<compile_context>
chip_gen: v7x
topology: tpu7x:2x2x1
jax: 0.10.0
libtpu: 0.0.40
codegen_flags: <defaults>
</compile_context>

<pallas_src>
import jax
import jax.numpy as jnp
from jax.experimental import pallas as pl

# ---------------- problem sizes (small, consistent with the module) ----------
B, N, D = 2, 8, 32          # batch, text seq len, hidden dim
H, DH = 4, 8                # heads, dim per head (inner dim = H*DH = 32)
T, M = 2, 4                 # num media per sample, visual tokens per media
TM = T * M
FF = 4 * D                  # feed-forward hidden (mult = 4)
SCALE = DH ** -0.5
EPS = 1e-5
NEG = -1e30

N_XW = 12                   # number of gated-xattn weight refs
N_DW = 16                   # number of decoder weight refs


# ---------------- in-kernel helpers ------------------------------------------
def _layernorm(x, g, b):
    mu = jnp.mean(x, axis=-1, keepdims=True)
    var = jnp.mean((x - mu) ** 2, axis=-1, keepdims=True)
    return (x - mu) * jax.lax.rsqrt(var + EPS) * g + b


def _gelu(x):
    # TODO(synk): PyTorch nn.GELU() uses exact erf; tanh approximation used here
    # to stay on the TPU EUP fast path (max abs error ~1e-3).
    c = 0.7978845608028654  # sqrt(2/pi)
    return 0.5 * x * (1.0 + jnp.tanh(c * (x + 0.044715 * x * x * x)))


def _softmax(s):
    s = s - jnp.max(s, axis=-1, keepdims=True)
    p = jnp.exp(s)
    return p * pl.reciprocal(jnp.sum(p, axis=-1, keepdims=True), approx=True)


def _bf16(x):
    return x.astype(jnp.bfloat16)


# ---------------- gated cross-attention block (in-kernel) --------------------
def _xattn_block(x, vis_ref, tt_ref, xw):
    (lnag, lnab, wq, wk, wv, wo, gate_a, lnfg, lnfb, wf1, wf2, gate_f) = xw

    # ---- MaskedCrossAttention (scale already folded into wq) ----
    xn = _layernorm(x, lnag[...], lnab[...])                 # (B*N, D) f32
    media = vis_ref[...].reshape(B * TM, D)                  # (B*TM, D) bf16
    q = jnp.dot(_bf16(xn), wq[...], preferred_element_type=jnp.float32)
    k = jnp.dot(media, wk[...], preferred_element_type=jnp.float32)
    v = jnp.dot(media, wv[...], preferred_element_type=jnp.float32)
    q3 = q.reshape(B, N, H * DH)
    k3 = k.reshape(B, TM, H * DH)
    v3 = v.reshape(B, TM, H * DH)

    # masks built in-kernel from text_time (B, N, 1) int32.
    # attend iff media_time == text_time  <=>  (tt-1)*M <= m_idx < tt*M
    tt = tt_ref[...]                                                   # (B,N,1)
    m_idx = jax.lax.broadcasted_iota(jnp.int32, (1, 1, TM), 2)         # (1,1,TM)
    attend_ok = jnp.logical_and(m_idx >= (tt - 1) * M, m_idx < tt * M)  # (B,N,TM)
    has_media = tt > 0                                                 # (B,N,1)

    wo_full = wo[...]                                        # (H*DH, D) bf16
    attn = jnp.zeros((B * N, D), jnp.float32)
    for h in range(H):                                       # static unroll, no concat
        sl = slice(h * DH, (h + 1) * DH)
        qh = _bf16(q3[:, :, sl])
        kh = _bf16(k3[:, :, sl])
        vh = _bf16(v3[:, :, sl])
        s = jnp.einsum('bnk,bmk->bnm', qh, kh, preferred_element_type=jnp.float32)
        s = jnp.where(attend_ok, s, NEG)
        p = _softmax(s)
        p = jnp.where(has_media, p, 0.0)                     # zero rows with no media
        oh = jnp.einsum('bnm,bmk->bnk', _bf16(p), vh,
                        preferred_element_type=jnp.float32)  # (B,N,DH)
        attn += jnp.dot(_bf16(oh.reshape(B * N, DH)), wo_full[sl, :],
                        preferred_element_type=jnp.float32)

    x = x + gate_a[...] * attn                               # gate already tanh'd

    # ---- gated feed-forward (LN -> Linear -> GELU -> Linear, no biases) ----
    xn = _layernorm(x, lnfg[...], lnfb[...])
    h1 = _gelu(jnp.dot(_bf16(xn), wf1[...], preferred_element_type=jnp.float32))
    ff = jnp.dot(_bf16(h1), wf2[...], preferred_element_type=jnp.float32)
    x = x + gate_f[...] * ff
    return x


# ---------------- decoder layer (pre-LN self-attn + MLP, in-kernel) ----------
def _decoder_block(x, am_ref, dw):
    (ln1g, ln1b, wq, bq, wk, bk, wv, bv, wo, bo,
     ln2g, ln2b, w1, b1, w2, b2) = dw

    # ---- self attention (scale folded into wq/bq) ----
    xn = _layernorm(x, ln1g[...], ln1b[...])                 # (B*N, D) f32
    xnb = _bf16(xn)
    q = jnp.dot(xnb, wq[...], preferred_element_type=jnp.float32) + bq[...]
    k = jnp.dot(xnb, wk[...], preferred_element_type=jnp.float32) + bk[...]
    v = jnp.dot(xnb, wv[...], preferred_element_type=jnp.float32) + bv[...]
    q3 = q.reshape(B, N, H * DH)
    k3 = k.reshape(B, N, H * DH)
    v3 = v.reshape(B, N, H * DH)

    # causal + padding bias built in-kernel from attention_mask (B, 1, N)
    row = jax.lax.broadcasted_iota(jnp.int32, (1, N, N), 1)
    col = jax.lax.broadcasted_iota(jnp.int32, (1, N, N), 2)
    allowed = jnp.logical_and(col <= row, am_ref[...] > 0.0)  # (B,N,N)
    bias = jnp.where(allowed, 0.0, NEG)

    wo_full = wo[...]
    attn = jnp.zeros((B * N, D), jnp.float32)
    for h in range(H):
        sl = slice(h * DH, (h + 1) * DH)
        qh = _bf16(q3[:, :, sl])
        kh = _bf16(k3[:, :, sl])
        vh = _bf16(v3[:, :, sl])
        s = jnp.einsum('bnk,bmk->bnm', qh, kh,
                       preferred_element_type=jnp.float32) + bias
        p = _softmax(s)
        oh = jnp.einsum('bnm,bmk->bnk', _bf16(p), vh,
                        preferred_element_type=jnp.float32)
        attn += jnp.dot(_bf16(oh.reshape(B * N, DH)), wo_full[sl, :],
                        preferred_element_type=jnp.float32)

    x = x + attn + bo[...]

    # ---- MLP ----
    xn = _layernorm(x, ln2g[...], ln2b[...])
    h1 = _gelu(jnp.dot(_bf16(xn), w1[...], preferred_element_type=jnp.float32)
               + b1[...])
    x = x + jnp.dot(_bf16(h1), w2[...], preferred_element_type=jnp.float32) + b2[...]
    return x


# ---------------- fused kernels -----------------------------------------------
def fused_kernel(*refs):
    lang_ref, vis_ref, tt_ref, am_ref = refs[0:4]
    xw = refs[4:4 + N_XW]
    dw = refs[4 + N_XW:4 + N_XW + N_DW]
    out_ref = refs[4 + N_XW + N_DW]

    x = lang_ref[...].reshape(B * N, D)          # whole batch in one block
    x = _xattn_block(x, vis_ref, tt_ref, xw)
    x = _decoder_block(x, am_ref, dw)
    out_ref[...] = x.reshape(B, N, D).astype(out_ref.dtype)


def decoder_only_kernel(*refs):
    lang_ref, am_ref = refs[0:2]
    dw = refs[2:2 + N_DW]
    out_ref = refs[2 + N_DW]

    x = lang_ref[...].reshape(B * N, D)
    x = _decoder_block(x, am_ref, dw)
    out_ref[...] = x.reshape(B, N, D).astype(out_ref.dtype)


# ---------------- pallas_call wrappers ----------------------------------------
def flamingo_fused_forward(lang_x, vis_flat_bf16, text_time, attn_mask_b1n, xw, dw):
    # single pallas_call, no grid: every input is one whole-array VMEM block.
    return pl.pallas_call(
        fused_kernel,
        out_shape=jax.ShapeDtypeStruct((B, N, D), jnp.float32),
    )(lang_x.astype(jnp.float32), vis_flat_bf16, text_time, attn_mask_b1n, *xw, *dw)


def decoder_only_forward(lang_x, attn_mask_b1n, dw):
    return pl.pallas_call(
        decoder_only_kernel,
        out_shape=jax.ShapeDtypeStruct((B, N, D), jnp.float32),
    )(lang_x.astype(jnp.float32), attn_mask_b1n, *dw)


# ---------------- parameter prep (scale/tanh folding + bf16 cast) -------------
def _prep_xattn(p):
    return [
        p["ln_attn_g"], p["ln_attn_b"],
        (p["wq"] * SCALE).astype(jnp.bfloat16),      # fold q scale into W_q
        p["wk"].astype(jnp.bfloat16),
        p["wv"].astype(jnp.bfloat16),
        p["wo"].astype(jnp.bfloat16),
        jnp.tanh(p["attn_gate"]),                    # pre-tanh the gate
        p["ln_ff_g"], p["ln_ff_b"],
        p["wf1"].astype(jnp.bfloat16),
        p["wf2"].astype(jnp.bfloat16),
        jnp.tanh(p["ff_gate"]),
    ]


def _prep_decoder(p):
    return [
        p["ln1_g"], p["ln1_b"],
        (p["wq"] * SCALE).astype(jnp.bfloat16), p["bq"] * SCALE,
        p["wk"].astype(jnp.bfloat16), p["bk"],
        p["wv"].astype(jnp.bfloat16), p["bv"],
        p["wo"].astype(jnp.bfloat16), p["bo"],
        p["ln2_g"], p["ln2_b"],
        p["w1"].astype(jnp.bfloat16), p["b1"],
        p["w2"].astype(jnp.bfloat16), p["b2"],
    ]


def _text_time(media_locations, attend_previous):
    """Replicates open_flamingo MaskedCrossAttention text_time (B, N, 1) int32."""
    ml = media_locations.astype(jnp.int32)
    tt = jnp.cumsum(ml, axis=-1)
    if not attend_previous:
        tt = jnp.where(media_locations, tt, tt + 1)
        num_media = jnp.sum(ml, axis=-1, keepdims=True)
        tt = jnp.where(tt > num_media, 0, tt)
    return tt[:, :, None].astype(jnp.int32)


# ---------------- FlamingoLayer (JAX/Pallas version) --------------------------
class FlamingoLayer:
    def __init__(self, gated_cross_attn_params, decoder_params):
        self.xw = (_prep_xattn(gated_cross_attn_params)
                   if gated_cross_attn_params is not None else None)
        self.dw = _prep_decoder(decoder_params)
        self.vis_x = None
        self.media_locations = None
        self.attend_previous = True

    def is_conditioned(self):
        return self.vis_x is not None

    def condition_vis_x(self, vis_x):
        self.vis_x = vis_x

    def condition_media_locations(self, media_locations):
        self.media_locations = media_locations

    def condition_attend_previous(self, attend_previous):
        self.attend_previous = attend_previous

    def forward(self, lang_x, attention_mask=None):
        if attention_mask is None:
            am = jnp.ones((B, 1, N), jnp.float32)
        else:
            am = attention_mask.astype(jnp.float32).reshape(B, 1, N)

        if self.xw is None:
            return decoder_only_forward(lang_x, am, self.dw)
        if self.vis_x is None:
            raise ValueError("vis_x must be conditioned before forward pass")
        if self.media_locations is None:
            raise ValueError("media_locations must be conditioned before forward pass")

        tt = _text_time(self.media_locations, self.attend_previous)
        vis_flat = self.vis_x.reshape(B, TM, D).astype(jnp.bfloat16)
        return flamingo_fused_forward(lang_x, vis_flat, tt, am, self.xw, self.dw)


# ---------------- deterministic parameter init --------------------------------
def init_params(key):
    ks = jax.random.split(key, 16)
    s = 0.05

    def w(k, shape):
        return (jax.random.normal(k, shape, jnp.float32) * s).astype(jnp.float32)

    xattn = dict(
        ln_attn_g=jnp.ones((1, D), jnp.float32),
        ln_attn_b=jnp.zeros((1, D), jnp.float32),
        wq=w(ks[0], (D, H * DH)),
        wk=w(ks[1], (D, H * DH)),
        wv=w(ks[2], (D, H * DH)),
        wo=w(ks[3], (H * DH, D)),
        # real Flamingo inits gates at 0 (tanh(0)=0); use 0.5 so the path is exercised
        attn_gate=jnp.full((1, 1), 0.5, jnp.float32),
        ln_ff_g=jnp.ones((1, D), jnp.float32),
        ln_ff_b=jnp.zeros((1, D), jnp.float32),
        wf1=w(ks[4], (D, FF)),
        wf2=w(ks[5], (FF, D)),
        ff_gate=jnp.full((1, 1), 0.5, jnp.float32),
    )
    decoder = dict(
        ln1_g=jnp.ones((1, D), jnp.float32),
        ln1_b=jnp.zeros((1, D), jnp.float32),
        wq=w(ks[6], (D, H * DH)), bq=jnp.zeros((1, H * DH), jnp.float32),
        wk=w(ks[7], (D, H * DH)), bk=jnp.zeros((1, H * DH), jnp.float32),
        wv=w(ks[8], (D, H * DH)), bv=jnp.zeros((1, H * DH), jnp.float32),
        wo=w(ks[9], (H * DH, D)), bo=jnp.zeros((1, D), jnp.float32),
        ln2_g=jnp.ones((1, D), jnp.float32),
        ln2_b=jnp.zeros((1, D), jnp.float32),
        w1=w(ks[10], (D, FF)), b1=jnp.zeros((1, FF), jnp.float32),
        w2=w(ks[11], (FF, D)), b2=jnp.zeros((1, D), jnp.float32),
    )
    return xattn, decoder


# ---------------- main ---------------------------------------------------------
if __name__ == "__main__":
    root = jax.random.PRNGKey(0)
    k_param, k_lang, k_vis = jax.random.split(root, 3)

    xattn_params, decoder_params = init_params(k_param)

    lang_x = jax.random.normal(k_lang, (B, N, D), jnp.float32)
    vis_x = jax.random.normal(k_vis, (B, T, M, D), jnp.float32)

    # two media tokens per sequence (T = 2), at positions 1 and 4
    media_locations = jnp.zeros((B, N), jnp.bool_).at[:, 1].set(True).at[:, 4].set(True)
    # padding mask: last token of batch 1 is padding
    attention_mask = jnp.ones((B, N), jnp.float32).at[1, -1].set(0.0)

    layer = FlamingoLayer(xattn_params, decoder_params)
    layer.condition_vis_x(vis_x)
    layer.condition_media_locations(media_locations)
    layer.condition_attend_previous(True)

    out = layer.forward(lang_x, attention_mask=attention_mask)
    out = jax.block_until_ready(out)

    assert out.shape == (B, N, D), out.shape
    assert bool(jnp.all(jnp.isfinite(out)))
    print("KERNEL_OK")
</pallas_src>

<mosaic_0001>
module attributes {stable_mosaic.version = 11 : i64} {
  func.func @fused_kernel(%arg0: memref<2x8x32xf32, #tpu.memory_space<vmem>>, %arg1: memref<2x8x32xbf16, #tpu.memory_space<vmem>>, %arg2: memref<2x8x1xi32, #tpu.memory_space<vmem>>, %arg3: memref<2x1x8xf32, #tpu.memory_space<vmem>>, %arg4: memref<1x32xf32, #tpu.memory_space<vmem>>, %arg5: memref<1x32xf32, #tpu.memory_space<vmem>>, %arg6: memref<32x32xbf16, #tpu.memory_space<vmem>>, %arg7: memref<32x32xbf16, #tpu.memory_space<vmem>>, %arg8: memref<32x32xbf16, #tpu.memory_space<vmem>>, %arg9: memref<32x32xbf16, #tpu.memory_space<vmem>>, %arg10: memref<1x1xf32, #tpu.memory_space<vmem>>, %arg11: memref<1x32xf32, #tpu.memory_space<vmem>>, %arg12: memref<1x32xf32, #tpu.memory_space<vmem>>, %arg13: memref<32x128xbf16, #tpu.memory_space<vmem>>, %arg14: memref<128x32xbf16, #tpu.memory_space<vmem>>, %arg15: memref<1x1xf32, #tpu.memory_space<vmem>>, %arg16: memref<1x32xf32, #tpu.memory_space<vmem>>, %arg17: memref<1x32xf32, #tpu.memory_space<vmem>>, %arg18: memref<32x32xbf16, #tpu.memory_space<vmem>>, %arg19: memref<1x32xf32, #tpu.memory_space<vmem>>, %arg20: memref<32x32xbf16, #tpu.memory_space<vmem>>, %arg21: memref<1x32xf32, #tpu.memory_space<vmem>>, %arg22: memref<32x32xbf16, #tpu.memory_space<vmem>>, %arg23: memref<1x32xf32, #tpu.memory_space<vmem>>, %arg24: memref<32x32xbf16, #tpu.memory_space<vmem>>, %arg25: memref<1x32xf32, #tpu.memory_space<vmem>>, %arg26: memref<1x32xf32, #tpu.memory_space<vmem>>, %arg27: memref<1x32xf32, #tpu.memory_space<vmem>>, %arg28: memref<32x128xbf16, #tpu.memory_space<vmem>>, %arg29: memref<1x128xf32, #tpu.memory_space<vmem>>, %arg30: memref<128x32xbf16, #tpu.memory_space<vmem>>, %arg31: memref<1x32xf32, #tpu.memory_space<vmem>>, %arg32: memref<2x8x32xf32, #tpu.memory_space<vmem>>) attributes {dimension_semantics = [], scalar_prefetch = 0 : i64, scratch_operands = 0 : i64, tpu.core_type = #tpu.core_type<tc>} {
    %c0 = arith.constant 0 : index
    %c0_0 = arith.constant 0 : index
    %c0_1 = arith.constant 0 : index
    %0 = vector.load %arg0[%c0, %c0_0, %c0_1] : memref<2x8x32xf32, #tpu.memory_space<vmem>>, vector<2x8x32xf32>
    %1 = vector.shape_cast %0 : vector<2x8x32xf32> to vector<16x32xf32>
    %c0_2 = arith.constant 0 : index
    %c0_3 = arith.constant 0 : index
    %2 = vector.load %arg4[%c0_2, %c0_3] : memref<1x32xf32, #tpu.memory_space<vmem>>, vector<1x32xf32>
    %c0_4 = arith.constant 0 : index
    %c0_5 = arith.constant 0 : index
    %3 = vector.load %arg5[%c0_4, %c0_5] : memref<1x32xf32, #tpu.memory_space<vmem>>, vector<1x32xf32>
    %cst = arith.constant dense<0.000000e+00> : vector<16xf32>
    %4 = vector.multi_reduction <add>, %1, %cst [1] : vector<16x32xf32> to vector<16xf32>
    %5 = vector.shape_cast %4 : vector<16xf32> to vector<16x1xf32>
    %cst_6 = arith.constant 3.200000e+01 : f32
    %6 = vector.broadcast %cst_6 : f32 to vector<16x1xf32>
    %7 = arith.divf %5, %6 : vector<16x1xf32>
    %8 = vector.broadcast %7 : vector<16x1xf32> to vector<16x32xf32>
    %9 = arith.subf %1, %8 : vector<16x32xf32>
    %10 = arith.mulf %9, %9 : vector<16x32xf32>
    %cst_7 = arith.constant dense<0.000000e+00> : vector<16xf32>
    %11 = vector.multi_reduction <add>, %10, %cst_7 [1] : vector<16x32xf32> to vector<16xf32>
    %12 = vector.shape_cast %11 : vector<16xf32> to vector<16x1xf32>
    %cst_8 = arith.constant 3.200000e+01 : f32
    %13 = vector.broadcast %cst_8 : f32 to vector<16x1xf32>
    %14 = arith.divf %12, %13 : vector<16x1xf32>
    %15 = vector.broadcast %7 : vector<16x1xf32> to vector<16x32xf32>
    %16 = arith.subf %1, %15 : vector<16x32xf32>
    %cst_9 = arith.constant 9.99999974E-6 : f32
    %17 = vector.broadcast %cst_9 : f32 to vector<16x1xf32>
    %18 = arith.addf %14, %17 : vector<16x1xf32>
    %19 = math.rsqrt %18 : vector<16x1xf32>
    %20 = vector.broadcast %19 : vector<16x1xf32> to vector<16x32xf32>
    %21 = arith.mulf %16, %20 : vector<16x32xf32>
    %22 = vector.broadcast %2 : vector<1x32xf32> to vector<16x32xf32>
    %23 = arith.mulf %21, %22 : vector<16x32xf32>
    %24 = vector.broadcast %3 : vector<1x32xf32> to vector<16x32xf32>
    %25 = arith.addf %23, %24 : vector<16x32xf32>
    %c0_10 = arith.constant 0 : index
    %c0_11 = arith.constant 0 : index
    %c0_12 = arith.constant 0 : index
    %26 = vector.load %arg1[%c0_10, %c0_11, %c0_12] : memref<2x8x32xbf16, #tpu.memory_space<vmem>>, vector<2x8x32xbf16>
    %27 = vector.shape_cast %26 : vector<2x8x32xbf16> to vector<16x32xbf16>
    %28 = arith.truncf %25 : vector<16x32xf32> to vector<16x32xbf16>
    %c0_13 = arith.constant 0 : index
    %c0_14 = arith.constant 0 : index
    %29 = vector.load %arg6[%c0_13, %c0_14] : memref<32x32xbf16, #tpu.memory_space<vmem>>, vector<32x32xbf16>
    %cst_15 = arith.constant dense<0.000000e+00> : vector<16x32xf32>
    %30 = tpu.matmul %28, %29, %cst_15 {dimension_numbers = #tpu.dot_dimension_numbers<[1], [0], [0], [1], [0, 0, 1, 1], [], []>} : vector<16x32xbf16>, vector<32x32xbf16>, vector<16x32xf32> -> vector<16x32xf32>
    %c0_16 = arith.constant 0 : index
    %c0_17 = arith.constant 0 : index
    %31 = vector.load %arg7[%c0_16, %c0_17] : memref<32x32xbf16, #tpu.memory_space<vmem>>, vector<32x32xbf16>
    %cst_18 = arith.constant dense<0.000000e+00> : vector<16x32xf32>
    %32 = tpu.matmul %27, %31, %cst_18 {dimension_numbers = #tpu.dot_dimension_numbers<[1], [0], [0], [1], [0, 0, 1, 1], [], []>} : vector<16x32xbf16>, vector<32x32xbf16>, vector<16x32xf32> -> vector<16x32xf32>
    %c0_19 = arith.constant 0 : index
    %c0_20 = arith.constant 0 : index
    %33 = vector.load %arg8[%c0_19, %c0_20] : memref<32x32xbf16, #tpu.memory_space<vmem>>, vector<32x32xbf16>
    %cst_21 = arith.constant dense<0.000000e+00> : vector<16x32xf32>
    %34 = tpu.matmul %27, %33, %cst_21 {dimension_numbers = #tpu.dot_dimension_numbers<[1], [0], [0], [1], [0, 0, 1, 1], [], []>} : vector<16x32xbf16>, vector<32x32xbf16>, vector<16x32xf32> -> vector<16x32xf32>
    %35 = vector.shape_cast %30 : vector<16x32xf32> to vector<2x8x32xf32>
    %36 = vector.shape_cast %32 : vector<16x32xf32> to vector<2x8x32xf32>
    %37 = vector.shape_cast %34 : vector<16x32xf32> to vector<2x8x32xf32>
    %c0_22 = arith.constant 0 : index
    %c0_23 = arith.constant 0 : index
    %c0_24 = arith.constant 0 : index
    %38 = vector.load %arg2[%c0_22, %c0_23, %c0_24] : memref<2x8x1xi32, #tpu.memory_space<vmem>>, vector<2x8x1xi32>
    %39 = tpu.iota {dimensions = array<i32: 2>} : vector<1x1x8xi32>
    %c1_i32 = arith.constant 1 : i32
    %40 = vector.broadcast %c1_i32 : i32 to vector<2x8x1xi32>
    %41 = arith.subi %38, %40 : vector<2x8x1xi32>
    %c4_i32 = arith.constant 4 : i32
    %42 = vector.broadcast %c4_i32 : i32 to vector<2x8x1xi32>
    %43 = arith.muli %41, %42 : vector<2x8x1xi32>
    %44 = vector.broadcast %39 : vector<1x1x8xi32> to vector<2x8x8xi32>
    %45 = vector.broadcast %43 : vector<2x8x1xi32> to vector<2x8x8xi32>
    %46 = arith.cmpi sge, %44, %45 : vector<2x8x8xi32>
    %c4_i32_25 = arith.constant 4 : i32
    %47 = vector.broadcast %c4_i32_25 : i32 to vector<2x8x1xi32>
    %48 = arith.muli %38, %47 : vector<2x8x1xi32>
    %49 = vector.broadcast %39 : vector<1x1x8xi32> to vector<2x8x8xi32>
    %50 = vector.broadcast %48 : vector<2x8x1xi32> to vector<2x8x8xi32>
    %51 = arith.cmpi slt, %49, %50 : vector<2x8x8xi32>
    %52 = arith.andi %46, %51 : vector<2x8x8xi1>
    %c0_i32 = arith.constant 0 : i32
    %53 = vector.broadcast %c0_i32 : i32 to vector<2x8x1xi32>
    %54 = arith.cmpi sgt, %38, %53 : vector<2x8x1xi32>
    %c0_26 = arith.constant 0 : index
    %c0_27 = arith.constant 0 : index
    %55 = vector.load %arg9[%c0_26, %c0_27] : memref<32x32xbf16, #tpu.memory_space<vmem>>, vector<32x32xbf16>
    %cst_28 = arith.constant 0.000000e+00 : f32
    %56 = vector.broadcast %cst_28 : f32 to vector<16x32xf32>
    %57 = vector.extract_strided_slice %35 {offsets = [0, 0, 0], sizes = [2, 8, 8], strides = [1, 1, 1]} : vector<2x8x32xf32> to vector<2x8x8xf32>
    %58 = arith.truncf %57 : vector<2x8x8xf32> to vector<2x8x8xbf16>
    %59 = vector.extract_strided_slice %36 {offsets = [0, 0, 0], sizes = [2, 8, 8], strides = [1, 1, 1]} : vector<2x8x32xf32> to vector<2x8x8xf32>
    %60 = arith.truncf %59 : vector<2x8x8xf32> to vector<2x8x8xbf16>
    %61 = vector.extract_strided_slice %37 {offsets = [0, 0, 0], sizes = [2, 8, 8], strides = [1, 1, 1]} : vector<2x8x32xf32> to vector<2x8x8xf32>
    %62 = arith.truncf %61 : vector<2x8x8xf32> to vector<2x8x8xbf16>
    "tpu.trace_start"() <{level = 10 : i32, message = "bnk,bmk->bnm"}> : () -> ()
    %cst_29 = arith.constant dense<0.000000e+00> : vector<2x8x8xf32>
    %63 = tpu.matmul %58, %60, %cst_29 {dimension_numbers = #tpu.dot_dimension_numbers<[2], [2], [1], [1], [0, 0, 0, 1, 1, 1], [0], [0]>} : vector<2x8x8xbf16>, vector<2x8x8xbf16>, vector<2x8x8xf32> -> vector<2x8x8xf32>
    %cst_30 = arith.constant -1.000000e+30 : f32
    "tpu.trace_stop"() : () -> ()
    %64 = vector.broadcast %cst_30 : f32 to vector<2x8x8xf32>
    %65 = arith.select %52, %63, %64 : vector<2x8x8xi1>, vector<2x8x8xf32>
    %cst_31 = arith.constant dense<0xFF800000> : vector<2x8xf32>
    %66 = vector.multi_reduction <maximumf>, %65, %cst_31 [2] : vector<2x8x8xf32> to vector<2x8xf32>
    %67 = vector.shape_cast %66 : vector<2x8xf32> to vector<2x8x1xf32>
    %68 = vector.broadcast %67 : vector<2x8x1xf32> to vector<2x8x8xf32>
    %69 = arith.subf %65, %68 : vector<2x8x8xf32>
    %70 = math.exp %69 : vector<2x8x8xf32>
    %cst_32 = arith.constant dense<0.000000e+00> : vector<2x8xf32>
    %71 = vector.multi_reduction <add>, %70, %cst_32 [2] : vector<2x8x8xf32> to vector<2x8xf32>
    %72 = vector.shape_cast %71 : vector<2x8xf32> to vector<2x8x1xf32>
    %73 = tpu.reciprocal %72 {approx = true} : vector<2x8x1xf32> -> vector<2x8x1xf32>
    %74 = vector.broadcast %73 : vector<2x8x1xf32> to vector<2x8x8xf32>
    %75 = arith.mulf %70, %74 : vector<2x8x8xf32>
    %cst_33 = arith.constant 0.000000e+00 : f32
    %76 = vector.shape_cast %54 : vector<2x8x1xi1> to vector<2x8x1xi1>
    %77 = vector.broadcast %76 : vector<2x8x1xi1> to vector<2x8x8xi1>
    %78 = vector.broadcast %cst_33 : f32 to vector<2x8x8xf32>
    %79 = arith.select %77, %75, %78 : vector<2x8x8xi1>, vector<2x8x8xf32>
    %80 = arith.truncf %79 : vector<2x8x8xf32> to vector<2x8x8xbf16>
    "tpu.trace_start"() <{level = 10 : i32, message = "bnm,bmk->bnk"}> : () -> ()
    %cst_34 = arith.constant dense<0.000000e+00> : vector<2x8x8xf32>
    %81 = tpu.matmul %80, %62, %cst_34 {dimension_numbers = #tpu.dot_dimension_numbers<[2], [1], [1], [2], [0, 0, 0, 1, 1, 2], [0], [0]>} : vector<2x8x8xbf16>, vector<2x8x8xbf16>, vector<2x8x8xf32> -> vector<2x8x8xf32>
    "tpu.trace_stop"() : () -> ()
    %82 = vector.shape_cast %81 : vector<2x8x8xf32> to vector<16x8xf32>
    %83 = arith.truncf %82 : vector<16x8xf32> to vector<16x8xbf16>
    %84 = vector.extract_strided_slice %55 {offsets = [0, 0], sizes = [8, 32], strides = [1, 1]} : vector<32x32xbf16> to vector<8x32xbf16>
    %cst_35 = arith.constant dense<0.000000e+00> : vector<16x32xf32>
    %85 = tpu.matmul %83, %84, %cst_35 {dimension_numbers = #tpu.dot_dimension_numbers<[1], [0], [0], [1], [0, 0, 1, 1], [], []>} : vector<16x8xbf16>, vector<8x32xbf16>, vector<16x32xf32> -> vector<16x32xf32>
    %86 = arith.addf %56, %85 : vector<16x32xf32>
    %87 = vector.extract_strided_slice %35 {offsets = [0, 0, 8], sizes = [2, 8, 8], strides = [1, 1, 1]} : vector<2x8x32xf32> to vector<2x8x8xf32>
    %88 = arith.truncf %87 : vector<2x8x8xf32> to vector<2x8x8xbf16>
    %89 = vector.extract_strided_slice %36 {offsets = [0, 0, 8], sizes = [2, 8, 8], strides = [1, 1, 1]} : vector<2x8x32xf32> to vector<2x8x8xf32>
    %90 = arith.truncf %89 : vector<2x8x8xf32> to vector<2x8x8xbf16>
    %91 = vector.extract_strided_slice %37 {offsets = [0, 0, 8], sizes = [2, 8, 8], strides = [1, 1, 1]} : vector<2x8x32xf32> to vector<2x8x8xf32>
    %92 = arith.truncf %91 : vector<2x8x8xf32> to vector<2x8x8xbf16>
    "tpu.trace_start"() <{level = 10 : i32, message = "bnk,bmk->bnm"}> : () -> ()
    %cst_36 = arith.constant dense<0.000000e+00> : vector<2x8x8xf32>
    %93 = tpu.matmul %88, %90, %cst_36 {dimension_numbers = #tpu.dot_dimension_numbers<[2], [2], [1], [1], [0, 0, 0, 1, 1, 1], [0], [0]>} : vector<2x8x8xbf16>, vector<2x8x8xbf16>, vector<2x8x8xf32> -> vector<2x8x8xf32>
    %cst_37 = arith.constant -1.000000e+30 : f32
    "tpu.trace_stop"() : () -> ()
    %94 = vector.broadcast %cst_37 : f32 to vector<2x8x8xf32>
    %95 = arith.select %52, %93, %94 : vector<2x8x8xi1>, vector<2x8x8xf32>
    %cst_38 = arith.constant dense<0xFF800000> : vector<2x8xf32>
    %96 = vector.multi_reduction <maximumf>, %95, %cst_38 [2] : vector<2x8x8xf32> to vector<2x8xf32>
    %97 = vector.shape_cast %96 : vector<2x8xf32> to vector<2x8x1xf32>
    %98 = vector.broadcast %97 : vector<2x8x1xf32> to vector<2x8x8xf32>
    %99 = arith.subf %95, %98 : vector<2x8x8xf32>
    %100 = math.exp %99 : vector<2x8x8xf32>
    %cst_39 = arith.constant dense<0.000000e+00> : vector<2x8xf32>
    %101 = vector.multi_reduction <add>, %100, %cst_39 [2] : vector<2x8x8xf32> to vector<2x8xf32>
    %102 = vector.shape_cast %101 : vector<2x8xf32> to vector<2x8x1xf32>
    %103 = tpu.reciprocal %102 {approx = true} : vector<2x8x1xf32> -> vector<2x8x1xf32>
    %104 = vector.broadcast %103 : vector<2x8x1xf32> to vector<2x8x8xf32>
    %105 = arith.mulf %100, %104 : vector<2x8x8xf32>
    %cst_40 = arith.constant 0.000000e+00 : f32
    %106 = vector.shape_cast %54 : vector<2x8x1xi1> to vector<2x8x1xi1>
    %107 = vector.broadcast %106 : vector<2x8x1xi1> to vector<2x8x8xi1>
    %108 = vector.broadcast %cst_40 : f32 to vector<2x8x8xf32>
    %109 = arith.select %107, %105, %108 : vector<2x8x8xi1>, vector<2x8x8xf32>
    %110 = arith.truncf %109 : vector<2x8x8xf32> to vector<2x8x8xbf16>
    "tpu.trace_start"() <{level = 10 : i32, message = "bnm,bmk->bnk"}> : () -> ()
    %cst_41 = arith.constant dense<0.000000e+00> : vector<2x8x8xf32>
    %111 = tpu.matmul %110, %92, %cst_41 {dimension_numbers = #tpu.dot_dimension_numbers<[2], [1], [1], [2], [0, 0, 0, 1, 1, 2], [0], [0]>} : vector<2x8x8xbf16>, vector<2x8x8xbf16>, vector<2x8x8xf32> -> vector<2x8x8xf32>
    "tpu.trace_stop"() : () -> ()
    %112 = vector.shape_cast %111 : vector<2x8x8xf32> to vector<16x8xf32>
    %113 = arith.truncf %112 : vector<16x8xf32> to vector<16x8xbf16>
    %114 = vector.extract_strided_slice %55 {offsets = [8, 0], sizes = [8, 32], strides = [1, 1]} : vector<32x32xbf16> to vector<8x32xbf16>
    %cst_42 = arith.constant dense<0.000000e+00> : vector<16x32xf32>
    %115 = tpu.matmul %113, %114, %cst_42 {dimension_numbers = #tpu.dot_dimension_numbers<[1], [0], [0], [1], [0, 0, 1, 1], [], []>} : vector<16x8xbf16>, vector<8x32xbf16>, vector<16x32xf32> -> vector<16x32xf32>
    %116 = arith.addf %86, %115 : vector<16x32xf32>
    %117 = vector.extract_strided_slice %35 {offsets = [0, 0, 16], sizes = [2, 8, 8], strides = [1, 1, 1]} : vector<2x8x32xf32> to vector<2x8x8xf32>
    %118 = arith.truncf %117 : vector<2x8x8xf32> to vector<2x8x8xbf16>
    %119 = vector.extract_strided_slice %36 {offsets = [0, 0, 16], sizes = [2, 8, 8], strides = [1, 1, 1]} : vector<2x8x32xf32> to vector<2x8x8xf32>
    %120 = arith.truncf %119 : vector<2x8x8xf32> to vector<2x8x8xbf16>
    %121 = vector.extract_strided_slice %37 {offsets = [0, 0, 16], sizes = [2, 8, 8], strides = [1, 1, 1]} : vector<2x8x32xf32> to vector<2x8x8xf32>
    %122 = arith.truncf %121 : vector<2x8x8xf32> to vector<2x8x8xbf16>
    "tpu.trace_start"() <{level = 10 : i32, message = "bnk,bmk->bnm"}> : () -> ()
    %cst_43 = arith.constant dense<0.000000e+00> : vector<2x8x8xf32>
    %123 = tpu.matmul %118, %120, %cst_43 {dimension_numbers = #tpu.dot_dimension_numbers<[2], [2], [1], [1], [0, 0, 0, 1, 1, 1], [0], [0]>} : vector<2x8x8xbf16>, vector<2x8x8xbf16>, vector<2x8x8xf32> -> vector<2x8x8xf32>
    %cst_44 = arith.constant -1.000000e+30 : f32
    "tpu.trace_stop"() : () -> ()
    %124 = vector.broadcast %cst_44 : f32 to vector<2x8x8xf32>
    %125 = arith.select %52, %123, %124 : vector<2x8x8xi1>, vector<2x8x8xf32>
    %cst_45 = arith.constant dense<0xFF800000> : vector<2x8xf32>
    %126 = vector.multi_reduction <maximumf>, %125, %cst_45 [2] : vector<2x8x8xf32> to vector<2x8xf32>
    %127 = vector.shape_cast %126 : vector<2x8xf32> to vector<2x8x1xf32>
    %128 = vector.broadcast %127 : vector<2x8x1xf32> to vector<2x8x8xf32>
    %129 = arith.subf %125, %128 : vector<2x8x8xf32>
    %130 = math.exp %129 : vector<2x8x8xf32>
    %cst_46 = arith.constant dense<0.000000e+00> : vector<2x8xf32>
    %131 = vector.multi_reduction <add>, %130, %cst_46 [2] : vector<2x8x8xf32> to vector<2x8xf32>
    %132 = vector.shape_cast %131 : vector<2x8xf32> to vector<2x8x1xf32>
    %133 = tpu.reciprocal %132 {approx = true} : vector<2x8x1xf32> -> vector<2x8x1xf32>
    %134 = vector.broadcast %133 : vector<2x8x1xf32> to vector<2x8x8xf32>
    %135 = arith.mulf %130, %134 : vector<2x8x8xf32>
    %cst_47 = arith.constant 0.000000e+00 : f32
    %136 = vector.shape_cast %54 : vector<2x8x1xi1> to vector<2x8x1xi1>
    %137 = vector.broadcast %136 : vector<2x8x1xi1> to vector<2x8x8xi1>
    %138 = vector.broadcast %cst_47 : f32 to vector<2x8x8xf32>
    %139 = arith.select %137, %135, %138 : vector<2x8x8xi1>, vector<2x8x8xf32>
    %140 = arith.truncf %139 : vector<2x8x8xf32> to vector<2x8x8xbf16>
    "tpu.trace_start"() <{level = 10 : i32, message = "bnm,bmk->bnk"}> : () -> ()
    %cst_48 = arith.constant dense<0.000000e+00> : vector<2x8x8xf32>
    %141 = tpu.matmul %140, %122, %cst_48 {dimension_numbers = #tpu.dot_dimension_numbers<[2], [1], [1], [2], [0, 0, 0, 1, 1, 2], [0], [0]>} : vector<2x8x8xbf16>, vector<2x8x8xbf16>, vector<2x8x8xf32> -> vector<2x8x8xf32>
    "tpu.trace_stop"() : () -> ()
    %142 = vector.shape_cast %141 : vector<2x8x8xf32> to vector<16x8xf32>
    %143 = arith.truncf %142 : vector<16x8xf32> to vector<16x8xbf16>
    %144 = vector.extract_strided_slice %55 {offsets = [16, 0], sizes = [8, 32], strides = [1, 1]} : vector<32x32xbf16> to vector<8x32xbf16>
    %cst_49 = arith.constant dense<0.000000e+00> : vector<16x32xf32>
    %145 = tpu.matmul %143, %144, %cst_49 {dimension_numbers = #tpu.dot_dimension_numbers<[1], [0], [0], [1], [0, 0, 1, 1], [], []>} : vector<16x8xbf16>, vector<8x32xbf16>, vector<16x32xf32> -> vector<16x32xf32>
    %146 = arith.addf %116, %145 : vector<16x32xf32>
    %147 = vector.extract_strided_slice %35 {offsets = [0, 0, 24], sizes = [2, 8, 8], strides = [1, 1, 1]} : vector<2x8x32xf32> to vector<2x8x8xf32>
    %148 = arith.truncf %147 : vector<2x8x8xf32> to vector<2x8x8xbf16>
    %149 = vector.extract_strided_slice %36 {offsets = [0, 0, 24], sizes = [2, 8, 8], strides = [1, 1, 1]} : vector<2x8x32xf32> to vector<2x8x8xf32>
    %150 = arith.truncf %149 : vector<2x8x8xf32> to vector<2x8x8xbf16>
    %151 = vector.extract_strided_slice %37 {offsets = [0, 0, 24], sizes = [2, 8, 8], strides = [1, 1, 1]} : vector<2x8x32xf32> to vector<2x8x8xf32>
    %152 = arith.truncf %151 : vector<2x8x8xf32> to vector<2x8x8xbf16>
    "tpu.trace_start"() <{level = 10 : i32, message = "bnk,bmk->bnm"}> : () -> ()
    %cst_50 = arith.constant dense<0.000000e+00> : vector<2x8x8xf32>
    %153 = tpu.matmul %148, %150, %cst_50 {dimension_numbers = #tpu.dot_dimension_numbers<[2], [2], [1], [1], [0, 0, 0, 1, 1, 1], [0], [0]>} : vector<2x8x8xbf16>, vector<2x8x8xbf16>, vector<2x8x8xf32> -> vector<2x8x8xf32>
    %cst_51 = arith.constant -1.000000e+30 : f32
    "tpu.trace_stop"() : () -> ()
    %154 = vector.broadcast %cst_51 : f32 to vector<2x8x8xf32>
    %155 = arith.select %52, %153, %154 : vector<2x8x8xi1>, vector<2x8x8xf32>
    %cst_52 = arith.constant dense<0xFF800000> : vector<2x8xf32>
    %156 = vector.multi_reduction <maximumf>, %155, %cst_52 [2] : vector<2x8x8xf32> to vector<2x8xf32>
    %157 = vector.shape_cast %156 : vector<2x8xf32> to vector<2x8x1xf32>
    %158 = vector.broadcast %157 : vector<2x8x1xf32> to vector<2x8x8xf32>
    %159 = arith.subf %155, %158 : vector<2x8x8xf32>
    %160 = math.exp %159 : vector<2x8x8xf32>
    %cst_53 = arith.constant dense<0.000000e+00> : vector<2x8xf32>
    %161 = vector.multi_reduction <add>, %160, %cst_53 [2] : vector<2x8x8xf32> to vector<2x8xf32>
    %162 = vector.shape_cast %161 : vector<2x8xf32> to vector<2x8x1xf32>
    %163 = tpu.reciprocal %162 {approx = true} : vector<2x8x1xf32> -> vector<2x8x1xf32>
    %164 = vector.broadcast %163 : vector<2x8x1xf32> to vector<2x8x8xf32>
    %165 = arith.mulf %160, %164 : vector<2x8x8xf32>
    %cst_54 = arith.constant 0.000000e+00 : f32
    %166 = vector.shape_cast %54 : vector<2x8x1xi1> to vector<2x8x1xi1>
    %167 = vector.broadcast %166 : vector<2x8x1xi1> to vector<2x8x8xi1>
    %168 = vector.broadcast %cst_54 : f32 to vector<2x8x8xf32>
    %169 = arith.select %167, %165, %168 : vector<2x8x8xi1>, vector<2x8x8xf32>
    %170 = arith.truncf %169 : vector<2x8x8xf32> to vector<2x8x8xbf16>
    "tpu.trace_start"() <{level = 10 : i32, message = "bnm,bmk->bnk"}> : () -> ()
    %cst_55 = arith.constant dense<0.000000e+00> : vector<2x8x8xf32>
    %171 = tpu.matmul %170, %152, %cst_55 {dimension_numbers = #tpu.dot_dimension_numbers<[2], [1], [1], [2], [0, 0, 0, 1, 1, 2], [0], [0]>} : vector<2x8x8xbf16>, vector<2x8x8xbf16>, vector<2x8x8xf32> -> vector<2x8x8xf32>
    "tpu.trace_stop"() : () -> ()
    %172 = vector.shape_cast %171 : vector<2x8x8xf32> to vector<16x8xf32>
    %173 = arith.truncf %172 : vector<16x8xf32> to vector<16x8xbf16>
    %174 = vector.extract_strided_slice %55 {offsets = [24, 0], sizes = [8, 32], strides = [1, 1]} : vector<32x32xbf16> to vector<8x32xbf16>
    %cst_56 = arith.constant dense<0.000000e+00> : vector<16x32xf32>
    %175 = tpu.matmul %173, %174, %cst_56 {dimension_numbers = #tpu.dot_dimension_numbers<[1], [0], [0], [1], [0, 0, 1, 1], [], []>} : vector<16x8xbf16>, vector<8x32xbf16>, vector<16x32xf32> -> vector<16x32xf32>
    %176 = arith.addf %146, %175 : vector<16x32xf32>
    %c0_57 = arith.constant 0 : index
    %c0_58 = arith.constant 0 : index
    %177 = vector.load %arg10[%c0_57, %c0_58] : memref<1x1xf32, #tpu.memory_space<vmem>>, vector<1x1xf32>
    %178 = vector.broadcast %177 : vector<1x1xf32> to vector<16x32xf32>
    %179 = arith.mulf %178, %176 : vector<16x32xf32>
    %180 = arith.addf %1, %179 : vector<16x32xf32>
    %c0_59 = arith.constant 0 : index
    %c0_60 = arith.constant 0 : index
    %181 = vector.load %arg11[%c0_59, %c0_60] : memref<1x32xf32, #tpu.memory_space<vmem>>, vector<1x32xf32>
    %c0_61 = arith.constant 0 : index
    %c0_62 = arith.constant 0 : index
    %182 = vector.load %arg12[%c0_61, %c0_62] : memref<1x32xf32, #tpu.memory_space<vmem>>, vector<1x32xf32>
    %cst_63 = arith.constant dense<0.000000e+00> : vector<16xf32>
    %183 = vector.multi_reduction <add>, %180, %cst_63 [1] : vector<16x32xf32> to vector<16xf32>
    %184 = vector.shape_cast %183 : vector<16xf32> to vector<16x1xf32>
    %cst_64 = arith.constant 3.200000e+01 : f32
    %185 = vector.broadcast %cst_64 : f32 to vector<16x1xf32>
    %186 = arith.divf %184, %185 : vector<16x1xf32>
    %187 = vector.broadcast %186 : vector<16x1xf32> to vector<16x32xf32>
    %188 = arith.subf %180, %187 : vector<16x32xf32>
    %189 = arith.mulf %188, %188 : vector<16x32xf32>
    %cst_65 = arith.constant dense<0.000000e+00> : vector<16xf32>
    %190 = vector.multi_reduction <add>, %189, %cst_65 [1] : vector<16x32xf32> to vector<16xf32>
    %191 = vector.shape_cast %190 : vector<16xf32> to vector<16x1xf32>
    %cst_66 = arith.constant 3.200000e+01 : f32
    %192 = vector.broadcast %cst_66 : f32 to vector<16x1xf32>
    %193 = arith.divf %191, %192 : vector<16x1xf32>
    %194 = vector.broadcast %186 : vector<16x1xf32> to vector<16x32xf32>
    %195 = arith.subf %180, %194 : vector<16x32xf32>
    %cst_67 = arith.constant 9.99999974E-6 : f32
    %196 = vector.broadcast %cst_67 : f32 to vector<16x1xf32>
    %197 = arith.addf %193, %196 : vector<16x1xf32>
    %198 = math.rsqrt %197 : vector<16x1xf32>
    %199 = vector.broadcast %198 : vector<16x1xf32> to vector<16x32xf32>
    %200 = arith.mulf %195, %199 : vector<16x32xf32>
    %201 = vector.broadcast %181 : vector<1x32xf32> to vector<16x32xf32>
    %202 = arith.mulf %200, %201 : vector<16x32xf32>
    %203 = vector.broadcast %182 : vector<1x32xf32> to vector<16x32xf32>
    %204 = arith.addf %202, %203 : vector<16x32xf32>
    %205 = arith.truncf %204 : vector<16x32xf32> to vector<16x32xbf16>
    %c0_68 = arith.constant 0 : index
    %c0_69 = arith.constant 0 : index
    %206 = vector.load %arg13[%c0_68, %c0_69] : memref<32x128xbf16, #tpu.memory_space<vmem>>, vector<32x128xbf16>
    %cst_70 = arith.constant dense<0.000000e+00> : vector<16x128xf32>
    %207 = tpu.matmul %205, %206, %cst_70 {dimension_numbers = #tpu.dot_dimension_numbers<[1], [0], [0], [1], [0, 0, 1, 1], [], []>} : vector<16x32xbf16>, vector<32x128xbf16>, vector<16x128xf32> -> vector<16x128xf32>
    %cst_71 = arith.constant 5.000000e-01 : f32
    %208 = vector.broadcast %cst_71 : f32 to vector<16x128xf32>
    %209 = arith.mulf %208, %207 : vector<16x128xf32>
    %cst_72 = arith.constant 4.471500e-02 : f32
    %210 = vector.broadcast %cst_72 : f32 to vector<16x128xf32>
    %211 = arith.mulf %210, %207 : vector<16x128xf32>
    %212 = arith.mulf %211, %207 : vector<16x128xf32>
    %213 = arith.mulf %212, %207 : vector<16x128xf32>
    %214 = arith.addf %207, %213 : vector<16x128xf32>
    %cst_73 = arith.constant 0.797884583 : f32
    %215 = vector.broadcast %cst_73 : f32 to vector<16x128xf32>
    %216 = arith.mulf %215, %214 : vector<16x128xf32>
    %217 = math.tanh %216 : vector<16x128xf32>
    %cst_74 = arith.constant 1.000000e+00 : f32
    %218 = vector.broadcast %cst_74 : f32 to vector<16x128xf32>
    %219 = arith.addf %218, %217 : vector<16x128xf32>
    %220 = arith.mulf %209, %219 : vector<16x128xf32>
    %221 = arith.truncf %220 : vector<16x128xf32> to vector<16x128xbf16>
    %c0_75 = arith.constant 0 : index
    %c0_76 = arith.constant 0 : index
    %222 = vector.load %arg14[%c0_75, %c0_76] : memref<128x32xbf16, #tpu.memory_space<vmem>>, vector<128x32xbf16>
    %cst_77 = arith.constant dense<0.000000e+00> : vector<16x32xf32>
    %223 = tpu.matmul %221, %222, %cst_77 {dimension_numbers = #tpu.dot_dimension_numbers<[1], [0], [0], [1], [0, 0, 1, 1], [], []>} : vector<16x128xbf16>, vector<128x32xbf16>, vector<16x32xf32> -> vector<16x32xf32>
    %c0_78 = arith.constant 0 : index
    %c0_79 = arith.constant 0 : index
    %224 = vector.load %arg15[%c0_78, %c0_79] : memref<1x1xf32, #tpu.memory_space<vmem>>, vector<1x1xf32>
    %225 = vector.broadcast %224 : vector<1x1xf32> to vector<16x32xf32>
    %226 = arith.mulf %225, %223 : vector<16x32xf32>
    %227 = arith.addf %180, %226 : vector<16x32xf32>
    %c0_80 = arith.constant 0 : index
    %c0_81 = arith.constant 0 : index
    %228 = vector.load %arg16[%c0_80, %c0_81] : memref<1x32xf32, #tpu.memory_space<vmem>>, vector<1x32xf32>
    %c0_82 = arith.constant 0 : index
    %c0_83 = arith.constant 0 : index
    %229 = vector.load %arg17[%c0_82, %c0_83] : memref<1x32xf32, #tpu.memory_space<vmem>>, vector<1x32xf32>
    %cst_84 = arith.constant dense<0.000000e+00> : vector<16xf32>
    %230 = vector.multi_reduction <add>, %227, %cst_84 [1] : vector<16x32xf32> to vector<16xf32>
    %231 = vector.shape_cast %230 : vector<16xf32> to vector<16x1xf32>
    %cst_85 = arith.constant 3.200000e+01 : f32
    %232 = vector.broadcast %cst_85 : f32 to vector<16x1xf32>
    %233 = arith.divf %231, %232 : vector<16x1xf32>
    %234 = vector.broadcast %233 : vector<16x1xf32> to vector<16x32xf32>
    %235 = arith.subf %227, %234 : vector<16x32xf32>
    %236 = arith.mulf %235, %235 : vector<16x32xf32>
    %cst_86 = arith.constant dense<0.000000e+00> : vector<16xf32>
    %237 = vector.multi_reduction <add>, %236, %cst_86 [1] : vector<16x32xf32> to vector<16xf32>
    %238 = vector.shape_cast %237 : vector<16xf32> to vector<16x1xf32>
    %cst_87 = arith.constant 3.200000e+01 : f32
    %239 = vector.broadcast %cst_87 : f32 to vector<16x1xf32>
    %240 = arith.divf %238, %239 : vector<16x1xf32>
    %241 = vector.broadcast %233 : vector<16x1xf32> to vector<16x32xf32>
    %242 = arith.subf %227, %241 : vector<16x32xf32>
    %cst_88 = arith.constant 9.99999974E-6 : f32
    %243 = vector.broadcast %cst_88 : f32 to vector<16x1xf32>
    %244 = arith.addf %240, %243 : vector<16x1xf32>
    %245 = math.rsqrt %244 : vector<16x1xf32>
    %246 = vector.broadcast %245 : vector<16x1xf32> to vector<16x32xf32>
    %247 = arith.mulf %242, %246 : vector<16x32xf32>
    %248 = vector.broadcast %228 : vector<1x32xf32> to vector<16x32xf32>
    %249 = arith.mulf %247, %248 : vector<16x32xf32>
    %250 = vector.broadcast %229 : vector<1x32xf32> to vector<16x32xf32>
    %251 = arith.addf %249, %250 : vector<16x32xf32>
    %252 = arith.truncf %251 : vector<16x32xf32> to vector<16x32xbf16>
    %c0_89 = arith.constant 0 : index
    %c0_90 = arith.constant 0 : index
    %253 = vector.load %arg18[%c0_89, %c0_90] : memref<32x32xbf16, #tpu.memory_space<vmem>>, vector<32x32xbf16>
    %cst_91 = arith.constant dense<0.000000e+00> : vector<16x32xf32>
    %254 = tpu.matmul %252, %253, %cst_91 {dimension_numbers = #tpu.dot_dimension_numbers<[1], [0], [0], [1], [0, 0, 1, 1], [], []>} : vector<16x32xbf16>, vector<32x32xbf16>, vector<16x32xf32> -> vector<16x32xf32>
    %c0_92 = arith.constant 0 : index
    %c0_93 = arith.constant 0 : index
    %255 = vector.load %arg19[%c0_92, %c0_93] : memref<1x32xf32, #tpu.memory_space<vmem>>, vector<1x32xf32>
    %256 = vector.broadcast %255 : vector<1x32xf32> to vector<16x32xf32>
    %257 = arith.addf %254, %256 : vector<16x32xf32>
    %c0_94 = arith.constant 0 : index
    %c0_95 = arith.constant 0 : index
    %258 = vector.load %arg20[%c0_94, %c0_95] : memref<32x32xbf16, #tpu.memory_space<vmem>>, vector<32x32xbf16>
    %cst_96 = arith.constant dense<0.000000e+00> : vector<16x32xf32>
    %259 = tpu.matmul %252, %258, %cst_96 {dimension_numbers = #tpu.dot_dimension_numbers<[1], [0], [0], [1], [0, 0, 1, 1], [], []>} : vector<16x32xbf16>, vector<32x32xbf16>, vector<16x32xf32> -> vector<16x32xf32>
    %c0_97 = arith.constant 0 : index
    %c0_98 = arith.constant 0 : index
    %260 = vector.load %arg21[%c0_97, %c0_98] : memref<1x32xf32, #tpu.memory_space<vmem>>, vector<1x32xf32>
    %261 = vector.broadcast %260 : vector<1x32xf32> to vector<16x32xf32>
    %262 = arith.addf %259, %261 : vector<16x32xf32>
    %c0_99 = arith.constant 0 : index
    %c0_100 = arith.constant 0 : index
    %263 = vector.load %arg22[%c0_99, %c0_100] : memref<32x32xbf16, #tpu.memory_space<vmem>>, vector<32x32xbf16>
    %cst_101 = arith.constant dense<0.000000e+00> : vector<16x32xf32>
    %264 = tpu.matmul %252, %263, %cst_101 {dimension_numbers = #tpu.dot_dimension_numbers<[1], [0], [0], [1], [0, 0, 1, 1], [], []>} : vector<16x32xbf16>, vector<32x32xbf16>, vector<16x32xf32> -> vector<16x32xf32>
    %c0_102 = arith.constant 0 : index
    %c0_103 = arith.constant 0 : index
    %265 = vector.load %arg23[%c0_102, %c0_103] : memref<1x32xf32, #tpu.memory_space<vmem>>, vector<1x32xf32>
    %266 = vector.broadcast %265 : vector<1x32xf32> to vector<16x32xf32>
    %267 = arith.addf %264, %266 : vector<16x32xf32>
    %268 = vector.shape_cast %257 : vector<16x32xf32> to vector<2x8x32xf32>
    %269 = vector.shape_cast %262 : vector<16x32xf32> to vector<2x8x32xf32>
    %270 = vector.shape_cast %267 : vector<16x32xf32> to vector<2x8x32xf32>
    %271 = tpu.iota {dimensions = array<i32: 1>} : vector<1x8x8xi32>
    %272 = tpu.iota {dimensions = array<i32: 2>} : vector<1x8x8xi32>
    %273 = arith.cmpi sle, %272, %271 : vector<1x8x8xi32>
    %c0_104 = arith.constant 0 : index
    %c0_105 = arith.constant 0 : index
    %c0_106 = arith.constant 0 : index
    %274 = vector.load %arg3[%c0_104, %c0_105, %c0_106] : memref<2x1x8xf32, #tpu.memory_space<vmem>>, vector<2x1x8xf32>
    %cst_107 = arith.constant 0.000000e+00 : f32
    %275 = vector.broadcast %cst_107 : f32 to vector<2x1x8xf32>
    %276 = arith.cmpf ogt, %274, %275 : vector<2x1x8xf32>
    %277 = vector.broadcast %273 : vector<1x8x8xi1> to vector<2x8x8xi1>
    %278 = vector.broadcast %276 : vector<2x1x8xi1> to vector<2x8x8xi1>
    %279 = arith.andi %277, %278 : vector<2x8x8xi1>
    %cst_108 = arith.constant 0.000000e+00 : f32
    %cst_109 = arith.constant -1.000000e+30 : f32
    %280 = vector.broadcast %cst_108 : f32 to vector<2x8x8xf32>
    %281 = vector.broadcast %cst_109 : f32 to vector<2x8x8xf32>
    %282 = arith.select %279, %280, %281 : vector<2x8x8xi1>, vector<2x8x8xf32>
    %c0_110 = arith.constant 0 : index
    %c0_111 = arith.constant 0 : index
    %283 = vector.load %arg24[%c0_110, %c0_111] : memref<32x32xbf16, #tpu.memory_space<vmem>>, vector<32x32xbf16>
    %cst_112 = arith.constant 0.000000e+00 : f32
    %284 = vector.broadcast %cst_112 : f32 to vector<16x32xf32>
    %285 = vector.extract_strided_slice %268 {offsets = [0, 0, 0], sizes = [2, 8, 8], strides = [1, 1, 1]} : vector<2x8x32xf32> to vector<2x8x8xf32>
    %286 = arith.truncf %285 : vector<2x8x8xf32> to vector<2x8x8xbf16>
    %287 = vector.extract_strided_slice %269 {offsets = [0, 0, 0], sizes = [2, 8, 8], strides = [1, 1, 1]} : vector<2x8x32xf32> to vector<2x8x8xf32>
    %288 = arith.truncf %287 : vector<2x8x8xf32> to vector<2x8x8xbf16>
    %289 = vector.extract_strided_slice %270 {offsets = [0, 0, 0], sizes = [2, 8, 8], strides = [1, 1, 1]} : vector<2x8x32xf32> to vector<2x8x8xf32>
    %290 = arith.truncf %289 : vector<2x8x8xf32> to vector<2x8x8xbf16>
    "tpu.trace_start"() <{level = 10 : i32, message = "bnk,bmk->bnm"}> : () -> ()
    %cst_113 = arith.constant dense<0.000000e+00> : vector<2x8x8xf32>
    %291 = tpu.matmul %286, %288, %cst_113 {dimension_numbers = #tpu.dot_dimension_numbers<[2], [2], [1], [1], [0, 0, 0, 1, 1, 1], [0], [0]>} : vector<2x8x8xbf16>, vector<2x8x8xbf16>, vector<2x8x8xf32> -> vector<2x8x8xf32>
    "tpu.trace_stop"() : () -> ()
    %292 = arith.addf %291, %282 : vector<2x8x8xf32>
    %cst_114 = arith.constant dense<0xFF800000> : vector<2x8xf32>
    %293 = vector.multi_reduction <maximumf>, %292, %cst_114 [2] : vector<2x8x8xf32> to vector<2x8xf32>
    %294 = vector.shape_cast %293 : vector<2x8xf32> to vector<2x8x1xf32>
    %295 = vector.broadcast %294 : vector<2x8x1xf32> to vector<2x8x8xf32>
    %296 = arith.subf %292, %295 : vector<2x8x8xf32>
    %297 = math.exp %296 : vector<2x8x8xf32>
    %cst_115 = arith.constant dense<0.000000e+00> : vector<2x8xf32>
    %298 = vector.multi_reduction <add>, %297, %cst_115 [2] : vector<2x8x8xf32> to vector<2x8xf32>
    %299 = vector.shape_cast %298 : vector<2x8xf32> to vector<2x8x1xf32>
    %300 = tpu.reciprocal %299 {approx = true} : vector<2x8x1xf32> -> vector<2x8x1xf32>
    %301 = vector.broadcast %300 : vector<2x8x1xf32> to vector<2x8x8xf32>
    %302 = arith.mulf %297, %301 : vector<2x8x8xf32>
    %303 = arith.truncf %302 : vector<2x8x8xf32> to vector<2x8x8xbf16>
    "tpu.trace_start"() <{level = 10 : i32, message = "bnm,bmk->bnk"}> : () -> ()
    %cst_116 = arith.constant dense<0.000000e+00> : vector<2x8x8xf32>
    %304 = tpu.matmul %303, %290, %cst_116 {dimension_numbers = #tpu.dot_dimension_numbers<[2], [1], [1], [2], [0, 0, 0, 1, 1, 2], [0], [0]>} : vector<2x8x8xbf16>, vector<2x8x8xbf16>, vector<2x8x8xf32> -> vector<2x8x8xf32>
    "tpu.trace_stop"() : () -> ()
    %305 = vector.shape_cast %304 : vector<2x8x8xf32> to vector<16x8xf32>
    %306 = arith.truncf %305 : vector<16x8xf32> to vector<16x8xbf16>
    %307 = vector.extract_strided_slice %283 {offsets = [0, 0], sizes = [8, 32], strides = [1, 1]} : vector<32x32xbf16> to vector<8x32xbf16>
    %cst_117 = arith.constant dense<0.000000e+00> : vector<16x32xf32>
    %308 = tpu.matmul %306, %307, %cst_117 {dimension_numbers = #tpu.dot_dimension_numbers<[1], [0], [0], [1], [0, 0, 1, 1], [], []>} : vector<16x8xbf16>, vector<8x32xbf16>, vector<16x32xf32> -> vector<16x32xf32>
    %309 = arith.addf %284, %308 : vector<16x32xf32>
    %310 = vector.extract_strided_slice %268 {offsets = [0, 0, 8], sizes = [2, 8, 8], strides = [1, 1, 1]} : vector<2x8x32xf32> to vector<2x8x8xf32>
    %311 = arith.truncf %310 : vector<2x8x8xf32> to vector<2x8x8xbf16>
    %312 = vector.extract_strided_slice %269 {offsets = [0, 0, 8], sizes = [2, 8, 8], strides = [1, 1, 1]} : vector<2x8x32xf32> to vector<2x8x8xf32>
    %313 = arith.truncf %312 : vector<2x8x8xf32> to vector<2x8x8xbf16>
    %314 = vector.extract_strided_slice %270 {offsets = [0, 0, 8], sizes = [2, 8, 8], strides = [1, 1, 1]} : vector<2x8x32xf32> to vector<2x8x8xf32>
    %315 = arith.truncf %314 : vector<2x8x8xf32> to vector<2x8x8xbf16>
    "tpu.trace_start"() <{level = 10 : i32, message = "bnk,bmk->bnm"}> : () -> ()
    %cst_118 = arith.constant dense<0.000000e+00> : vector<2x8x8xf32>
    %316 = tpu.matmul %311, %313, %cst_118 {dimension_numbers = #tpu.dot_dimension_numbers<[2], [2], [1], [1], [0, 0, 0, 1, 1, 1], [0], [0]>} : vector<2x8x8xbf16>, vector<2x8x8xbf16>, vector<2x8x8xf32> -> vector<2x8x8xf32>
    "tpu.trace_stop"() : () -> ()
    %317 = arith.addf %316, %282 : vector<2x8x8xf32>
    %cst_119 = arith.constant dense<0xFF800000> : vector<2x8xf32>
    %318 = vector.multi_reduction <maximumf>, %317, %cst_119 [2] : vector<2x8x8xf32> to vector<2x8xf32>
    %319 = vector.shape_cast %318 : vector<2x8xf32> to vector<2x8x1xf32>
    %320 = vector.broadcast %319 : vector<2x8x1xf32> to vector<2x8x8xf32>
    %321 = arith.subf %317, %320 : vector<2x8x8xf32>
    %322 = math.exp %321 : vector<2x8x8xf32>
    %cst_120 = arith.constant dense<0.000000e+00> : vector<2x8xf32>
    %323 = vector.multi_reduction <add>, %322, %cst_120 [2] : vector<2x8x8xf32> to vector<2x8xf32>
    %324 = vector.shape_cast %323 : vector<2x8xf32> to vector<2x8x1xf32>
    %325 = tpu.reciprocal %324 {approx = true} : vector<2x8x1xf32> -> vector<2x8x1xf32>
    %326 = vector.broadcast %325 : vector<2x8x1xf32> to vector<2x8x8xf32>
    %327 = arith.mulf %322, %326 : vector<2x8x8xf32>
    %328 = arith.truncf %327 : vector<2x8x8xf32> to vector<2x8x8xbf16>
    "tpu.trace_start"() <{level = 10 : i32, message = "bnm,bmk->bnk"}> : () -> ()
    %cst_121 = arith.constant dense<0.000000e+00> : vector<2x8x8xf32>
    %329 = tpu.matmul %328, %315, %cst_121 {dimension_numbers = #tpu.dot_dimension_numbers<[2], [1], [1], [2], [0, 0, 0, 1, 1, 2], [0], [0]>} : vector<2x8x8xbf16>, vector<2x8x8xbf16>, vector<2x8x8xf32> -> vector<2x8x8xf32>
    "tpu.trace_stop"() : () -> ()
    %330 = vector.shape_cast %329 : vector<2x8x8xf32> to vector<16x8xf32>
    %331 = arith.truncf %330 : vector<16x8xf32> to vector<16x8xbf16>
    %332 = vector.extract_strided_slice %283 {offsets = [8, 0], sizes = [8, 32], strides = [1, 1]} : vector<32x32xbf16> to vector<8x32xbf16>
    %cst_122 = arith.constant dense<0.000000e+00> : vector<16x32xf32>
    %333 = tpu.matmul %331, %332, %cst_122 {dimension_numbers = #tpu.dot_dimension_numbers<[1], [0], [0], [1], [0, 0, 1, 1], [], []>} : vector<16x8xbf16>, vector<8x32xbf16>, vector<16x32xf32> -> vector<16x32xf32>
    %334 = arith.addf %309, %333 : vector<16x32xf32>
    %335 = vector.extract_strided_slice %268 {offsets = [0, 0, 16], sizes = [2, 8, 8], strides = [1, 1, 1]} : vector<2x8x32xf32> to vector<2x8x8xf32>
    %336 = arith.truncf %335 : vector<2x8x8xf32> to vector<2x8x8xbf16>
    %337 = vector.extract_strided_slice %269 {offsets = [0, 0, 16], sizes = [2, 8, 8], strides = [1, 1, 1]} : vector<2x8x32xf32> to vector<2x8x8xf32>
    %338 = arith.truncf %337 : vector<2x8x8xf32> to vector<2x8x8xbf16>
    %339 = vector.extract_strided_slice %270 {offsets = [0, 0, 16], sizes = [2, 8, 8], strides = [1, 1, 1]} : vector<2x8x32xf32> to vector<2x8x8xf32>
    %340 = arith.truncf %339 : vector<2x8x8xf32> to vector<2x8x8xbf16>
    "tpu.trace_start"() <{level = 10 : i32, message = "bnk,bmk->bnm"}> : () -> ()
    %cst_123 = arith.constant dense<0.000000e+00> : vector<2x8x8xf32>
    %341 = tpu.matmul %336, %338, %cst_123 {dimension_numbers = #tpu.dot_dimension_numbers<[2], [2], [1], [1], [0, 0, 0, 1, 1, 1], [0], [0]>} : vector<2x8x8xbf16>, vector<2x8x8xbf16>, vector<2x8x8xf32> -> vector<2x8x8xf32>
    "tpu.trace_stop"() : () -> ()
    %342 = arith.addf %341, %282 : vector<2x8x8xf32>
    %cst_124 = arith.constant dense<0xFF800000> : vector<2x8xf32>
    %343 = vector.multi_reduction <maximumf>, %342, %cst_124 [2] : vector<2x8x8xf32> to vector<2x8xf32>
    %344 = vector.shape_cast %343 : vector<2x8xf32> to vector<2x8x1xf32>
    %345 = vector.broadcast %344 : vector<2x8x1xf32> to vector<2x8x8xf32>
    %346 = arith.subf %342, %345 : vector<2x8x8xf32>
    %347 = math.exp %346 : vector<2x8x8xf32>
    %cst_125 = arith.constant dense<0.000000e+00> : vector<2x8xf32>
    %348 = vector.multi_reduction <add>, %347, %cst_125 [2] : vector<2x8x8xf32> to vector<2x8xf32>
    %349 = vector.shape_cast %348 : vector<2x8xf32> to vector<2x8x1xf32>
    %350 = tpu.reciprocal %349 {approx = true} : vector<2x8x1xf32> -> vector<2x8x1xf32>
    %351 = vector.broadcast %350 : vector<2x8x1xf32> to vector<2x8x8xf32>
    %352 = arith.mulf %347, %351 : vector<2x8x8xf32>
    %353 = arith.truncf %352 : vector<2x8x8xf32> to vector<2x8x8xbf16>
    "tpu.trace_start"() <{level = 10 : i32, message = "bnm,bmk->bnk"}> : () -> ()
    %cst_126 = arith.constant dense<0.000000e+00> : vector<2x8x8xf32>
    %354 = tpu.matmul %353, %340, %cst_126 {dimension_numbers = #tpu.dot_dimension_numbers<[2], [1], [1], [2], [0, 0, 0, 1, 1, 2], [0], [0]>} : vector<2x8x8xbf16>, vector<2x8x8xbf16>, vector<2x8x8xf32> -> vector<2x8x8xf32>
    "tpu.trace_stop"() : () -> ()
    %355 = vector.shape_cast %354 : vector<2x8x8xf32> to vector<16x8xf32>
    %356 = arith.truncf %355 : vector<16x8xf32> to vector<16x8xbf16>
    %357 = vector.extract_strided_slice %283 {offsets = [16, 0], sizes = [8, 32], strides = [1, 1]} : vector<32x32xbf16> to vector<8x32xbf16>
    %cst_127 = arith.constant dense<0.000000e+00> : vector<16x32xf32>
    %358 = tpu.matmul %356, %357, %cst_127 {dimension_numbers = #tpu.dot_dimension_numbers<[1], [0], [0], [1], [0, 0, 1, 1], [], []>} : vector<16x8xbf16>, vector<8x32xbf16>, vector<16x32xf32> -> vector<16x32xf32>
    %359 = arith.addf %334, %358 : vector<16x32xf32>
    %360 = vector.extract_strided_slice %268 {offsets = [0, 0, 24], sizes = [2, 8, 8], strides = [1, 1, 1]} : vector<2x8x32xf32> to vector<2x8x8xf32>
    %361 = arith.truncf %360 : vector<2x8x8xf32> to vector<2x8x8xbf16>
    %362 = vector.extract_strided_slice %269 {offsets = [0, 0, 24], sizes = [2, 8, 8], strides = [1, 1, 1]} : vector<2x8x32xf32> to vector<2x8x8xf32>
    %363 = arith.truncf %362 : vector<2x8x8xf32> to vector<2x8x8xbf16>
    %364 = vector.extract_strided_slice %270 {offsets = [0, 0, 24], sizes = [2, 8, 8], strides = [1, 1, 1]} : vector<2x8x32xf32> to vector<2x8x8xf32>
    %365 = arith.truncf %364 : vector<2x8x8xf32> to vector<2x8x8xbf16>
    "tpu.trace_start"() <{level = 10 : i32, message = "bnk,bmk->bnm"}> : () -> ()
    %cst_128 = arith.constant dense<0.000000e+00> : vector<2x8x8xf32>
    %366 = tpu.matmul %361, %363, %cst_128 {dimension_numbers = #tpu.dot_dimension_numbers<[2], [2], [1], [1], [0, 0, 0, 1, 1, 1], [0], [0]>} : vector<2x8x8xbf16>, vector<2x8x8xbf16>, vector<2x8x8xf32> -> vector<2x8x8xf32>
    "tpu.trace_stop"() : () -> ()
    %367 = arith.addf %366, %282 : vector<2x8x8xf32>
    %cst_129 = arith.constant dense<0xFF800000> : vector<2x8xf32>
    %368 = vector.multi_reduction <maximumf>, %367, %cst_129 [2] : vector<2x8x8xf32> to vector<2x8xf32>
    %369 = vector.shape_cast %368 : vector<2x8xf32> to vector<2x8x1xf32>
    %370 = vector.broadcast %369 : vector<2x8x1xf32> to vector<2x8x8xf32>
    %371 = arith.subf %367, %370 : vector<2x8x8xf32>
    %372 = math.exp %371 : vector<2x8x8xf32>
    %cst_130 = arith.constant dense<0.000000e+00> : vector<2x8xf32>
    %373 = vector.multi_reduction <add>, %372, %cst_130 [2] : vector<2x8x8xf32> to vector<2x8xf32>
    %374 = vector.shape_cast %373 : vector<2x8xf32> to vector<2x8x1xf32>
    %375 = tpu.reciprocal %374 {approx = true} : vector<2x8x1xf32> -> vector<2x8x1xf32>
    %376 = vector.broadcast %375 : vector<2x8x1xf32> to vector<2x8x8xf32>
    %377 = arith.mulf %372, %376 : vector<2x8x8xf32>
    %378 = arith.truncf %377 : vector<2x8x8xf32> to vector<2x8x8xbf16>
    "tpu.trace_start"() <{level = 10 : i32, message = "bnm,bmk->bnk"}> : () -> ()
    %cst_131 = arith.constant dense<0.000000e+00> : vector<2x8x8xf32>
    %379 = tpu.matmul %378, %365, %cst_131 {dimension_numbers = #tpu.dot_dimension_numbers<[2], [1], [1], [2], [0, 0, 0, 1, 1, 2], [0], [0]>} : vector<2x8x8xbf16>, vector<2x8x8xbf16>, vector<2x8x8xf32> -> vector<2x8x8xf32>
    "tpu.trace_stop"() : () -> ()
    %380 = vector.shape_cast %379 : vector<2x8x8xf32> to vector<16x8xf32>
    %381 = arith.truncf %380 : vector<16x8xf32> to vector<16x8xbf16>
    %382 = vector.extract_strided_slice %283 {offsets = [24, 0], sizes = [8, 32], strides = [1, 1]} : vector<32x32xbf16> to vector<8x32xbf16>
    %cst_132 = arith.constant dense<0.000000e+00> : vector<16x32xf32>
    %383 = tpu.matmul %381, %382, %cst_132 {dimension_numbers = #tpu.dot_dimension_numbers<[1], [0], [0], [1], [0, 0, 1, 1], [], []>} : vector<16x8xbf16>, vector<8x32xbf16>, vector<16x32xf32> -> vector<16x32xf32>
    %384 = arith.addf %359, %383 : vector<16x32xf32>
    %385 = arith.addf %227, %384 : vector<16x32xf32>
    %c0_133 = arith.constant 0 : index
    %c0_134 = arith.constant 0 : index
    %386 = vector.load %arg25[%c0_133, %c0_134] : memref<1x32xf32, #tpu.memory_space<vmem>>, vector<1x32xf32>
    %387 = vector.broadcast %386 : vector<1x32xf32> to vector<16x32xf32>
    %388 = arith.addf %385, %387 : vector<16x32xf32>
    %c0_135 = arith.constant 0 : index
    %c0_136 = arith.constant 0 : index
    %389 = vector.load %arg26[%c0_135, %c0_136] : memref<1x32xf32, #tpu.memory_space<vmem>>, vector<1x32xf32>
    %c0_137 = arith.constant 0 : index
    %c0_138 = arith.constant 0 : index
    %390 = vector.load %arg27[%c0_137, %c0_138] : memref<1x32xf32, #tpu.memory_space<vmem>>, vector<1x32xf32>
    %cst_139 = arith.constant dense<0.000000e+00> : vector<16xf32>
    %391 = vector.multi_reduction <add>, %388, %cst_139 [1] : vector<16x32xf32> to vector<16xf32>
    %392 = vector.shape_cast %391 : vector<16xf32> to vector<16x1xf32>
    %cst_140 = arith.constant 3.200000e+01 : f32
    %393 = vector.broadcast %cst_140 : f32 to vector<16x1xf32>
    %394 = arith.divf %392, %393 : vector<16x1xf32>
    %395 = vector.broadcast %394 : vector<16x1xf32> to vector<16x32xf32>
    %396 = arith.subf %388, %395 : vector<16x32xf32>
    %397 = arith.mulf %396, %396 : vector<16x32xf32>
    %cst_141 = arith.constant dense<0.000000e+00> : vector<16xf32>
    %398 = vector.multi_reduction <add>, %397, %cst_141 [1] : vector<16x32xf32> to vector<16xf32>
    %399 = vector.shape_cast %398 : vector<16xf32> to vector<16x1xf32>
    %cst_142 = arith.constant 3.200000e+01 : f32
    %400 = vector.broadcast %cst_142 : f32 to vector<16x1xf32>
    %401 = arith.divf %399, %400 : vector<16x1xf32>
    %402 = vector.broadcast %394 : vector<16x1xf32> to vector<16x32xf32>
    %403 = arith.subf %388, %402 : vector<16x32xf32>
    %cst_143 = arith.constant 9.99999974E-6 : f32
    %404 = vector.broadcast %cst_143 : f32 to vector<16x1xf32>
    %405 = arith.addf %401, %404 : vector<16x1xf32>
    %406 = math.rsqrt %405 : vector<16x1xf32>
    %407 = vector.broadcast %406 : vector<16x1xf32> to vector<16x32xf32>
    %408 = arith.mulf %403, %407 : vector<16x32xf32>
    %409 = vector.broadcast %389 : vector<1x32xf32> to vector<16x32xf32>
    %410 = arith.mulf %408, %409 : vector<16x32xf32>
    %411 = vector.broadcast %390 : vector<1x32xf32> to vector<16x32xf32>
    %412 = arith.addf %410, %411 : vector<16x32xf32>
    %413 = arith.truncf %412 : vector<16x32xf32> to vector<16x32xbf16>
    %c0_144 = arith.constant 0 : index
    %c0_145 = arith.constant 0 : index
    %414 = vector.load %arg28[%c0_144, %c0_145] : memref<32x128xbf16, #tpu.memory_space<vmem>>, vector<32x128xbf16>
    %cst_146 = arith.constant dense<0.000000e+00> : vector<16x128xf32>
    %415 = tpu.matmul %413, %414, %cst_146 {dimension_numbers = #tpu.dot_dimension_numbers<[1], [0], [0], [1], [0, 0, 1, 1], [], []>} : vector<16x32xbf16>, vector<32x128xbf16>, vector<16x128xf32> -> vector<16x128xf32>
    %c0_147 = arith.constant 0 : index
    %c0_148 = arith.constant 0 : index
    %416 = vector.load %arg29[%c0_147, %c0_148] : memref<1x128xf32, #tpu.memory_space<vmem>>, vector<1x128xf32>
    %417 = vector.broadcast %416 : vector<1x128xf32> to vector<16x128xf32>
    %418 = arith.addf %415, %417 : vector<16x128xf32>
    %cst_149 = arith.constant 5.000000e-01 : f32
    %419 = vector.broadcast %cst_149 : f32 to vector<16x128xf32>
    %420 = arith.mulf %419, %418 : vector<16x128xf32>
    %cst_150 = arith.constant 4.471500e-02 : f32
    %421 = vector.broadcast %cst_150 : f32 to vector<16x128xf32>
    %422 = arith.mulf %421, %418 : vector<16x128xf32>
    %423 = arith.mulf %422, %418 : vector<16x128xf32>
    %424 = arith.mulf %423, %418 : vector<16x128xf32>
    %425 = arith.addf %418, %424 : vector<16x128xf32>
    %cst_151 = arith.constant 0.797884583 : f32
    %426 = vector.broadcast %cst_151 : f32 to vector<16x128xf32>
    %427 = arith.mulf %426, %425 : vector<16x128xf32>
    %428 = math.tanh %427 : vector<16x128xf32>
    %cst_152 = arith.constant 1.000000e+00 : f32
    %429 = vector.broadcast %cst_152 : f32 to vector<16x128xf32>
    %430 = arith.addf %429, %428 : vector<16x128xf32>
    %431 = arith.mulf %420, %430 : vector<16x128xf32>
    %432 = arith.truncf %431 : vector<16x128xf32> to vector<16x128xbf16>
    %c0_153 = arith.constant 0 : index
    %c0_154 = arith.constant 0 : index
    %433 = vector.load %arg30[%c0_153, %c0_154] : memref<128x32xbf16, #tpu.memory_space<vmem>>, vector<128x32xbf16>
    %cst_155 = arith.constant dense<0.000000e+00> : vector<16x32xf32>
    %434 = tpu.matmul %432, %433, %cst_155 {dimension_numbers = #tpu.dot_dimension_numbers<[1], [0], [0], [1], [0, 0, 1, 1], [], []>} : vector<16x128xbf16>, vector<128x32xbf16>, vector<16x32xf32> -> vector<16x32xf32>
    %435 = arith.addf %388, %434 : vector<16x32xf32>
    %c0_156 = arith.constant 0 : index
    %c0_157 = arith.constant 0 : index
    %436 = vector.load %arg31[%c0_156, %c0_157] : memref<1x32xf32, #tpu.memory_space<vmem>>, vector<1x32xf32>
    %437 = vector.broadcast %436 : vector<1x32xf32> to vector<16x32xf32>
    %438 = arith.addf %435, %437 : vector<16x32xf32>
    %439 = vector.shape_cast %438 : vector<16x32xf32> to vector<2x8x32xf32>
    %c0_158 = arith.constant 0 : index
    %c0_159 = arith.constant 0 : index
    %c0_160 = arith.constant 0 : index
    %440 = vector.load %arg32[%c0_158, %c0_159, %c0_160] : memref<2x8x32xf32, #tpu.memory_space<vmem>>, vector<2x8x32xf32>
    tpu.vector_store %arg32[%c0_158, %c0_159, %c0_160], %439 {strides = array<i32>} : memref<2x8x32xf32, #tpu.memory_space<vmem>>, vector<2x8x32xf32>,
    return
  }
}

</mosaic_0001>

<bundles_post_ra>
// kernel: tpu_custom_call.1
= control target key start
LH: loop header
LB: loop body
LE: loop exit
PB: predicated region body
PF: predicated region fallthrough
CT: control target
= control target key end

     0   :  { %s4345_s6 = smov 1   ;;  %s4346_s10 = smov 2   ;;  %s5184_s0 = inlined_call_operand.smem [shape: u32[33], index: -1, kind: input, shape index: {}] }
   0x1   :  { %s4403_s5 = sld [smem:[%s5184_s0]]   ;;  %s4347_s14 = smov 3  }
   0x2   :  { %s4408_s9 = sld [smem:[%s5184_s0 + %s4345_s6]]   ;;  %s4348_s18 = smov 4  }
   0x3   :  { %s4413_s13 = sld [smem:[%s5184_s0 + %s4346_s10]]   ;;  %s4349_s22 = smov 5  }
   0x4   :  { %s4418_s17 = sld [smem:[%s5184_s0 + %s4347_s14]]   ;;  %s4350_s26 = smov 6  }
   0x5   :  { %s4423_s21 = sld [smem:[%s5184_s0 + %s4348_s18]]   ;;  %s4351_s30 = smov 7  }
   0x6   :  { %s4428_s25 = sld [smem:[%s5184_s0 + %s4349_s22]]   ;;  %s4352_s4 = smov 8  }
   0x7   :  { %s4433_s29 = sld [smem:[%s5184_s0 + %s4350_s26]]   ;;  %s4353_s10 = smov 9  }
   0x8   :  { %s4438_s3 = sld [smem:[%s5184_s0 + %s4351_s30]]   ;;  %s4354_s15 = smov 10  }
   0x9   :  { %s4443_s8 = sld [smem:[%s5184_s0 + %s4352_s4]]   ;;  %s4355_s20 = smov 11  }
   0xa   :  { %s4448_s14 = sld [smem:[%s5184_s0 + %s4353_s10]]   ;;  %s4356_s26 = smov 12  }
   0xb   :  { %s3452_s19 = sld [smem:[%s5184_s0 + %s4354_s15]]   ;;  %s4357_s1 = smov 13  }
   0xc   :  { %s4456_s24 = sld [smem:[%s5184_s0 + %s4355_s20]]   ;;  %s4358_s7 = smov 14  }
   0xd   :  { %s4461_s30 = sld [smem:[%s5184_s0 + %s4356_s26]]   ;;  %s4359_s15 = smov 16  }
   0xe   :  { %s4466_s6 = sld [smem:[%s5184_s0 + %s4357_s1]]   ;;  %s4360_s22 = smov 17  }
   0xf   :  { %s4471_s12 = sld [smem:[%s5184_s0 + %s4358_s7]]   ;;  %s4361_s28 = smov 18  }
  0x10   :  { %s4476_s20 = sld [smem:[%s5184_s0 + %s4359_s15]]   ;;  %s4362_s7 = smov 19  }
  0x11   :  { %s4481_s27 = sld [smem:[%s5184_s0 + %s4360_s22]]   ;;  %v70_v0 = vstv %s3452_s19  ;;  %s4363_s16 = smov 20  }
  0x12   :  { %s4486_s4 = sld [smem:[%s5184_s0 + %s4361_s28]]   ;;  %71 = vst [vmem:[#allocation2] sm:$0x1] %v70_v0  ;;  %s4364_s19 = smov 21  }
  0x13   :  { %s4491_s15 = sld [smem:[%s5184_s0 + %s4362_s7]]   ;;  %s4365_s28 = smov 22  }
  0x14   :  { %s4496_s22 = sld [smem:[%s5184_s0 + %s4363_s16]]   ;;  %s4366_s7 = smov 23  }
  0x15   :  { %s4501_s1 = sld [smem:[%s5184_s0 + %s4364_s19]]   ;;  %s4368_s19 = smov 25  }
  0x16   :  { %5190 = sst [smem:[#allocation17_spill]] %s4476_s20  ;;  %s4367_s20 = smov 24  }
  0x17   :  { %5191 = sst [smem:[#allocation18_spill]] %s4481_s27  ;;  %s4369_s27 = smov 26  }
  0x18   :  { %5192 = sst [smem:[#allocation19_spill]] %s4486_s4 }
  0x19   :  { %5193 = sst [smem:[#allocation20_spill]] %s4491_s15 }
  0x1a   :  { %5194 = sst [smem:[#allocation21_spill]] %s4496_s22 }
  0x1b   :  { %5195 = sst [smem:[#allocation22_spill]] %s4501_s1 }
  0x1c   :  { %s4506_s4 = sld [smem:[%s5184_s0 + %s4365_s28]]  }
  0x1d   :  { %s4511_s15 = sld [smem:[%s5184_s0 + %s4366_s7]]   ;;  %s4370_s7 = smov 27  }
  0x1e   :  { %s4516_s22 = sld [smem:[%s5184_s0 + %s4367_s20]]   ;;  %s4371_s20 = smov 28  }
  0x1f   :  { %s4521_s1 = sld [smem:[%s5184_s0 + %s4368_s19]]   ;;  %s4372_s19 = smov 29  }
  0x22   :  { %5196 = sst [smem:[#allocation23_spill]] %s4506_s4 }
  0x23   :  { %5197 = sst [smem:[#allocation24_spill]] %s4511_s15 }
  0x24   :  { %5198 = sst [smem:[#allocation25_spill]] %s4516_s22 }
  0x25   :  { %5199 = sst [smem:[#allocation26_spill]] %s4521_s1 }
  0x26   :  { %s4526_s4 = sld [smem:[%s5184_s0 + %s4369_s27]]   ;;  %s4373_s27 = smov 30  }
  0x27   :  { %s4531_s15 = sld [smem:[%s5184_s0 + %s4370_s7]]   ;;  %s4374_s7 = smov 31  }
  0x28   :  { %s4536_s22 = sld [smem:[%s5184_s0 + %s4371_s20]]   ;;  %s4375_s20 = smov 32  }
  0x29   :  { %s4541_s1 = sld [smem:[%s5184_s0 + %s4372_s19]]   ;;  %s4376_s19 = smov 15  }
  0x2c   :  { %5200 = sst [smem:[#allocation27_spill]] %s4526_s4 }
  0x2d   :  { %5201 = sst [smem:[#allocation28_spill]] %s4531_s15 }
  0x2e   :  { %5202 = sst [smem:[#allocation29_spill]] %s4536_s22 }
  0x2f   :  { %5203 = sst [smem:[#allocation30_spill]] %s4541_s1 }
  0x30   :  { %s4546_s4 = sld [smem:[%s5184_s0 + %s4373_s27]]  }
  0x31   :  { %s4551_s15 = sld [smem:[%s5184_s0 + %s4374_s7]]  }
  0x32   :  { %s4556_s22 = sld [smem:[%s5184_s0 + %s4375_s20]]  }
  0x33   :  { %s3457_s1 = sld [smem:[%s5184_s0 + %s4376_s19]]  }
  0x39   :  { %v72_v1 = vstv %s3457_s1 }
  0x3a   :  { %73 = vst [vmem:[#allocation3] sm:$0x1] %v72_v1 }
  0x3b   :  { %74 = vsyncpa [#allocation5], 0 }
  0x3c   :  { %75 = vsyncpa [#allocation8], 0 }
  0x3d   :  { %76 = vsyncpa [#allocation11], 0 }
  0x3e   :  { %77 = vsyncpa [#allocation6], 0  ;;  %s4377_s27 = smov [#allocation7]   ;;  %s4227_s2 = scalar_lea.hbm %s4418_s17, 32 }
  0x3f   :  { %s99_s28 = sshll.u32 %s4377_s27, 4  ;;  %p4228_p0 = scmp.ne.s32.totalorder %s4418_s17, %s4227_s2  ;;  %s100_s28 = int_to_ptr.vmem [resolvable:$true] %s99_s28 }
  0x40   :  { %p4231_p1 = scmp.lt.u32.totalorder %s4227_s2, %s4418_s17 }
  0x42   :  { %p4233_p2 = pnand %p4231_p1, %p4228_p0 }
  0x44   :  { %4236 = shalt.err (!%p4233_p2)
}
  0x45   :  { %s4237_s7 = scalar_lea.vmem %s100_s28, 32  ;;  %p4242_p4 = scmp.lt.s32.totalorder %s100_s28, %s100_s28 }
  0x46   :  { %p4238_p3 = scmp.ne.s32.totalorder %s100_s28, %s4237_s7  ;;  %p4243_p5 = scmp.lt.s32.totalorder %s4237_s7, %s4237_s7 }
  0x48   :  { %p4244_p6 = por %p4243_p5, %p4242_p4 }
  0x4a   :  { %p4245_p7 = pnand %p4244_p6, %p4238_p3 }
  0x4c   :  { %4248 = shalt.err (!%p4245_p7)
}
  0x4d   :  { %s4378_s0 = smov 16   ;;  %s4379_s1 = smov 1  }
  0x4e   :  { %105 = dma.hbm_to_vmem [thread:$0]  %s4418_s17, 32, %s100_s28, [#allocation8], %s4378_s0, %s4378_s0, %s4379_s1  }
  0x4f   :  { %s4380_s10 = smov [#allocation4]   ;;  %s4249_s20 = scalar_lea.hbm %s4408_s9, 128 }
  0x50   :  { %s85_s11 = sshll.u32 %s4380_s10, 4  ;;  %p4250_p8 = scmp.ne.s32.totalorder %s4408_s9, %s4249_s20  ;;  %s86_s11 = int_to_ptr.vmem [resolvable:$true] %s85_s11 }
  0x51   :  { %p4253_p9 = scmp.lt.u32.totalorder %s4249_s20, %s4408_s9 }
  0x53   :  { %p4255_p10 = pnand %p4253_p9, %p4250_p8 }
  0x55   :  { %4258 = shalt.err (!%p4255_p10)
}
  0x56   :  { %s4259_s16 = scalar_lea.vmem %s86_s11, 128  ;;  %p4264_p12 = scmp.lt.s32.totalorder %s86_s11, %s86_s11 }
  0x57   :  { %p4260_p11 = scmp.ne.s32.totalorder %s86_s11, %s4259_s16  ;;  %p4265_p13 = scmp.lt.s32.totalorder %s4259_s16, %s4259_s16 }
  0x59   :  { %p4266_p0 = por %p4265_p13, %p4264_p12 }
  0x5b   :  { %p4267_p1 = pnand %p4266_p0, %p4260_p11 }
  0x5d   :  { %4270 = shalt.err (!%p4267_p1)
}
  0x5e   :  { %s4381_s18 = smov 64   ;;  %s4382_s17 = smov 4  }
  0x5f   :  { %91 = dma.hbm_to_vmem [thread:$0]  %s4408_s9, 128, %s86_s11, [#allocation5], %s4381_s18, %s4381_s18, %s4382_s17  }
  0x60   :  { %s4383_s19 = smov [#allocation9]   ;;  %s4384_s26 = smov [#allocation10]  }
  0x61   :  { %s112_s23 = sshll.u32 %s4383_s19, 4  ;;  %s122_s27 = sshll.u32 %s4384_s26, 4  ;;  %s113_s23 = int_to_ptr.vmem [resolvable:$true] %s112_s23  ;;  %s123_s27 = int_to_ptr.vmem [resolvable:$true] %s122_s27 }
  0x62   :  { %s4271_s28 = scalar_lea.hbm %s4423_s21, 16 }
  0x63   :  { %p4272_p2 = scmp.ne.s32.totalorder %s4423_s21, %s4271_s28  ;;  %p4275_p3 = scmp.lt.u32.totalorder %s4271_s28, %s4423_s21 }
  0x65   :  { %p4277_p4 = pnand %p4275_p3, %p4272_p2 }
  0x67   :  { %4280 = shalt.err (!%p4277_p4)
}
  0x68   :  { %s4281_s2 = scalar_lea.vmem %s113_s23, 16  ;;  %s4285_s7 = scalar_lea.vmem %s113_s23, 32 }
  0x69   :  { %p4282_p5 = scmp.ne.s32.totalorder %s113_s23, %s4281_s2  ;;  %p4286_p6 = scmp.lt.s32.totalorder %s113_s23, %s113_s23 }
  0x6a   :  { %p4287_p7 = scmp.lt.s32.totalorder %s4285_s7, %s4281_s2 }
  0x6c   :  { %p4288_p8 = por %p4287_p7, %p4286_p6 }
  0x6e   :  { %p4289_p9 = pnand %p4288_p8, %p4282_p5 }
  0x70   :  { %4292 = shalt.err (!%p4289_p9)
}
  0x71   :  { %115 = dma.hbm_to_vmem [thread:$0]  %s4423_s21, 16, %s113_s23, [#allocation8]  }
  0x72   :  { %s4293_s9 = scalar_lea.hbm %s4428_s25, 16 }
  0x73   :  { %p4294_p10 = scmp.ne.s32.totalorder %s4428_s25, %s4293_s9  ;;  %p4297_p11 = scmp.lt.u32.totalorder %s4293_s9, %s4428_s25 }
  0x75   :  { %p4299_p12 = pnand %p4297_p11, %p4294_p10 }
  0x77   :  { %4302 = shalt.err (!%p4299_p12)
}
  0x78   :  { %s4303_s0 = scalar_lea.vmem %s123_s27, 16  ;;  %s4307_s1 = scalar_lea.vmem %s123_s27, 32 }
  0x79   :  { %p4304_p13 = scmp.ne.s32.totalorder %s123_s27, %s4303_s0  ;;  %p4308_p0 = scmp.lt.s32.totalorder %s123_s27, %s123_s27 }
  0x7a   :  { %p4309_p1 = scmp.lt.s32.totalorder %s4307_s1, %s4303_s0 }
  0x7c   :  { %p4310_p2 = por %p4309_p1, %p4308_p0 }
  0x7e   :  { %p4311_p3 = pnand %p4310_p2, %p4304_p13 }
  0x80   :  { %4314 = shalt.err (!%p4311_p3)
}
  0x81   :  { %125 = dma.hbm_to_vmem [thread:$0]  %s4428_s25, 16, %s123_s27, [#allocation11]  }
  0x82   :  { %4337 = dma.done.wait [#allocation5], 128  }
  0x83   :  { %4338 = vsyncadd [#allocation5], 4294967168 }
  0x84   :  { %4339 = dma.done.wait [#allocation8], 48  }
  0x85   :  { %4340 = vsyncadd [#allocation8], 4294967248 }
  0x86   :  { %4341 = dma.done.wait [#allocation11], 16  }
  0x87   :  { %4342 = vsyncadd [#allocation11], 4294967280  ;;  %vm195_vm0 = vcmask 261120   ;;  %v191_v2 = vld [vmem:[%s4403_s5] sm:$0xff]  ;;  %v192_v3 = vld [vmem:[%s4403_s5 + $0x8] sm:$0xff]  ;;  %v4385_v17 = vmov 0.0   ;;  %v426_v0 = vlaneseq }
  0x88   :  { %v196_v4 = vsel %vm195_vm0, %v191_v2, 0.0  ;;  %v199_v5 = vsel %vm195_vm0, %v192_v3, 0.0  ;;  %v4104_v16 = vld [vmem:[%s4433_s29] sm:$0xff]   ;;  %3696 = vmatprep.subr.bf16.mxu1 %v4385_v17  ;;  %3726 = vmatprep.subr.bf16.mxu0 %v4385_v17  ;;  %v4105_v18 = vld [vmem:[%s4433_s29 + $0x8] sm:$0xff]   ;;  %vm4386_vm1 = vmmov 0   ;;  %v4387_v42 = vmov 0  }
  0x89   :  { %197 = vadd.xlane.f32.xlu0 %v196_v4  ;;  %3697 = vmatpush3.bf16.msra.mxu1 %v4104_v16  ;;  %v3475_v27 = vld [vmem:[#allocation9] ss:$0 sm:$0xff]  ;;  %v3476_v31 = vld [vmem:[#allocation10] ss:$0 sm:$0xff]  ;;  %v4106_v35 = vld [vmem:[%s4438_s3] sm:$0xff]   ;;  %vm464_vm2 = vcmask 64512  }
  0x8a   :  { %3700 = vmatprep.mubr.msk.bf16.mxu1 %vm4386_vm1, %v4385_v17  ;;  %3698 = vmatprep.subr.bf16.mxu1 %v4385_v17  ;;  %v4107_v37 = vld [vmem:[%s4438_s3 + $0x8] sm:$0xff]   ;;  %v4109_v39 = vld [vmem:[%s4443_s8] sm:$0xff]   ;;  %v4636_v1 = vand.u32 127, %v426_v0  ;;  %s4388_s21 = smov 120   ;;  %vm598_vm11 = vcmask 1043456   ;;  %s4390_s25 = smov 104  }
  0x8b   :  { %3728 = vmatprep.mubr.msk.bf16.mxu0 %vm4386_vm1, %v4385_v17  ;;  %v4108_v38 = vld [vmem:[#allocation4] sm:$0xff]   ;;  %4103 = vset.pattern.permute.xlu1 %v4387_v42  ;;  %s5209_s29 = sld [smem:[#allocation17_spill]]  ;;  %s5210_s3 = sld [smem:[#allocation18_spill]] }
  0x8c   :  { %v4110_v40 = vld [vmem:[%s4443_s8 + $0x8] sm:$0xff]   ;;  %4102 = vset.pattern.permute.xlu0 %v4387_v42  ;;  %s5211_s8 = sld [smem:[#allocation21_spill]]  ;;  %s5217_s10 = sld [smem:[#allocation26_spill]] }
  0x8d   :  { %200 = vadd.xlane.f32.xlu0 %v199_v5  ;;  %3699 = vmatpush3.bf16.msra.mxu1 %v4105_v18  ;;  %v425_v41 = vld [vmem:[%s4413_s13 + $0x8] sm:$0xff]  ;;  %s5218_s11 = sld [smem:[#allocation29_spill]]  ;;  %s5219_s20 = sld [smem:[#allocation27_spill]] }
  0x8e   :  { %3704 = vmatprep.subr.bf16.mxu1 %v4385_v17  ;;  %v3488_v43 = vadd.s32 4294967295, %v425_v41  ;;  %v441_v44 = vmul.u32 4, %v425_v41  ;;  %vm453_vm6 = vcmp.gt.s32.totalorder %v425_v41, 0  ;;  %s5220_s16 = sld [smem:[#allocation28_spill]]  ;;  %s5221_s18 = sld [smem:[#allocation30_spill]] }
  0x90   :  { %v431_v45 = vmul.u32 4, %v3488_v43 }
  0xa3   :  { %436 = vperm.xlu0 %4102, %v431_v45  }
 0x116   :  { %v198_v6 = vpop.xlane.xlu0 %197 }
 0x117   :  { %v203_v7 = vmul.f32 0.03125, %v198_v6 }
 0x119   :  { %v205_v8 = vsub.f32 %v191_v2, %v203_v7 }
 0x11a   :  { %v201_v9 = vpop.xlane.xlu0 %200 }
 0x11b   :  { %v204_v10 = vmul.f32 0.03125, %v201_v9  ;;  %v207_v11 = vmul.f32 %v205_v8, %v205_v8 }
 0x11d   :  { %v206_v12 = vsub.f32 %v192_v3, %v204_v10  ;;  %v209_v13 = vsel %vm195_vm0, %v207_v11, 0.0 }
 0x11e   :  { %210 = vadd.xlane.f32.xlu1 %v209_v13 }
 0x11f   :  { %v208_v14 = vmul.f32 %v206_v12, %v206_v12 }
 0x121   :  { %v212_v15 = vsel %vm195_vm0, %v208_v14, 0.0 }
 0x122   :  { %213 = vadd.xlane.f32.xlu1 %v212_v15  ;;  %v437_v3 = vpop.permute.xlu0 %436  ;;  %v424_v15 = vld [vmem:[%s4413_s13] sm:$0xff]  ;;  %s4389_s13 = smov 112  }
 0x123   :  { %vm439_vm4 = vcmp.ge.s32.totalorder %v4636_v1, %v437_v3  ;;  %v3487_v16 = vadd.s32 4294967295, %v424_v15  ;;  %vm452_vm10 = vcmp.gt.s32.totalorder %v424_v15, 0 }
 0x125   :  { %v430_v18 = vmul.u32 4, %v3487_v16 }
 0x133   :  { %446 = vperm.xlu1 %4103, %v441_v44  }
 0x1ab   :  { %v211_v19 = vpop.xlane.xlu1 %210 }
 0x1ac   :  { %v215_v20 = vmul.f32 0.03125, %v211_v19  ;;  %v440_v19 = vmul.u32 4, %v424_v15 }
 0x1ae   :  { %v217_v21 = vadd.f32 1e-05, %v215_v20  ;;  %v582_v20 = vsel %vm453_vm6, 1, %v4387_v42 }
 0x1af   :  { %v214_v22 = vpop.xlane.xlu1 %213 }
 0x1b0   :  { %4137 = vrsqrt.f32 %v217_v21  ;;  %v216_v23 = vmul.f32 0.03125, %v214_v22 }
 0x1b2   :  { %v218_v24 = vadd.f32 1e-05, %v216_v23 }
 0x1b3   :  { %v447_v2 = vpop.permute.xlu1 %446 }
 0x1b4   :  { %4139 = vrsqrt.f32 %v218_v24  ;;  %vm449_vm3 = vcmp.lt.s32.totalorder %v4636_v1, %v447_v2 }
 0x1b5   :  { %vm4640_vm5 = vmand %vm439_vm4, %vm449_vm3 }
 0x1ba   :  { %v4138_v25 = vpop.eup %4137 }
 0x1bb   :  { %v221_v26 = vmul.f32 %v4138_v25, %v205_v8 }
 0x1bd   :  { %v229_v30 = vmul.f32 %v3475_v27, %v221_v26 }
 0x1be   :  { %v4140_v28 = vpop.eup %4139 }
 0x1bf   :  { %v222_v29 = vmul.f32 %v4140_v28, %v206_v12  ;;  %v237_v33 = vadd.f32 %v3476_v31, %v229_v30 }
 0x1c1   :  { %v230_v32 = vmul.f32 %v3475_v27, %v222_v29 }
 0x1c3   :  { %v238_v34 = vadd.f32 %v3476_v31, %v230_v32  ;;  %v581_v31 = vsel %vm452_vm10, 1, %v4387_v42 }
 0x1c5   :  { %v241_v36 = vpack.c.bf16 %v238_v34, %v237_v33 }
 0x1c7   :  { %3701 = vmatmul.mubr.msk.bf16.vlgmr.msra.gmra.mrb[0].mxu1 %vm195_vm0, %v241_v36 }
 0x1c8   :  { %3705 = vmatpush3.bf16.msra.mxu1 %v4106_v35  ;;  %3708 = vmatprep.mubr.msk.bf16.mxu1 %vm4386_vm1, %v4385_v17 }
 0x1c9   :  { %3706 = vmatprep.subr.bf16.mxu1 %v4385_v17 }
 0x1cc   :  { %3707 = vmatpush3.bf16.msra.mxu1 %v4107_v37 }
 0x1cd   :  { %3712 = vmatprep.subr.bf16.mxu1 %v4385_v17 }
 0x1cf   :  { %3709 = vmatmul.mubr.msk.bf16.vlgmr.msra.gmra.mrb[4].mxu1 %vm195_vm0, %v4108_v38 }
 0x1d0   :  { %3713 = vmatpush3.bf16.msra.mxu1 %v4109_v39  ;;  %3716 = vmatprep.mubr.msk.bf16.mxu1 %vm4386_vm1, %v4385_v17 }
 0x1d1   :  { %3714 = vmatprep.subr.bf16.mxu1 %v4385_v17 }
 0x1d4   :  { %3715 = vmatpush3.bf16.msra.mxu1 %v4110_v40 }
 0x1d5   :  { %3720 = vmatprep.subr.bf16.mxu1 %v4385_v17 }
 0x1d7   :  { %3717 = vmatmul.mubr.msk.bf16.vlgmr.msra.gmra.mrb[8].mxu1 %vm195_vm0, %v4108_v38 }
 0x1d8   :  { %3722 = vmatprep.mubr.msk.bf16.mxu1 %vm4386_vm1, %v4385_v17 }
 0x29a   :  { %v295_v46 = vpop.f32.mrb[0].mxu1 }
 0x29b   :  { %v3702_v47 = vpop.f32.mrb[1].mxu1  ;;  %v4623_v58 = vpack.c.bf16 %v295_v46, %v295_v46 }
 0x29c   :  { %v298_v48 = vpop.f32.mrb[2].mxu1 }
 0x29d   :  { %v3703_v49 = vpop.f32.mrb[3].mxu1  ;;  %v4625_v59 = vpack.c.bf16 %v298_v48, %v298_v48 }
 0x2a2   :  { %v360_v50 = vpop.f32.mrb[4].mxu1 }
 0x2a3   :  { %v4613_v51 = vpack.c.bf16 %v360_v50, %v360_v50  ;;  %v3710_v52 = vpop.f32.mrb[5].mxu1 }
 0x2a4   :  { %v363_v53 = vpop.f32.mrb[6].mxu1 }
 0x2a5   :  { %v4615_v54 = vpack.c.bf16 %v363_v53, %v363_v53  ;;  %v3711_v55 = vpop.f32.mrb[7].mxu1  ;;  %v469_v56 = vsel %vm464_vm2, %v4613_v51, 0 }
 0x2a6   :  { %3721 = vmatpush3.bf16.xpose.msra.mxu1 %v469_v56 }
 0x2a7   :  { %v515_v57 = vsel %vm464_vm2, %v4615_v54, 0  ;;  %3732 = vmatprep.subr.bf16.mxu1 %v4385_v17 }
 0x2a8   :  { %3727 = vmatpush3.bf16.xpose.msra.mxu0 %v515_v57 }
 0x2a9   :  { %3738 = vmatprep.subr.bf16.mxu0 %v4385_v17 }
 0x2aa   :  { %v417_v60 = vpop.f32.mrb[8].mxu1 }
 0x2ab   :  { %v3718_v61 = vpop.f32.mrb[9].mxu1  ;;  %v4662_v32 = vpack.c.bf16 %v417_v60, %v417_v60 }
 0x2ac   :  { %v420_v62 = vpop.f32.mrb[10].mxu1 }
 0x2ad   :  { %3723 = vmatmul.mubr.msk.bf16.vlgmr.msra.gmra.mrb[12].mxu1 %vm464_vm2, %v4623_v58  ;;  %v3719_v63 = vpop.f32.mrb[11].mxu1  ;;  %v4664_v33 = vpack.c.bf16 %v420_v62, %v420_v62  ;;  %v600_v34 = vsel %vm598_vm11, %v4662_v32, 0 }
 0x2ae   :  { %3734 = vmatprep.mubr.msk.bf16.mxu1 %vm4386_vm1, %v4385_v17  ;;  %3733 = vmatpush3.bf16.msra.mxu1 %v600_v34 }
 0x2af   :  { %3729 = vmatmul.mubr.msk.bf16.vlgmr.msra.gmra.mrb[0].mxu0 %vm464_vm2, %v4625_v59  ;;  %v646_v35 = vsel %vm598_vm11, %v4664_v33, 0  ;;  %3744 = vmatprep.subr.bf16.mxu1 %v4385_v17 }
 0x2b0   :  { %3740 = vmatprep.mubr.msk.bf16.mxu0 %vm4386_vm1, %v4385_v17  ;;  %3739 = vmatpush3.bf16.msra.mxu0 %v646_v35 }
 0x2b1   :  { %3750 = vmatprep.subr.bf16.mxu0 %v4385_v17 }
 0x380   :  { %v505_v4 = vpop.f32.mrb[12].mxu1 }
 0x381   :  { %v3724_v6 = vpop.f32.mrb[13].mxu1 }
 0x382   :  { %v508_v7 = vpop.f32.mrb[14].mxu1  ;;  %v551_v8 = vpop.f32.mrb[0].mxu0 }
 0x383   :  { %v558_v9 = vsel %vm4640_vm5, %v551_v8, -1e+30  ;;  %v3725_v10 = vpop.f32.mrb[15].mxu1  ;;  %v3730_v11 = vpop.f32.mrb[1].mxu0 }
 0x384   :  { %v554_v12 = vpop.f32.mrb[2].mxu0  ;;  %v562_v13 = vsel %vm464_vm2, %v558_v9, -inf }
 0x385   :  { %v3731_v14 = vpop.f32.mrb[3].mxu0  ;;  %563 = vmax.xlane.f32.xlu1 %v562_v13 }
 0x396   :  { %433 = vperm.xlu1 %4103, %v430_v18  }
 0x39a   :  { %443 = vperm.xlu1 %4103, %v440_v19  }
 0x39e   :  { %587 = vperm.xlu1 %4103, %v582_v20  }
 0x3a2   :  { %742 = vrot.lane.b32.xlu1 %v4625_v59, %s4388_s21 }
 0x412   :  { %v564_v21 = vpop.xlane.xlu1 %563 }
 0x413   :  { %v566_v22 = vsub.f32 %v558_v9, %v564_v21 }
 0x415   :  { %v569_v23 = vmul.f32 1.442695, %v566_v22 }
 0x416   :  { %v434_v24 = vpop.permute.xlu1 %433 }
 0x417   :  { %4141 = vpow2.f32 %v569_v23  ;;  %vm438_vm7 = vcmp.ge.s32.totalorder %v4636_v1, %v434_v24 }
 0x41a   :  { %v444_v25 = vpop.permute.xlu1 %443 }
 0x41b   :  { %vm448_vm8 = vcmp.lt.s32.totalorder %v4636_v1, %v444_v25 }
 0x41c   :  { %vm4653_vm9 = vmand %vm438_vm7, %vm448_vm8 }
 0x41d   :  { %v557_v27 = vsel %vm4653_vm9, %v505_v4, -1e+30 }
 0x41e   :  { %v559_v28 = vsel %vm464_vm2, %v557_v27, -inf  ;;  %v4676_v36 = vpop.permute.xlu1 %587 }
 0x41f   :  { %560 = vmax.xlane.f32.xlu1 %v559_v28  ;;  %vm590_vm12 = vcmp.eq.s32.totalorder %v4676_v36, 1 }
 0x421   :  { %v4142_v29 = vpop.eup %4141 }
 0x422   :  { %v574_v30 = vsel %vm464_vm2, %v4142_v29, 0.0  ;;  %v743_v37 = vpop.permute.xlu1 %742 }
 0x423   :  { %575 = vadd.xlane.f32.xlu0 %v574_v30 }
 0x430   :  { %584 = vperm.xlu1 %4103, %v581_v31  }
 0x434   :  { %690 = vrot.lane.b32.xlu1 %v4623_v58, %s4388_s21 }
 0x439   :  { %745 = vrot.lane.b32.xlu0 %v4615_v54, %s4388_s21 }
 0x4ac   :  { %v561_v38 = vpop.xlane.xlu1 %560 }
 0x4ad   :  { %v565_v39 = vsub.f32 %v557_v27, %v561_v38 }
 0x4af   :  { %v567_v40 = vmul.f32 1.442695, %v565_v39 }
 0x4b0   :  { %v576_v41 = vpop.xlane.xlu0 %575  ;;  %v4692_v53 = vpop.permute.xlu1 %584 }
 0x4b1   :  { %4143 = vpow2.f32 %v567_v40  ;;  %vm589_vm13 = vcmp.eq.s32.totalorder %v4692_v53, 1 }
 0x4b2   :  { %4145 = vrcp.f32 %v576_v41 }
 0x4b4   :  { %v746_v47 = vpop.permute.xlu0 %745  ;;  %v691_v63 = vpop.permute.xlu1 %690 }
 0x4b5   :  { %v751_v50 = vsel %vm464_vm2, %v746_v47, 0 }
 0x4bb   :  { %v4144_v43 = vpop.eup %4143 }
 0x4bc   :  { %v4146_v44 = vpop.eup %4145  ;;  %v571_v45 = vsel %vm464_vm2, %v4144_v43, 0.0 }
 0x4bd   :  { %v580_v46 = vmul.f32 %v4146_v44, %v4142_v29  ;;  %572 = vadd.xlane.f32.xlu0 %v571_v45 }
 0x4bf   :  { %v592_v48 = vsel %vm590_vm12, %v580_v46, 0.0 }
 0x4c0   :  { %v594_v49 = vpack.c.bf16 %v592_v48, %v592_v48 }
 0x4c2   :  { %3741 = vmatmul.mubr.msk.bf16.vlgmr.msra.gmra.mrb[4].mxu0 %vm464_vm2, %v594_v49 }
 0x4c3   :  { %3751 = vmatpush3.bf16.xpose.msra.mxu0 %v751_v50  ;;  %3752 = vmatprep.mubr.msk.bf16.mxu0 %vm4386_vm1, %v4385_v17 }
 0x4c4   :  { %3762 = vmatprep.subr.bf16.mxu0 %v4385_v17 }
 0x4ca   :  { %3753 = vmatmul.mubr.msk.bf16.vlgmr.msra.gmra.mrb[8].mxu0 %vm464_vm2, %v743_v37 }
 0x4cb   :  { %3764 = vmatprep.mubr.msk.bf16.mxu0 %vm4386_vm1, %v4385_v17 }
 0x4d3   :  { %693 = vrot.lane.b32.xlu0 %v4613_v51, %s4388_s21 }
 0x54a   :  { %v573_v52 = vpop.xlane.xlu0 %572 }
 0x54b   :  { %4147 = vrcp.f32 %v573_v52 }
 0x54e   :  { %v694_v57 = vpop.permute.xlu0 %693 }
 0x54f   :  { %v699_v62 = vsel %vm464_vm2, %v694_v57, 0 }
 0x555   :  { %v4148_v55 = vpop.eup %4147 }
 0x556   :  { %v579_v56 = vmul.f32 %v4148_v55, %v4144_v43 }
 0x558   :  { %v591_v60 = vsel %vm589_vm13, %v579_v56, 0.0 }
 0x559   :  { %v593_v61 = vpack.c.bf16 %v591_v60, %v591_v60 }
 0x55b   :  { %3735 = vmatmul.mubr.msk.bf16.vlgmr.msra.gmra.mrb[16].mxu1 %vm464_vm2, %v593_v61 }
 0x55c   :  { %3745 = vmatpush3.bf16.xpose.msra.mxu1 %v699_v62  ;;  %3746 = vmatprep.mubr.msk.bf16.mxu1 %vm4386_vm1, %v4385_v17 }
 0x55d   :  { %3756 = vmatprep.subr.bf16.mxu1 %v4385_v17 }
 0x563   :  { %3747 = vmatmul.mubr.msk.bf16.vlgmr.msra.gmra.mrb[20].mxu1 %vm464_vm2, %v691_v63 }
 0x564   :  { %3758 = vmatprep.mubr.msk.bf16.mxu1 %vm4386_vm1, %v4385_v17 }
 0x595   :  { %v4705_v2 = vpop.f32.mrb[4].mxu0 }
 0x596   :  { %v3742_v3 = vpop.f32.mrb[5].mxu0 }
 0x597   :  { %v685_v4 = vpop.f32.mrb[6].mxu0 }
 0x598   :  { %v3743_v6 = vpop.f32.mrb[7].mxu0 }
 0x59d   :  { %v787_v7 = vpop.f32.mrb[8].mxu0 }
 0x59e   :  { %v794_v8 = vsel %vm4640_vm5, %v787_v7, -1e+30  ;;  %v3754_v9 = vpop.f32.mrb[9].mxu0 }
 0x59f   :  { %v790_v10 = vpop.f32.mrb[10].mxu0  ;;  %v798_v11 = vsel %vm464_vm2, %v794_v8, -inf }
 0x5a0   :  { %799 = vmax.xlane.f32.xlu1 %v798_v11  ;;  %v3755_v12 = vpop.f32.mrb[11].mxu0 }
 0x5b1   :  { %871 = vrot.lane.b32.xlu1 %v4664_v33, %s4388_s21 }
 0x5b5   :  { %1014 = vrot.lane.b32.xlu1 %v4623_v58, %s4389_s13 }
 0x5b9   :  { %1066 = vrot.lane.b32.xlu1 %v4615_v54, %s4389_s13 }
 0x5bd   :  { %1064 = vrot.lane.b32.xlu1 %v4625_v59, %s4389_s13 }
 0x62d   :  { %v800_v13 = vpop.xlane.xlu1 %799 }
 0x62e   :  { %v802_v14 = vsub.f32 %v794_v8, %v800_v13  ;;  %v4718_v15 = vpop.f32.mrb[16].mxu1 }
 0x62f   :  { %v688_v16 = vpack.c.bf16 %v4705_v2, %v4718_v15  ;;  %v3736_v18 = vpop.f32.mrb[17].mxu1 }
 0x630   :  { %v805_v19 = vmul.f32 1.442695, %v802_v14  ;;  %v639_v20 = vpop.f32.mrb[18].mxu1 }
 0x631   :  { %v872_v21 = vpop.permute.xlu1 %871  ;;  %v3737_v22 = vpop.f32.mrb[19].mxu1  ;;  %v455_v20 = vld [vmem:[%s4448_s14 + $0x4] sm:$0xf] }
 0x632   :  { %4149 = vpow2.f32 %v805_v19  ;;  %v877_v23 = vsel %vm598_vm11, %v872_v21, 0  ;;  %v924_v21 = vsel %vm598_vm11, %v455_v20, 0 }
 0x633   :  { %3763 = vmatpush3.bf16.msra.mxu0 %v877_v23 }
 0x634   :  { %3780 = vmatprep.subr.bf16.mxu0 %v4385_v17 }
 0x635   :  { %v1015_v43 = vpop.permute.xlu1 %1014 }
 0x636   :  { %v735_v24 = vpop.f32.mrb[20].mxu1 }
 0x637   :  { %v3748_v25 = vpop.f32.mrb[21].mxu1  ;;  %v793_v31 = vsel %vm4653_vm9, %v735_v24, -1e+30 }
 0x638   :  { %v738_v27 = vpop.f32.mrb[22].mxu1  ;;  %v795_v34 = vsel %vm464_vm2, %v793_v31, -inf }
 0x639   :  { %v3749_v28 = vpop.f32.mrb[23].mxu1 }
 0x63c   :  { %v4150_v29 = vpop.eup %4149 }
 0x63d   :  { %v810_v30 = vsel %vm464_vm2, %v4150_v29, 0.0 }
 0x63e   :  { %811 = vadd.xlane.f32.xlu0 %v810_v30 }
 0x654   :  { %1016 = vrot.lane.b32.xlu0 %v4613_v51, %s4389_s13 }
 0x673   :  { %796 = vmax.xlane.f32.xlu0 %v795_v34 }
 0x689   :  { %822 = vrot.lane.b32.xlu0 %v4662_v32, %s4388_s21 }
 0x68d   :  { %1142 = vrot.lane.b32.xlu0 %v4662_v32, %s4389_s13 }
 0x691   :  { %1290 = vrot.lane.b32.xlu0 %v4613_v51, %s4390_s25 }
 0x695   :  { %1340 = vrot.lane.b32.xlu0 %v4615_v54, %s4390_s25  ;;  %v1067_v54 = vpop.permute.xlu1 %1066 }
 0x699   :  { %1288 = vrot.lane.b32.xlu0 %v4623_v58, %s4390_s25  ;;  %v1072_v58 = vsel %vm464_vm2, %v1067_v54, 0 }
 0x69d   :  { %1338 = vrot.lane.b32.xlu0 %v4625_v59, %s4390_s25  ;;  %v1065_v59 = vpop.permute.xlu1 %1064 }
 0x6cb   :  { %v812_v35 = vpop.xlane.xlu0 %811 }
 0x6cc   :  { %4151 = vrcp.f32 %v812_v35  ;;  %v454_v35 = vld [vmem:[%s4448_s14] sm:$0xf] }
 0x6cf   :  { %v1017_v39 = vpop.permute.xlu0 %1016 }
 0x6d0   :  { %v1022_v51 = vsel %vm464_vm2, %v1017_v39, 0 }
 0x6d6   :  { %v4152_v37 = vpop.eup %4151 }
 0x6d7   :  { %v816_v38 = vmul.f32 %v4152_v37, %v4150_v29 }
 0x6d9   :  { %v818_v40 = vsel %vm590_vm12, %v816_v38, 0.0 }
 0x6da   :  { %v820_v41 = vpack.c.bf16 %v818_v40, %v818_v40  ;;  %v971_v40 = vsel %vm598_vm11, %v454_v35, 0 }
 0x6dc   :  { %3765 = vmatmul.mubr.msk.bf16.vlgmr.msra.gmra.mrb[12].mxu0 %vm464_vm2, %v820_v41 }
 0x6dd   :  { %3781 = vmatpush3.bf16.xpose.msra.mxu0 %v1022_v51  ;;  %3782 = vmatprep.mubr.msk.bf16.mxu0 %vm4386_vm1, %v4385_v17 }
 0x6de   :  { %3786 = vmatprep.subr.bf16.mxu0 %v4385_v17 }
 0x6e4   :  { %3783 = vmatmul.mubr.msk.bf16.vlgmr.msra.gmra.mrb[16].mxu0 %vm464_vm2, %v1015_v43 }
 0x6e5   :  { %3787 = vmatpush3.bf16.xpose.msra.mxu0 %v1072_v58  ;;  %3788 = vmatprep.mubr.msk.bf16.mxu0 %vm4386_vm1, %v4385_v17 }
 0x6e6   :  { %3798 = vmatprep.subr.bf16.mxu0 %v4385_v17 }
 0x6ec   :  { %3789 = vmatmul.mubr.msk.bf16.vlgmr.msra.gmra.mrb[20].mxu0 %vm464_vm2, %v1065_v59 }
 0x6ed   :  { %3800 = vmatprep.mubr.msk.bf16.mxu0 %vm4386_vm1, %v4385_v17 }
 0x700   :  { %v797_v44 = vpop.xlane.xlu0 %796 }
 0x701   :  { %v801_v45 = vsub.f32 %v793_v31, %v797_v44 }
 0x703   :  { %v803_v46 = vmul.f32 1.442695, %v801_v45 }
 0x704   :  { %v823_v47 = vpop.permute.xlu0 %822 }
 0x705   :  { %4153 = vpow2.f32 %v803_v46  ;;  %v828_v48 = vsel %vm598_vm11, %v823_v47, 0 }
 0x706   :  { %3757 = vmatpush3.bf16.msra.mxu1 %v828_v48 }
 0x707   :  { %3768 = vmatprep.subr.bf16.mxu1 %v4385_v17 }
 0x708   :  { %v1143_v51 = vpop.permute.xlu0 %1142 }
 0x709   :  { %v1148_v54 = vsel %vm598_vm11, %v1143_v51, 0 }
 0x70c   :  { %v1291_v48 = vpop.permute.xlu0 %1290 }
 0x70f   :  { %v4154_v49 = vpop.eup %4153 }
 0x710   :  { %v807_v50 = vsel %vm464_vm2, %v4154_v49, 0.0 }
 0x711   :  { %808 = vadd.xlane.f32.xlu1 %v807_v50 }
 0x79e   :  { %v809_v52 = vpop.xlane.xlu1 %808 }
 0x79f   :  { %4155 = vrcp.f32 %v809_v52 }
 0x7a9   :  { %v4156_v55 = vpop.eup %4155 }
 0x7aa   :  { %v815_v56 = vmul.f32 %v4156_v55, %v4154_v49  ;;  %v1296_v55 = vsel %vm464_vm2, %v1291_v48, 0 }
 0x7ac   :  { %v817_v57 = vsel %vm589_vm13, %v815_v56, 0.0  ;;  %v1341_v56 = vpop.permute.xlu0 %1340 }
 0x7ad   :  { %v819_v60 = vpack.c.bf16 %v817_v57, %v817_v57 }
 0x7af   :  { %3759 = vmatmul.mubr.msk.bf16.vlgmr.msra.gmra.mrb[24].mxu1 %vm464_vm2, %v819_v60  ;;  %v913_v61 = vpop.f32.mrb[12].mxu0  ;;  %v456_v60 = vld [vmem:[%s4448_s14 + $0x8] sm:$0xf] }
 0x7b0   :  { %v3766_v62 = vpop.f32.mrb[13].mxu0  ;;  %3770 = vmatprep.mubr.msk.bf16.mxu1 %vm4386_vm1, %v4385_v17  ;;  %3769 = vmatpush3.bf16.msra.mxu1 %v924_v21  ;;  %v1289_v57 = vpop.permute.xlu0 %1288 }
 0x7b1   :  { %v916_v63 = vpop.f32.mrb[14].mxu0  ;;  %3774 = vmatprep.subr.bf16.mxu1 %v4385_v17 }
 0x7b2   :  { %v3767_v3 = vpop.f32.mrb[15].mxu0 }
 0x7b7   :  { %v1058_v4 = vpop.f32.mrb[16].mxu0 }
 0x7b8   :  { %v1114_v6 = vsel %vm4653_vm9, %v1058_v4, -1e+30  ;;  %v3784_v7 = vpop.f32.mrb[17].mxu0 }
 0x7b9   :  { %v1061_v8 = vpop.f32.mrb[18].mxu0  ;;  %v1116_v9 = vsel %vm464_vm2, %v1114_v6, -inf }
 0x7ba   :  { %1117 = vmax.xlane.f32.xlu1 %v1116_v9  ;;  %v3785_v10 = vpop.f32.mrb[19].mxu0 }
 0x7bb   :  { %v1346_v10 = vsel %vm464_vm2, %v1341_v56, 0 }
 0x7bf   :  { %v1108_v11 = vpop.f32.mrb[20].mxu0 }
 0x7c0   :  { %v1115_v12 = vsel %vm4640_vm5, %v1108_v11, -1e+30  ;;  %v3790_v13 = vpop.f32.mrb[21].mxu0 }
 0x7c1   :  { %v1111_v14 = vpop.f32.mrb[22].mxu0  ;;  %v1119_v18 = vsel %vm464_vm2, %v1115_v12, -inf }
 0x7c2   :  { %1120 = vmax.xlane.f32.xlu1 %v1119_v18  ;;  %v3791_v19 = vpop.f32.mrb[23].mxu0  ;;  %v1339_v18 = vpop.permute.xlu0 %1338 }
 0x847   :  { %v1118_v22 = vpop.xlane.xlu1 %1117 }
 0x848   :  { %v1122_v23 = vsub.f32 %v1114_v6, %v1118_v22 }
 0x84a   :  { %v1124_v24 = vmul.f32 1.442695, %v1122_v23 }
 0x84c   :  { %4157 = vpow2.f32 %v1124_v24 }
 0x84f   :  { %v1121_v25 = vpop.xlane.xlu1 %1120 }
 0x850   :  { %v1123_v27 = vsub.f32 %v1115_v12, %v1121_v25 }
 0x852   :  { %v1126_v28 = vmul.f32 1.442695, %v1123_v27 }
 0x854   :  { %4159 = vpow2.f32 %v1126_v28 }
 0x856   :  { %v4158_v29 = vpop.eup %4157 }
 0x857   :  { %v1128_v30 = vsel %vm464_vm2, %v4158_v29, 0.0 }
 0x858   :  { %1129 = vadd.xlane.f32.xlu1 %v1128_v30 }
 0x85e   :  { %v4160_v31 = vpop.eup %4159 }
 0x85f   :  { %v1131_v34 = vsel %vm464_vm2, %v4160_v31, 0.0 }
 0x860   :  { %1132 = vadd.xlane.f32.xlu1 %v1131_v34 }
 0x871   :  { %1190 = vrot.lane.b32.xlu1 %v4664_v33, %s4389_s13 }
 0x882   :  { %v864_v37 = vpop.f32.mrb[24].mxu1 }
 0x883   :  { %v919_v38 = vpack.c.bf16 %v913_v61, %v864_v37  ;;  %v3760_v39 = vpop.f32.mrb[25].mxu1  ;;  %v1243_v61 = vsel %vm598_vm11, %v456_v60, 0 }
 0x884   :  { %v867_v41 = vpop.f32.mrb[26].mxu1 }
 0x885   :  { %v3761_v43 = vpop.f32.mrb[27].mxu1  ;;  %3771 = vmatmul.mubr.msk.bf16.vlgmr.msra.gmra.mrb[28].mxu1 %vm464_vm2, %v919_v38 }
 0x886   :  { %3775 = vmatpush3.bf16.msra.mxu1 %v971_v40  ;;  %3776 = vmatprep.mubr.msk.bf16.mxu1 %vm4386_vm1, %v4385_v17 }
 0x887   :  { %3792 = vmatprep.subr.bf16.mxu1 %v4385_v17 }
 0x891   :  { %3777 = vmatmul.mubr.msk.bf16.vlgmr.msra.gmra.mrb[28].mxu1 %vm464_vm2, %v688_v16 }
 0x892   :  { %3793 = vmatpush3.bf16.msra.mxu1 %v1148_v54  ;;  %3794 = vmatprep.mubr.msk.bf16.mxu1 %vm4386_vm1, %v4385_v17 }
 0x893   :  { %3804 = vmatprep.subr.bf16.mxu1 %v4385_v17 }
 0x8e5   :  { %v1130_v58 = vpop.xlane.xlu1 %1129 }
 0x8e6   :  { %4161 = vrcp.f32 %v1130_v58 }
 0x8ed   :  { %v1133_v59 = vpop.xlane.xlu1 %1132 }
 0x8ee   :  { %4163 = vrcp.f32 %v1133_v59  ;;  %v3509_v59 = vld [vmem:[#allocation2] ss:$0 sm:$0xff] }
 0x8f0   :  { %v4162_v44 = vpop.eup %4161 }
 0x8f1   :  { %v1136_v45 = vmul.f32 %v4162_v44, %v4158_v29  ;;  %v1191_v46 = vpop.permute.xlu1 %1190 }
 0x8f2   :  { %v1196_v47 = vsel %vm598_vm11, %v1191_v46, 0 }
 0x8f3   :  { %3799 = vmatpush3.bf16.msra.mxu0 %v1196_v47  ;;  %v1138_v2 = vsel %vm589_vm13, %v1136_v45, 0.0 }
 0x8f4   :  { %v1140_v15 = vpack.c.bf16 %v1138_v2, %v1138_v2  ;;  %3810 = vmatprep.subr.bf16.mxu0 %v4385_v17  ;;  %v457_v2 = vld [vmem:[%s4448_s14 + $0xc] sm:$0xf]  ;;  %s5212_s14 = sld [smem:[#allocation23_spill]] }
 0x8f5   :  { %v1517_v48 = vsel %vm598_vm11, %v457_v2, 0  ;;  %v4117_v2 = vld [vmem:[%s4471_s12 + $0x20] sm:$0xff]  }
 0x8f6   :  { %3795 = vmatmul.mubr.msk.bf16.vlgmr.msra.gmra.mrb[32].mxu1 %vm464_vm2, %v1140_v15 }
 0x8f7   :  { %3806 = vmatprep.mubr.msk.bf16.mxu1 %vm4386_vm1, %v4385_v17  ;;  %3805 = vmatpush3.bf16.msra.mxu1 %v1243_v61 }
 0x8f8   :  { %v4164_v16 = vpop.eup %4163  ;;  %3816 = vmatprep.subr.bf16.mxu1 %v4385_v17 }
 0x8f9   :  { %v1137_v49 = vmul.f32 %v4164_v16, %v4160_v31 }
 0x8fb   :  { %v1139_v50 = vsel %vm590_vm12, %v1137_v49, 0.0 }
 0x8fc   :  { %v1141_v52 = vpack.c.bf16 %v1139_v50, %v1139_v50 }
 0x8fe   :  { %3801 = vmatmul.mubr.msk.bf16.vlgmr.msra.gmra.mrb[24].mxu0 %vm464_vm2, %v1141_v52 }
 0x8ff   :  { %3811 = vmatpush3.bf16.xpose.msra.mxu0 %v1296_v55  ;;  %3812 = vmatprep.mubr.msk.bf16.mxu0 %vm4386_vm1, %v4385_v17 }
 0x900   :  { %3822 = vmatprep.subr.bf16.mxu0 %v4385_v17 }
 0x906   :  { %3813 = vmatmul.mubr.msk.bf16.vlgmr.msra.gmra.mrb[28].mxu0 %vm464_vm2, %v1289_v57 }
 0x907   :  { %3824 = vmatprep.mubr.msk.bf16.mxu0 %vm4386_vm1, %v4385_v17 }
 0x9c9   :  { %v1184_v62 = vpop.f32.mrb[32].mxu1 }
 0x9ca   :  { %v3796_v63 = vpop.f32.mrb[33].mxu1 }
 0x9cb   :  { %v1187_v3 = vpop.f32.mrb[34].mxu1 }
 0x9cc   :  { %v3797_v4 = vpop.f32.mrb[35].mxu1 }
 0x9d1   :  { %v1232_v6 = vpop.f32.mrb[24].mxu0 }
 0x9d2   :  { %v1238_v7 = vpack.c.bf16 %v1232_v6, %v1184_v62  ;;  %v3802_v8 = vpop.f32.mrb[25].mxu0  ;;  %v4225_v6 = vld [vmem:[%s4403_s5] sm:$0xff] }
 0x9d3   :  { %v1235_v9 = vpop.f32.mrb[26].mxu0 }
 0x9d4   :  { %v3803_v11 = vpop.f32.mrb[27].mxu0  ;;  %3807 = vmatmul.mubr.msk.bf16.vlgmr.msra.gmra.mrb[28].mxu1 %vm464_vm2, %v1238_v7 }
 0x9d5   :  { %3817 = vmatpush3.bf16.xpose.msra.mxu1 %v1346_v10  ;;  %3818 = vmatprep.mubr.msk.bf16.mxu1 %vm4386_vm1, %v4385_v17  ;;  %v4226_v10 = vld [vmem:[%s4403_s5 + $0x8] sm:$0xff]  ;;  %s5208_s5 = sld [smem:[#allocation19_spill]] }
 0x9d6   :  { %3828 = vmatprep.subr.bf16.mxu1 %v4385_v17 }
 0x9d9   :  { %v1332_v12 = vpop.f32.mrb[28].mxu0 }
 0x9da   :  { %v1388_v13 = vsel %vm4653_vm9, %v1332_v12, -1e+30  ;;  %v3814_v14 = vpop.f32.mrb[29].mxu0 }
 0x9db   :  { %v1335_v19 = vpop.f32.mrb[30].mxu0  ;;  %v1390_v20 = vsel %vm464_vm2, %v1388_v13, -inf  ;;  %v3523_v14 = vld [vmem:[#allocation3] ss:$0 sm:$0xff] }
 0x9dc   :  { %3819 = vmatmul.mubr.msk.bf16.vlgmr.msra.gmra.mrb[36].mxu1 %vm464_vm2, %v1339_v18  ;;  %1391 = vmax.xlane.f32.xlu1 %v1390_v20  ;;  %v3815_v21 = vpop.f32.mrb[31].mxu0 }
 0x9dd   :  { %3830 = vmatprep.mubr.msk.bf16.mxu1 %vm4386_vm1, %v4385_v17 }
 0xa69   :  { %v1392_v22 = vpop.xlane.xlu1 %1391 }
 0xa6a   :  { %v1396_v23 = vsub.f32 %v1388_v13, %v1392_v22 }
 0xa6c   :  { %v1398_v24 = vmul.f32 1.442695, %v1396_v23 }
 0xa6e   :  { %4165 = vpow2.f32 %v1398_v24 }
 0xa78   :  { %v4166_v30 = vpop.eup %4165 }
 0xa79   :  { %v1402_v34 = vsel %vm464_vm2, %v4166_v30, 0.0 }
 0xaaf   :  { %v1382_v25 = vpop.f32.mrb[36].mxu1 }
 0xab0   :  { %v1389_v26 = vsel %vm4640_vm5, %v1382_v25, -1e+30  ;;  %v3820_v27 = vpop.f32.mrb[37].mxu1 }
 0xab1   :  { %v1385_v28 = vpop.f32.mrb[38].mxu1  ;;  %v1393_v29 = vsel %vm464_vm2, %v1389_v26, -inf }
 0xab2   :  { %1394 = vmax.xlane.f32.xlu0 %v1393_v29  ;;  %v3821_v31 = vpop.f32.mrb[39].mxu1  ;;  %v4111_v28 = vld [vmem:[%s4466_s6] sm:$0xff]   ;;  %v4112_v29 = vld [vmem:[%s4466_s6 + $0x8] sm:$0xff]   ;;  %s5215_s6 = sld [smem:[#allocation24_spill]] }
 0xab6   :  { %1403 = vadd.xlane.f32.xlu0 %v1402_v34 }
 0xacc   :  { %1416 = vrot.lane.b32.xlu0 %v4662_v32, %s4390_s25 }
 0xb3f   :  { %v1395_v35 = vpop.xlane.xlu0 %1394 }
 0xb40   :  { %v1397_v37 = vsub.f32 %v1389_v26, %v1395_v35 }
 0xb42   :  { %v1400_v38 = vmul.f32 1.442695, %v1397_v37 }
 0xb43   :  { %v1404_v39 = vpop.xlane.xlu0 %1403 }
 0xb44   :  { %4167 = vpow2.f32 %v1400_v38 }
 0xb45   :  { %4169 = vrcp.f32 %v1404_v39 }
 0xb47   :  { %v1417_v5 = vpop.permute.xlu0 %1416 }
 0xb48   :  { %v1422_v40 = vsel %vm598_vm11, %v1417_v5, 0 }
 0xb49   :  { %3823 = vmatpush3.bf16.msra.mxu0 %v1422_v40  ;;  %v3510_v40 = vld [vmem:[%s4456_s24] ss:$0 sm:$0xff]  ;;  %s5213_s24 = sld [smem:[#allocation22_spill]] }
 0xb4a   :  { %3840 = vmatprep.subr.bf16.mxu0 %v4385_v17 }
 0xb4e   :  { %v4168_v41 = vpop.eup %4167 }
 0xb4f   :  { %v4170_v43 = vpop.eup %4169  ;;  %v1405_v51 = vsel %vm464_vm2, %v4168_v41, 0.0 }
 0xb50   :  { %v1410_v54 = vmul.f32 %v4170_v43, %v4166_v30  ;;  %1406 = vadd.xlane.f32.xlu1 %v1405_v51 }
 0xb52   :  { %v1412_v32 = vsel %vm589_vm13, %v1410_v54, 0.0  ;;  %v3511_v54 = vld [vmem:[%s4461_s30] ss:$0 sm:$0xff]  ;;  %s5214_s30 = sld [smem:[#allocation20_spill]] }
 0xb53   :  { %v1414_v58 = vpack.c.bf16 %v1412_v32, %v1412_v32 }
 0xb55   :  { %3825 = vmatmul.mubr.msk.bf16.vlgmr.msra.gmra.mrb[32].mxu0 %vm464_vm2, %v1414_v58 }
 0xb56   :  { %3844 = vmatprep.mubr.msk.bf16.mxu0 %vm4386_vm1, %v4385_v17  ;;  %3841 = vmatpush3.bf16.msra.mxu0 %v4111_v28 }
 0xb57   :  { %3842 = vmatprep.subr.bf16.mxu0 %v4385_v17 }
 0xb5a   :  { %3843 = vmatpush3.bf16.msra.mxu0 %v4112_v29 }
 0xb5b   :  { %3848 = vmatprep.subr.bf16.mxu0 %v4385_v17 }
 0xb61   :  { %1464 = vrot.lane.b32.xlu1 %v4664_v33, %s4390_s25 }
 0xb65   :  { %1569 = vperm.xlu1 %4103, %v3509_v59  }
 0xbdd   :  { %v1407_v44 = vpop.xlane.xlu1 %1406 }
 0xbde   :  { %4171 = vrcp.f32 %v1407_v44  ;;  %v4113_v44 = vld [vmem:[%s4471_s12] sm:$0xff]  }
 0xbe1   :  { %v1465_v45 = vpop.permute.xlu1 %1464 }
 0xbe2   :  { %v1470_v46 = vsel %vm598_vm11, %v1465_v45, 0 }
 0xbe3   :  { %3829 = vmatpush3.bf16.msra.mxu1 %v1470_v46  ;;  %v4114_v46 = vld [vmem:[%s4471_s12 + $0x8] sm:$0xff]  }
 0xbe4   :  { %3834 = vmatprep.subr.bf16.mxu1 %v4385_v17 }
 0xbe5   :  { %v1570_v61 = vpop.permute.xlu1 %1569 }
 0xbe8   :  { %v4172_v53 = vpop.eup %4171 }
 0xbe9   :  { %v1411_v47 = vmul.f32 %v4172_v53, %v4168_v41  ;;  %v4115_v53 = vld [vmem:[%s4471_s12 + $0x10] sm:$0xff]  }
 0xbeb   :  { %v1413_v15 = vsel %vm590_vm12, %v1411_v47, 0.0  ;;  %v4116_v47 = vld [vmem:[%s4471_s12 + $0x18] sm:$0xff]  }
 0xbec   :  { %v1415_v16 = vpack.c.bf16 %v1413_v15, %v1413_v15  ;;  %v4118_v15 = vld [vmem:[%s4471_s12 + $0x28] sm:$0xff]  }
 0xbee   :  { %3831 = vmatmul.mubr.msk.bf16.vlgmr.msra.gmra.mrb[40].mxu1 %vm464_vm2, %v1415_v16  ;;  %v4119_v16 = vld [vmem:[%s4471_s12 + $0x30] sm:$0xff]  }
 0xbef   :  { %3835 = vmatpush3.bf16.msra.mxu1 %v1517_v48  ;;  %3836 = vmatprep.mubr.msk.bf16.mxu1 %vm4386_vm1, %v4385_v17  ;;  %v4120_v48 = vld [vmem:[%s4471_s12 + $0x38] sm:$0xff]   ;;  %s5216_s12 = sld [smem:[#allocation25_spill]] }
 0xbf0   :  { %3868 = vmatprep.subr.bf16.mxu1 %v4385_v17 }
 0xc28   :  { %v1458_v33 = vpop.f32.mrb[32].mxu0 }
 0xc29   :  { %v3826_v49 = vpop.f32.mrb[33].mxu0 }
 0xc2a   :  { %v1461_v50 = vpop.f32.mrb[34].mxu0 }
 0xc2b   :  { %v3827_v52 = vpop.f32.mrb[35].mxu0 }
 0xcc1   :  { %v1506_v55 = vpop.f32.mrb[40].mxu1 }
 0xcc2   :  { %v1512_v36 = vpack.c.bf16 %v1506_v55, %v1458_v33  ;;  %v3832_v56 = vpop.f32.mrb[41].mxu1 }
 0xcc3   :  { %v1509_v57 = vpop.f32.mrb[42].mxu1 }
 0xcc4   :  { %v3833_v60 = vpop.f32.mrb[43].mxu1  ;;  %3837 = vmatmul.mubr.msk.bf16.vlgmr.msra.gmra.mrb[28].mxu1 %vm464_vm2, %v1512_v36 }
 0xcc5   :  { %3872 = vmatprep.mubr.msk.bf16.mxu1 %vm4386_vm1, %v4385_v17 }
 0xd97   :  { %v1553_v62 = vpop.f32.mrb[28].mxu1 }
 0xd98   :  { %v1572_v63 = vmul.f32 %v1570_v61, %v1553_v62  ;;  %v3838_v3 = vpop.f32.mrb[29].mxu1 }
 0xd99   :  { %v1556_v4 = vpop.f32.mrb[30].mxu1 }
 0xd9a   :  { %v4853_v7 = vadd.f32 %v4225_v6, %v1572_v63  ;;  %v1573_v8 = vmul.f32 %v1570_v61, %v1556_v4  ;;  %v3839_v9 = vpop.f32.mrb[31].mxu1 }
 0xd9c   :  { %v4856_v11 = vadd.f32 %v4226_v10, %v1573_v8  ;;  %v1578_v12 = vsel %vm195_vm0, %v4853_v7, 0.0 }
 0xd9d   :  { %1579 = vadd.xlane.f32.xlu0 %v1578_v12 }
 0xd9e   :  { %v1581_v13 = vsel %vm195_vm0, %v4856_v11, 0.0 }
 0xd9f   :  { %1582 = vadd.xlane.f32.xlu1 %v1581_v13 }
 0xdb0   :  { %1812 = vperm.xlu1 %4103, %v3523_v14  }
 0xe2a   :  { %v1580_v18 = vpop.xlane.xlu0 %1579 }
 0xe2b   :  { %v1584_v19 = vmul.f32 0.03125, %v1580_v18 }
 0xe2c   :  { %v1583_v20 = vpop.xlane.xlu1 %1582 }
 0xe2d   :  { %v1586_v21 = vsub.f32 %v4853_v7, %v1584_v19  ;;  %v1585_v22 = vmul.f32 0.03125, %v1583_v20 }
 0xe2f   :  { %v1587_v23 = vsub.f32 %v4856_v11, %v1585_v22  ;;  %v1588_v24 = vmul.f32 %v1586_v21, %v1586_v21 }
 0xe30   :  { %v1813_v20 = vpop.permute.xlu1 %1812 }
 0xe31   :  { %v1590_v25 = vsel %vm195_vm0, %v1588_v24, 0.0  ;;  %v1589_v26 = vmul.f32 %v1587_v23, %v1587_v23 }
 0xe32   :  { %1591 = vadd.xlane.f32.xlu0 %v1590_v25 }
 0xe33   :  { %v1593_v27 = vsel %vm195_vm0, %v1589_v26, 0.0 }
 0xe36   :  { %1594 = vadd.xlane.f32.xlu0 %v1593_v27 }
 0xebf   :  { %v1592_v30 = vpop.xlane.xlu0 %1591 }
 0xec0   :  { %v1596_v31 = vmul.f32 0.03125, %v1592_v30 }
 0xec2   :  { %v1598_v34 = vadd.f32 1e-05, %v1596_v31 }
 0xec3   :  { %v1595_v35 = vpop.xlane.xlu0 %1594 }
 0xec4   :  { %4173 = vrsqrt.f32 %v1598_v34  ;;  %v1597_v37 = vmul.f32 0.03125, %v1595_v35 }
 0xec6   :  { %v1599_v38 = vadd.f32 1e-05, %v1597_v37 }
 0xec8   :  { %4175 = vrsqrt.f32 %v1599_v38 }
 0xece   :  { %v4174_v39 = vpop.eup %4173 }
 0xecf   :  { %v1602_v5 = vmul.f32 %v4174_v39, %v1586_v21 }
 0xed1   :  { %v1610_v43 = vmul.f32 %v3510_v40, %v1602_v5 }
 0xed2   :  { %v4176_v41 = vpop.eup %4175 }
 0xed3   :  { %v1603_v51 = vmul.f32 %v4176_v41, %v1587_v23  ;;  %v1618_v58 = vadd.f32 %v3511_v54, %v1610_v43  ;;  %v4121_v41 = vld [vmem:[%s5208_s5] sm:$0xff]   ;;  %v4122_v43 = vld [vmem:[%s5208_s5 + $0x8] sm:$0xff]  }
 0xed4   :  { %3869 = vmatpush3.bf16.msra.mxu1 %v4121_v41 }
 0xed5   :  { %v1611_v32 = vmul.f32 %v3510_v40, %v1603_v51  ;;  %3870 = vmatprep.subr.bf16.mxu1 %v4385_v17 }
 0xed7   :  { %v1619_v59 = vadd.f32 %v3511_v54, %v1611_v32 }
 0xed8   :  { %3871 = vmatpush3.bf16.msra.mxu1 %v4122_v43 }
 0xed9   :  { %v1620_v45 = vpack.c.bf16 %v1619_v59, %v1618_v58  ;;  %3876 = vmatprep.subr.bf16.mxu1 %v4385_v17 }
 0xedb   :  { %3845 = vmatmul.mubr.msk.bf16.vlgmr.msra.gmra.mrb[36].mxu0 %vm195_vm0, %v1620_v45 }
 0xedc   :  { %3849 = vmatpush3.bf16.msra.mxu0 %v4113_v44  ;;  %3864 = vmatprep.mubr.msk.bf16.mxu0 %vm4386_vm1, %v4385_v17 }
 0xedd   :  { %3850 = vmatprep.subr.bf16.mxu0 %v4385_v17 }
 0xee0   :  { %3851 = vmatpush3.bf16.msra.mxu0 %v4114_v46 }
 0xee1   :  { %3852 = vmatprep.subr.bf16.mxu0 %v4385_v17 }
 0xee4   :  { %3853 = vmatpush3.bf16.msra.mxu0 %v4115_v53  ;;  %v3524_v53 = vld [vmem:[%s5209_s29] ss:$0 sm:$0xff] }
 0xee5   :  { %3854 = vmatprep.subr.bf16.mxu0 %v4385_v17 }
 0xee8   :  { %3855 = vmatpush3.bf16.msra.mxu0 %v4116_v47 }
 0xee9   :  { %3856 = vmatprep.subr.bf16.mxu0 %v4385_v17 }
 0xeec   :  { %3857 = vmatpush3.bf16.msra.mxu0 %v4117_v2 }
 0xeed   :  { %3858 = vmatprep.subr.bf16.mxu0 %v4385_v17 }
 0xef0   :  { %3859 = vmatpush3.bf16.msra.mxu0 %v4118_v15 }
 0xef1   :  { %3860 = vmatprep.subr.bf16.mxu0 %v4385_v17 }
 0xef4   :  { %3861 = vmatpush3.bf16.msra.mxu0 %v4119_v16  ;;  %v3525_v16 = vld [vmem:[%s5210_s3] ss:$0 sm:$0xff] }
 0xef5   :  { %3862 = vmatprep.subr.bf16.mxu0 %v4385_v17 }
 0xef8   :  { %3863 = vmatpush3.bf16.msra.mxu0 %v4120_v48 }
 0xef9   :  { %3898 = vmatprep.subr.bf16.mxu0 %v4385_v17 }
 0xfae   :  { %v1674_v33 = vpop.f32.mrb[36].mxu0 }
 0xfaf   :  { %v1683_v49 = vmul.f32 0.044715, %v1674_v33  ;;  %v3846_v50 = vpop.f32.mrb[37].mxu0  ;;  %v1681_v10 = vmul.f32 0.5, %v1674_v33 }
 0xfb0   :  { %v1677_v52 = vpop.f32.mrb[38].mxu0  ;;  %v4123_v50 = vld [vmem:[%s5211_s8] sm:$0xff]  }
 0xfb1   :  { %v1685_v55 = vmul.f32 %v1683_v49, %v1674_v33  ;;  %v1684_v36 = vmul.f32 0.044715, %v1677_v52  ;;  %v3847_v56 = vpop.f32.mrb[39].mxu0  ;;  %v1682_v12 = vmul.f32 0.5, %v1677_v52 }
 0xfb2   :  { %v4126_v56 = vld [vmem:[%s5212_s14 + $0x8] sm:$0xff]  }
 0xfb3   :  { %v1687_v57 = vmul.f32 %v1685_v55, %v1674_v33  ;;  %v1686_v60 = vmul.f32 %v1684_v36, %v1677_v52  ;;  %v4124_v55 = vld [vmem:[%s5211_s8 + $0x8] sm:$0xff]   ;;  %v4125_v36 = vld [vmem:[%s5212_s14] sm:$0xff]  }
 0xfb5   :  { %v1689_v61 = vadd.f32 %v1687_v57, %v1674_v33  ;;  %v1688_v62 = vmul.f32 %v1686_v60, %v1677_v52 }
 0xfb7   :  { %v1691_v63 = vmul.f32 0.7978846, %v1689_v61  ;;  %v1690_v3 = vadd.f32 %v1688_v62, %v1677_v52 }
 0xfb9   :  { %4177 = vtanh.f32 %v1691_v63  ;;  %v1692_v4 = vmul.f32 0.7978846, %v1690_v3  ;;  %v3530_v63 = vld [vmem:[%s5213_s24] ss:$0 sm:$0xff] }
 0xfbb   :  { %4179 = vtanh.f32 %v1692_v4 }
 0xfc3   :  { %v4178_v6 = vpop.eup %4177 }
 0xfc4   :  { %v1695_v8 = vadd.f32 1.0, %v4178_v6 }
 0xfc5   :  { %v4180_v9 = vpop.eup %4179 }
 0xfc6   :  { %v1696_v13 = vadd.f32 1.0, %v4180_v9  ;;  %v1697_v14 = vmul.f32 %v1695_v8, %v1681_v10 }
 0xfc8   :  { %v1698_v18 = vmul.f32 %v1696_v13, %v1682_v12  ;;  %v3526_v13 = vld [vmem:[%s5214_s30] ss:$0 sm:$0xff] }
 0xfca   :  { %v1699_v19 = vpack.c.bf16 %v1698_v18, %v1697_v14 }
 0xfcc   :  { %3865 = vmatmul.mubr.bf16.vlgmr.msra.gmra.mrb[40].mxu0 %v1699_v19  ;;  %v3534_v19 = vld [vmem:[%s5215_s6] ss:$0 sm:$0xff] }
 0xfcd   :  { %3900 = vmatprep.mubr.msk.bf16.mxu0 %vm4386_vm1, %v4385_v17 }
0x109f   :  { %v1798_v21 = vpop.f32.mrb[40].mxu0 }
0x10a0   :  { %v1815_v22 = vmul.f32 %v1813_v20, %v1798_v21  ;;  %v3866_v23 = vpop.f32.mrb[41].mxu0 }
0x10a1   :  { %v1801_v24 = vpop.f32.mrb[42].mxu0 }
0x10a2   :  { %v4894_v25 = vadd.f32 %v1815_v22, %v4853_v7  ;;  %v1816_v26 = vmul.f32 %v1813_v20, %v1801_v24  ;;  %v3867_v27 = vpop.f32.mrb[43].mxu0 }
0x10a4   :  { %v4897_v28 = vadd.f32 %v1816_v26, %v4856_v11  ;;  %v1821_v29 = vsel %vm195_vm0, %v4894_v25, 0.0 }
0x10a5   :  { %1822 = vadd.xlane.f32.xlu0 %v1821_v29 }
0x10a6   :  { %v1824_v30 = vsel %vm195_vm0, %v4897_v28, 0.0 }
0x10a9   :  { %1825 = vadd.xlane.f32.xlu0 %v1824_v30 }
0x1132   :  { %v1823_v31 = vpop.xlane.xlu0 %1822 }
0x1133   :  { %v1827_v34 = vmul.f32 0.03125, %v1823_v31 }
0x1135   :  { %v1829_v7 = vsub.f32 %v4894_v25, %v1827_v34 }
0x1136   :  { %v1826_v35 = vpop.xlane.xlu0 %1825 }
0x1137   :  { %v1828_v37 = vmul.f32 0.03125, %v1826_v35  ;;  %v1831_v38 = vmul.f32 %v1829_v7, %v1829_v7 }
0x1139   :  { %v1830_v11 = vsub.f32 %v4897_v28, %v1828_v37  ;;  %v1833_v39 = vsel %vm195_vm0, %v1831_v38, 0.0 }
0x113a   :  { %1834 = vadd.xlane.f32.xlu0 %v1833_v39  ;;  %v2060_v39 = vshrl.u32 %v426_v0, 7 }
0x113b   :  { %v1832_v5 = vmul.f32 %v1830_v11, %v1830_v11 }
0x113c   :  { %vm2061_vm3 = vcmp.le.s32.totalorder %v4636_v1, %v2060_v39 }
0x113d   :  { %v1836_v40 = vsel %vm195_vm0, %v1832_v5, 0.0  ;;  %v2063_v5 = vld [vmem:[#allocation7 + $0x1] sm:$0x1] }
0x113e   :  { %1837 = vadd.xlane.f32.xlu0 %v1836_v40  ;;  %v2072_v40 = vsub.s32 0, %v2060_v39  ;;  %vm2065_vm15 = vcmp.gt.f32.partialorder %v2063_v5, 0.0 }
0x113f   :  { %v2069_v43 = vsel %vm2065_vm15, 1, %v4387_v42 }
0x11c7   :  { %v1835_v51 = vpop.xlane.xlu0 %1834 }
0x11c8   :  { %v1839_v54 = vmul.f32 0.03125, %v1835_v51 }
0x11ca   :  { %v1841_v32 = vadd.f32 1e-05, %v1839_v54  ;;  %v2077_v54 = vrot.slane %v2069_v43, %v2072_v40 }
0x11cb   :  { %v1838_v58 = vpop.xlane.xlu0 %1837 }
0x11cc   :  { %4181 = vrsqrt.f32 %v1841_v32  ;;  %v1840_v59 = vmul.f32 0.03125, %v1838_v58  ;;  %vm2079_vm5 = vcmp.eq.s32.totalorder %v2077_v54, 1  ;;  %v4391_v32 = vmov -1e+30  }
0x11cd   :  { %vm2081_vm7 = vmand %vm2061_vm3, %vm2079_vm5 }
0x11ce   :  { %v1842_v44 = vadd.f32 1e-05, %v1840_v59  ;;  %v4971_v59 = vsel %vm2081_vm7, 0.0, %v4391_v32 }
0x11d0   :  { %4183 = vrsqrt.f32 %v1842_v44 }
0x11d6   :  { %v4182_v45 = vpop.eup %4181 }
0x11d7   :  { %v1845_v46 = vmul.f32 %v4182_v45, %v1829_v7 }
0x11d9   :  { %v1853_v2 = vmul.f32 %v3524_v53, %v1845_v46 }
0x11da   :  { %v4184_v47 = vpop.eup %4183 }
0x11db   :  { %v1846_v15 = vmul.f32 %v4184_v47, %v1830_v11  ;;  %v1861_v33 = vadd.f32 %v3525_v16, %v1853_v2  ;;  %v2062_v11 = vld [vmem:[#allocation7] sm:$0x1] }
0x11dc   :  { %vm2064_vm14 = vcmp.gt.f32.partialorder %v2062_v11, 0.0 }
0x11dd   :  { %v1854_v48 = vmul.f32 %v3524_v53, %v1846_v15  ;;  %v2068_v41 = vsel %vm2064_vm14, 1, %v4387_v42 }
0x11de   :  { %v2073_v51 = vrot.slane %v2068_v41, %v2072_v40 }
0x11df   :  { %v1862_v49 = vadd.f32 %v3525_v16, %v1854_v48 }
0x11e0   :  { %vm2078_vm4 = vcmp.eq.s32.totalorder %v2073_v51, 1 }
0x11e1   :  { %v1863_v52 = vpack.c.bf16 %v1862_v49, %v1861_v33  ;;  %vm2080_vm6 = vmand %vm2061_vm3, %vm2078_vm4 }
0x11e2   :  { %v4969_v58 = vsel %vm2080_vm6, 0.0, %v4391_v32 }
0x11e3   :  { %3873 = vmatmul.mubr.msk.bf16.vlgmr.msra.gmra.mrb[44].mxu1 %vm195_vm0, %v1863_v52 }
0x11e4   :  { %3877 = vmatpush3.bf16.msra.mxu1 %v4123_v50  ;;  %3880 = vmatprep.mubr.msk.bf16.mxu1 %vm4386_vm1, %v4385_v17 }
0x11e5   :  { %3878 = vmatprep.subr.bf16.mxu1 %v4385_v17 }
0x11e8   :  { %3879 = vmatpush3.bf16.msra.mxu1 %v4124_v55 }
0x11e9   :  { %3884 = vmatprep.subr.bf16.mxu1 %v4385_v17 }
0x11eb   :  { %3881 = vmatmul.mubr.msk.bf16.vlgmr.msra.gmra.mrb[48].mxu1 %vm195_vm0, %v1863_v52 }
0x11ec   :  { %3885 = vmatpush3.bf16.msra.mxu1 %v4125_v36  ;;  %3888 = vmatprep.mubr.msk.bf16.mxu1 %vm4386_vm1, %v4385_v17 }
0x11ed   :  { %3886 = vmatprep.subr.bf16.mxu1 %v4385_v17 }
0x11f0   :  { %3887 = vmatpush3.bf16.msra.mxu1 %v4126_v56 }
0x11f1   :  { %3892 = vmatprep.subr.bf16.mxu1 %v4385_v17 }
0x11f3   :  { %3889 = vmatmul.mubr.msk.bf16.vlgmr.msra.gmra.mrb[52].mxu1 %vm195_vm0, %v1863_v52 }
0x11f4   :  { %3894 = vmatprep.mubr.msk.bf16.mxu1 %vm4386_vm1, %v4385_v17 }
0x12b6   :  { %v1924_v57 = vpop.f32.mrb[44].mxu1 }
0x12b7   :  { %v3874_v60 = vpop.f32.mrb[45].mxu1  ;;  %v1925_v20 = vadd.f32 %v3526_v13, %v1924_v57 }
0x12b8   :  { %v1927_v61 = vpop.f32.mrb[46].mxu1 }
0x12b9   :  { %v3875_v62 = vpop.f32.mrb[47].mxu1  ;;  %v1928_v23 = vadd.f32 %v3526_v13, %v1927_v61  ;;  %v4943_v29 = vpack.c.bf16 %v1925_v20, %v1925_v20 }
0x12bb   :  { %v4947_v7 = vpack.c.bf16 %v1928_v23, %v1928_v23 }
0x12be   :  { %v1988_v3 = vpop.f32.mrb[48].mxu1 }
0x12bf   :  { %v1989_v4 = vadd.f32 %v3530_v63, %v1988_v3  ;;  %v3882_v6 = vpop.f32.mrb[49].mxu1 }
0x12c0   :  { %v1991_v8 = vpop.f32.mrb[50].mxu1 }
0x12c1   :  { %v4931_v9 = vpack.c.bf16 %v1989_v4, %v1989_v4  ;;  %v1992_v10 = vadd.f32 %v3530_v63, %v1991_v8  ;;  %v3883_v12 = vpop.f32.mrb[51].mxu1 }
0x12c3   :  { %v4934_v14 = vpack.c.bf16 %v1992_v10, %v1992_v10  ;;  %v2098_v18 = vsel %vm464_vm2, %v4931_v9, 0 }
0x12c4   :  { %3893 = vmatpush3.bf16.xpose.msra.mxu1 %v2098_v18 }
0x12c5   :  { %v2144_v21 = vsel %vm464_vm2, %v4934_v14, 0  ;;  %3904 = vmatprep.subr.bf16.mxu1 %v4385_v17 }
0x12c6   :  { %v2052_v22 = vpop.f32.mrb[52].mxu1  ;;  %3899 = vmatpush3.bf16.xpose.msra.mxu0 %v2144_v21 }
0x12c7   :  { %v2053_v24 = vadd.f32 %v3534_v19, %v2052_v22  ;;  %v3890_v26 = vpop.f32.mrb[53].mxu1  ;;  %3910 = vmatprep.subr.bf16.mxu0 %v4385_v17 }
0x12c8   :  { %v2055_v27 = vpop.f32.mrb[54].mxu1 }
0x12c9   :  { %v4945_v30 = vpack.c.bf16 %v2053_v24, %v2053_v24  ;;  %v2056_v31 = vadd.f32 %v3534_v19, %v2055_v27  ;;  %v3891_v34 = vpop.f32.mrb[55].mxu1 }
0x12cb   :  { %v4949_v35 = vpack.c.bf16 %v2056_v31, %v2056_v31  ;;  %3895 = vmatmul.mubr.msk.bf16.vlgmr.msra.gmra.mrb[56].mxu1 %vm464_vm2, %v4943_v29  ;;  %v2214_v37 = vsel %vm598_vm11, %v4945_v30, 0 }
0x12cc   :  { %3905 = vmatpush3.bf16.msra.mxu1 %v2214_v37  ;;  %3906 = vmatprep.mubr.msk.bf16.mxu1 %vm4386_vm1, %v4385_v17 }
0x12cd   :  { %3901 = vmatmul.mubr.msk.bf16.vlgmr.msra.gmra.mrb[44].mxu0 %vm464_vm2, %v4947_v7  ;;  %v2260_v38 = vsel %vm598_vm11, %v4949_v35, 0  ;;  %3916 = vmatprep.subr.bf16.mxu1 %v4385_v17 }
0x12ce   :  { %3911 = vmatpush3.bf16.msra.mxu0 %v2260_v38  ;;  %3912 = vmatprep.mubr.msk.bf16.mxu0 %vm4386_vm1, %v4385_v17 }
0x12cf   :  { %3922 = vmatprep.subr.bf16.mxu0 %v4385_v17 }
0x139e   :  { %v2134_v0 = vpop.f32.mrb[56].mxu1 }
0x139f   :  { %v2135_v44 = vadd.f32 %v2134_v0, %v4969_v58  ;;  %v3896_v45 = vpop.f32.mrb[57].mxu1 }
0x13a0   :  { %v2137_v46 = vpop.f32.mrb[58].mxu1  ;;  %v2180_v53 = vpop.f32.mrb[44].mxu0 }
0x13a1   :  { %v2181_v42 = vadd.f32 %v2180_v53, %v4971_v59  ;;  %v3897_v47 = vpop.f32.mrb[59].mxu1  ;;  %v3902_v2 = vpop.f32.mrb[45].mxu0  ;;  %v2186_v1 = vsel %vm464_vm2, %v2135_v44, -inf }
0x13a2   :  { %2187 = vmax.xlane.f32.xlu1 %v2186_v1  ;;  %v2183_v15 = vpop.f32.mrb[46].mxu0 }
0x13a3   :  { %v3903_v16 = vpop.f32.mrb[47].mxu0  ;;  %v2189_v48 = vsel %vm464_vm2, %v2181_v42, -inf }
0x13a4   :  { %2190 = vmax.xlane.f32.xlu0 %v2189_v48 }
0x13b3   :  { %2304 = vrot.lane.b32.xlu1 %v4943_v29, %s4388_s21 }
0x13ba   :  { %2307 = vrot.lane.b32.xlu0 %v4931_v9, %s4388_s21 }
0x142f   :  { %v2188_v33 = vpop.xlane.xlu1 %2187 }
0x1430   :  { %v2192_v49 = vsub.f32 %v2135_v44, %v2188_v33 }
0x1431   :  { %v2191_v50 = vpop.xlane.xlu0 %2190 }
0x1432   :  { %v2194_v52 = vmul.f32 1.442695, %v2192_v49  ;;  %v2193_v55 = vsub.f32 %v2181_v42, %v2191_v50 }
0x1433   :  { %v2305_v21 = vpop.permute.xlu1 %2304 }
0x1434   :  { %4185 = vpow2.f32 %v2194_v52  ;;  %v2196_v36 = vmul.f32 1.442695, %v2193_v55 }
0x1435   :  { %v2308_v62 = vpop.permute.xlu0 %2307 }
0x1436   :  { %4187 = vpow2.f32 %v2196_v36  ;;  %v2313_v12 = vsel %vm464_vm2, %v2308_v62, 0 }
0x143e   :  { %v4186_v56 = vpop.eup %4185 }
0x143f   :  { %v2198_v57 = vsel %vm464_vm2, %v4186_v56, 0.0 }
0x1440   :  { %v4188_v60 = vpop.eup %4187  ;;  %2199 = vadd.xlane.f32.xlu0 %v2198_v57 }
0x1441   :  { %v2201_v61 = vsel %vm464_vm2, %v4188_v60, 0.0 }
0x1444   :  { %2202 = vadd.xlane.f32.xlu0 %v2201_v61  ;;  %v2085_v61 = vld [vmem:[%s5216_s12 + $0x4] sm:$0xf] }
0x145a   :  { %2359 = vrot.lane.b32.xlu0 %v4934_v14, %s4388_s21 }
0x145e   :  { %2356 = vrot.lane.b32.xlu0 %v4947_v7, %s4388_s21 }
0x14cd   :  { %v2200_v63 = vpop.xlane.xlu0 %2199 }
0x14ce   :  { %4189 = vrcp.f32 %v2200_v63 }
0x14d1   :  { %v2203_v3 = vpop.xlane.xlu0 %2202 }
0x14d2   :  { %4191 = vrcp.f32 %v2203_v3  ;;  %v2534_v3 = vsel %vm598_vm11, %v2085_v61, 0 }
0x14d5   :  { %v2360_v18 = vpop.permute.xlu0 %2359 }
0x14d6   :  { %v2365_v20 = vsel %vm464_vm2, %v2360_v18, 0 }
0x14d8   :  { %v4190_v4 = vpop.eup %4189 }
0x14d9   :  { %v2206_v6 = vmul.f32 %v4190_v4, %v4186_v56  ;;  %v2357_v22 = vpop.permute.xlu0 %2356 }
0x14db   :  { %v2208_v8 = vpack.c.bf16 %v2206_v6, %v2206_v6  ;;  %v2084_v6 = vld [vmem:[%s5216_s12] sm:$0xf] }
0x14dc   :  { %v4192_v10 = vpop.eup %4191 }
0x14dd   :  { %v2207_v13 = vmul.f32 %v4192_v10, %v4188_v60  ;;  %3907 = vmatmul.mubr.msk.bf16.vlgmr.msra.gmra.mrb[60].mxu1 %vm464_vm2, %v2208_v8 }
0x14de   :  { %3917 = vmatpush3.bf16.xpose.msra.mxu1 %v2313_v12  ;;  %3918 = vmatprep.mubr.msk.bf16.mxu1 %vm4386_vm1, %v4385_v17  ;;  %v2581_v12 = vsel %vm598_vm11, %v2084_v6, 0 }
0x14df   :  { %v2209_v19 = vpack.c.bf16 %v2207_v13, %v2207_v13  ;;  %3928 = vmatprep.subr.bf16.mxu1 %v4385_v17 }
0x14e1   :  { %3913 = vmatmul.mubr.msk.bf16.vlgmr.msra.gmra.mrb[48].mxu0 %vm464_vm2, %v2209_v19 }
0x14e2   :  { %3923 = vmatpush3.bf16.xpose.msra.mxu0 %v2365_v20  ;;  %3924 = vmatprep.mubr.msk.bf16.mxu0 %vm4386_vm1, %v4385_v17 }
0x14e3   :  { %3934 = vmatprep.subr.bf16.mxu0 %v4385_v17 }
0x14e5   :  { %3919 = vmatmul.mubr.msk.bf16.vlgmr.msra.gmra.mrb[64].mxu1 %vm464_vm2, %v2305_v21 }
0x14e6   :  { %3930 = vmatprep.mubr.msk.bf16.mxu1 %vm4386_vm1, %v4385_v17 }
0x14e9   :  { %3925 = vmatmul.mubr.msk.bf16.vlgmr.msra.gmra.mrb[52].mxu0 %vm464_vm2, %v2357_v22 }
0x14ea   :  { %3936 = vmatprep.mubr.msk.bf16.mxu0 %vm4386_vm1, %v4385_v17 }
0x15b0   :  { %v5003_v23 = vpop.f32.mrb[60].mxu1 }
0x15b1   :  { %v3908_v24 = vpop.f32.mrb[61].mxu1 }
0x15b2   :  { %v2253_v26 = vpop.f32.mrb[62].mxu1 }
0x15b3   :  { %v3909_v27 = vpop.f32.mrb[63].mxu1 }
0x15b4   :  { %v5005_v31 = vpop.f32.mrb[48].mxu0 }
0x15b5   :  { %v2302_v34 = vpack.c.bf16 %v5005_v31, %v5003_v23  ;;  %v3914_v37 = vpop.f32.mrb[49].mxu0 }
0x15b6   :  { %v2299_v38 = vpop.f32.mrb[50].mxu0 }
0x15b7   :  { %v3915_v11 = vpop.f32.mrb[51].mxu0 }
0x15b8   :  { %v2349_v39 = vpop.f32.mrb[64].mxu1 }
0x15b9   :  { %v2350_v5 = vadd.f32 %v2349_v39, %v4969_v58  ;;  %v3920_v40 = vpop.f32.mrb[65].mxu1 }
0x15ba   :  { %v2352_v41 = vpop.f32.mrb[66].mxu1 }
0x15bb   :  { %v3921_v43 = vpop.f32.mrb[67].mxu1  ;;  %v2407_v51 = vsel %vm464_vm2, %v2350_v5, -inf }
0x15bc   :  { %2408 = vmax.xlane.f32.xlu0 %v2407_v51  ;;  %v2401_v54 = vpop.f32.mrb[52].mxu0 }
0x15bd   :  { %v2402_v32 = vadd.f32 %v2401_v54, %v4971_v59  ;;  %v3926_v0 = vpop.f32.mrb[53].mxu0 }
0x15be   :  { %v2404_v44 = vpop.f32.mrb[54].mxu0 }
0x15bf   :  { %v3927_v45 = vpop.f32.mrb[55].mxu0  ;;  %v2410_v46 = vsel %vm464_vm2, %v2402_v32, -inf }
0x15c0   :  { %2411 = vmax.xlane.f32.xlu1 %v2410_v46 }
0x15d1   :  { %2481 = vrot.lane.b32.xlu1 %v4949_v35, %s4388_s21 }
0x15d5   :  { %2676 = vrot.lane.b32.xlu1 %v4934_v14, %s4389_s13 }
0x15d9   :  { %2674 = vrot.lane.b32.xlu1 %v4947_v7, %s4389_s13 }
0x1649   :  { %v2409_v53 = vpop.xlane.xlu0 %2408 }
0x164a   :  { %v2413_v42 = vsub.f32 %v2350_v5, %v2409_v53 }
0x164c   :  { %v2415_v47 = vmul.f32 1.442695, %v2413_v42 }
0x164d   :  { %v2412_v2 = vpop.xlane.xlu1 %2411 }
0x164e   :  { %4193 = vpow2.f32 %v2415_v47  ;;  %v2414_v1 = vsub.f32 %v2402_v32, %v2412_v2 }
0x1650   :  { %v2417_v15 = vmul.f32 1.442695, %v2414_v1 }
0x1651   :  { %v2482_v16 = vpop.permute.xlu1 %2481 }
0x1652   :  { %4195 = vpow2.f32 %v2417_v15  ;;  %v2487_v48 = vsel %vm598_vm11, %v2482_v16, 0 }
0x1653   :  { %3935 = vmatpush3.bf16.msra.mxu0 %v2487_v48 }
0x1654   :  { %3946 = vmatprep.subr.bf16.mxu0 %v4385_v17 }
0x1655   :  { %v2677_v13 = vpop.permute.xlu1 %2676 }
0x1656   :  { %v2682_v18 = vsel %vm464_vm2, %v2677_v13, 0 }
0x1658   :  { %v4194_v33 = vpop.eup %4193 }
0x1659   :  { %v2419_v49 = vsel %vm464_vm2, %v4194_v33, 0.0  ;;  %v2675_v19 = vpop.permute.xlu1 %2674 }
0x165a   :  { %2420 = vadd.xlane.f32.xlu0 %v2419_v49 }
0x165c   :  { %v4196_v50 = vpop.eup %4195 }
0x165d   :  { %v2422_v52 = vsel %vm464_vm2, %v4196_v50, 0.0 }
0x165e   :  { %2423 = vadd.xlane.f32.xlu0 %v2422_v52 }
0x1674   :  { %2432 = vrot.lane.b32.xlu0 %v4945_v30, %s4388_s21 }
0x1678   :  { %2626 = vrot.lane.b32.xlu0 %v4931_v9, %s4389_s13 }
0x167c   :  { %2624 = vrot.lane.b32.xlu0 %v4943_v29, %s4389_s13 }
0x16e7   :  { %v2421_v55 = vpop.xlane.xlu0 %2420 }
0x16e8   :  { %4197 = vrcp.f32 %v2421_v55 }
0x16eb   :  { %v2424_v36 = vpop.xlane.xlu0 %2423 }
0x16ec   :  { %4199 = vrcp.f32 %v2424_v36 }
0x16ef   :  { %v2433_v56 = vpop.permute.xlu0 %2432 }
0x16f0   :  { %v2438_v57 = vsel %vm598_vm11, %v2433_v56, 0 }
0x16f1   :  { %3929 = vmatpush3.bf16.msra.mxu1 %v2438_v57 }
0x16f2   :  { %v4198_v60 = vpop.eup %4197  ;;  %3940 = vmatprep.subr.bf16.mxu1 %v4385_v17 }
0x16f3   :  { %v2427_v62 = vmul.f32 %v4198_v60, %v4194_v33  ;;  %v2627_v24 = vpop.permute.xlu0 %2626 }
0x16f4   :  { %v2632_v37 = vsel %vm464_vm2, %v2627_v24, 0 }
0x16f5   :  { %v2429_v63 = vpack.c.bf16 %v2427_v62, %v2427_v62 }
0x16f6   :  { %v4200_v4 = vpop.eup %4199 }
0x16f7   :  { %v2428_v8 = vmul.f32 %v4200_v4, %v4196_v50  ;;  %3931 = vmatmul.mubr.msk.bf16.vlgmr.msra.gmra.mrb[68].mxu1 %vm464_vm2, %v2429_v63  ;;  %v2625_v5 = vpop.permute.xlu0 %2624 }
0x16f8   :  { %3941 = vmatpush3.bf16.msra.mxu1 %v2534_v3  ;;  %3942 = vmatprep.mubr.msk.bf16.mxu1 %vm4386_vm1, %v4385_v17 }
0x16f9   :  { %v2430_v10 = vpack.c.bf16 %v2428_v8, %v2428_v8  ;;  %3952 = vmatprep.subr.bf16.mxu1 %v4385_v17 }
0x16fb   :  { %3937 = vmatmul.mubr.msk.bf16.vlgmr.msra.gmra.mrb[56].mxu0 %vm464_vm2, %v2430_v10 }
0x16fc   :  { %3947 = vmatpush3.bf16.msra.mxu0 %v2581_v12  ;;  %3948 = vmatprep.mubr.msk.bf16.mxu0 %vm4386_vm1, %v4385_v17 }
0x16fd   :  { %3958 = vmatprep.subr.bf16.mxu0 %v4385_v17 }
0x1703   :  { %3949 = vmatmul.mubr.msk.bf16.vlgmr.msra.gmra.mrb[60].mxu0 %vm464_vm2, %v2302_v34 }
0x1704   :  { %3960 = vmatprep.mubr.msk.bf16.mxu0 %vm4386_vm1, %v4385_v17 }
0x1705   :  { %3959 = vmatpush3.bf16.xpose.msra.mxu0 %v2682_v18 }
0x1706   :  { %3970 = vmatprep.subr.bf16.mxu0 %v4385_v17 }
0x170c   :  { %3961 = vmatmul.mubr.msk.bf16.vlgmr.msra.gmra.mrb[64].mxu0 %vm464_vm2, %v2675_v19 }
0x170d   :  { %3972 = vmatprep.mubr.msk.bf16.mxu0 %vm4386_vm1, %v4385_v17 }
0x17ca   :  { %v2474_v20 = vpop.f32.mrb[68].mxu1 }
0x17cb   :  { %v3932_v21 = vpop.f32.mrb[69].mxu1 }
0x17cc   :  { %v2477_v22 = vpop.f32.mrb[70].mxu1 }
0x17cd   :  { %v3933_v23 = vpop.f32.mrb[71].mxu1  ;;  %v2086_v22 = vld [vmem:[%s5216_s12 + $0x8] sm:$0xf] }
0x17ce   :  { %v2523_v26 = vpop.f32.mrb[56].mxu0  ;;  %v2849_v23 = vsel %vm598_vm11, %v2086_v22, 0 }
0x17cf   :  { %v2529_v27 = vpack.c.bf16 %v2523_v26, %v2474_v20  ;;  %v3938_v31 = vpop.f32.mrb[57].mxu0 }
0x17d0   :  { %v2526_v34 = vpop.f32.mrb[58].mxu0 }
0x17d1   :  { %v3939_v38 = vpop.f32.mrb[59].mxu0  ;;  %3943 = vmatmul.mubr.msk.bf16.vlgmr.msra.gmra.mrb[72].mxu1 %vm464_vm2, %v2529_v27 }
0x17d2   :  { %3953 = vmatpush3.bf16.xpose.msra.mxu1 %v2632_v37  ;;  %3954 = vmatprep.mubr.msk.bf16.mxu1 %vm4386_vm1, %v4385_v17 }
0x17d3   :  { %3964 = vmatprep.subr.bf16.mxu1 %v4385_v17 }
0x17d6   :  { %v2617_v11 = vpop.f32.mrb[60].mxu0 }
0x17d7   :  { %v3950_v39 = vpop.f32.mrb[61].mxu0 }
0x17d8   :  { %v2620_v40 = vpop.f32.mrb[62].mxu0 }
0x17d9   :  { %v3951_v41 = vpop.f32.mrb[63].mxu0  ;;  %3955 = vmatmul.mubr.msk.bf16.vlgmr.msra.gmra.mrb[76].mxu1 %vm464_vm2, %v2625_v5 }
0x17da   :  { %3966 = vmatprep.mubr.msk.bf16.mxu1 %vm4386_vm1, %v4385_v17 }
0x17df   :  { %v2718_v43 = vpop.f32.mrb[64].mxu0 }
0x17e0   :  { %v2719_v51 = vadd.f32 %v2718_v43, %v4971_v59  ;;  %v3962_v54 = vpop.f32.mrb[65].mxu0 }
0x17e1   :  { %v2721_v32 = vpop.f32.mrb[66].mxu0 }
0x17e2   :  { %v3963_v0 = vpop.f32.mrb[67].mxu0  ;;  %v2727_v44 = vsel %vm464_vm2, %v2719_v51, -inf }
0x17e3   :  { %2728 = vmax.xlane.f32.xlu1 %v2727_v44 }
0x17f4   :  { %2748 = vrot.lane.b32.xlu1 %v4945_v30, %s4389_s13 }
0x17f8   :  { %2896 = vrot.lane.b32.xlu1 %v4931_v9, %s4390_s25 }
0x17fc   :  { %2946 = vrot.lane.b32.xlu1 %v4934_v14, %s4390_s25 }
0x1800   :  { %2944 = vrot.lane.b32.xlu1 %v4947_v7, %s4390_s25 }
0x1870   :  { %v2729_v45 = vpop.xlane.xlu1 %2728 }
0x1871   :  { %v2731_v42 = vsub.f32 %v2719_v51, %v2729_v45 }
0x1873   :  { %v2734_v47 = vmul.f32 1.442695, %v2731_v42 }
0x1874   :  { %v2749_v46 = vpop.permute.xlu1 %2748 }
0x1875   :  { %v2754_v53 = vsel %vm598_vm11, %v2749_v46, 0  ;;  %4201 = vpow2.f32 %v2734_v47 }
0x1876   :  { %3965 = vmatpush3.bf16.msra.mxu1 %v2754_v53 }
0x1877   :  { %3976 = vmatprep.subr.bf16.mxu1 %v4385_v17 }
0x1878   :  { %v2897_v13 = vpop.permute.xlu1 %2896 }
0x1879   :  { %v2902_v19 = vsel %vm464_vm2, %v2897_v13, 0 }
0x187c   :  { %v2947_v34 = vpop.permute.xlu1 %2946 }
0x187d   :  { %v2952_v5 = vsel %vm464_vm2, %v2947_v34, 0 }
0x187f   :  { %v4202_v55 = vpop.eup %4201 }
0x1880   :  { %v2739_v36 = vsel %vm464_vm2, %v4202_v55, 0.0  ;;  %v2945_v44 = vpop.permute.xlu1 %2944 }
0x18a4   :  { %v2570_v2 = vpop.f32.mrb[72].mxu1 }
0x18a5   :  { %v5074_v1 = vadd.f32 %v2617_v11, %v2570_v2  ;;  %v3944_v15 = vpop.f32.mrb[73].mxu1 }
0x18a6   :  { %v2573_v9 = vpop.f32.mrb[74].mxu1 }
0x18a7   :  { %v5076_v16 = vadd.f32 %v2620_v40, %v2573_v9  ;;  %v3945_v14 = vpop.f32.mrb[75].mxu1 }
0x18ac   :  { %v2668_v48 = vpop.f32.mrb[76].mxu1 }
0x18ad   :  { %v2669_v7 = vadd.f32 %v2668_v48, %v4969_v58  ;;  %v3956_v33 = vpop.f32.mrb[77].mxu1 }
0x18ae   :  { %v2671_v49 = vpop.f32.mrb[78].mxu1 }
0x18af   :  { %v3957_v50 = vpop.f32.mrb[79].mxu1  ;;  %v2724_v52 = vsel %vm464_vm2, %v2669_v7, -inf }
0x18b0   :  { %2725 = vmax.xlane.f32.xlu0 %v2724_v52 }
0x18b4   :  { %2740 = vadd.xlane.f32.xlu0 %v2739_v36 }
0x193d   :  { %v2726_v56 = vpop.xlane.xlu0 %2725 }
0x193e   :  { %v2730_v57 = vsub.f32 %v2669_v7, %v2726_v56 }
0x1940   :  { %v2732_v60 = vmul.f32 1.442695, %v2730_v57 }
0x1941   :  { %v2741_v63 = vpop.xlane.xlu0 %2740 }
0x1942   :  { %4203 = vpow2.f32 %v2732_v60 }
0x1943   :  { %4205 = vrcp.f32 %v2741_v63 }
0x194c   :  { %v4204_v61 = vpop.eup %4203 }
0x194d   :  { %v2736_v62 = vsel %vm464_vm2, %v4204_v61, 0.0  ;;  %v4206_v3 = vpop.eup %4205 }
0x194e   :  { %2737 = vadd.xlane.f32.xlu0 %v2736_v62  ;;  %v2745_v6 = vmul.f32 %v4206_v3, %v4202_v55  ;;  %v2087_v3 = vld [vmem:[%s5216_s12 + $0xc] sm:$0xf] }
0x1950   :  { %v2747_v12 = vpack.c.bf16 %v2745_v6, %v2745_v6 }
0x1964   :  { %2796 = vrot.lane.b32.xlu0 %v4949_v35, %s4389_s13 }
0x1968   :  { %2894 = vrot.lane.b32.xlu0 %v4943_v29, %s4390_s25 }
0x19db   :  { %v2738_v4 = vpop.xlane.xlu0 %2737 }
0x19dc   :  { %4207 = vrcp.f32 %v2738_v4  ;;  %v3119_v4 = vsel %vm598_vm11, %v2087_v3, 0  ;;  %v4133_v3 = vld [vmem:[%s4546_s4 + $0x20] sm:$0xff]  }
0x19df   :  { %v2797_v8 = vpop.permute.xlu0 %2796 }
0x19e0   :  { %v2802_v10 = vsel %vm598_vm11, %v2797_v8, 0 }
0x19e1   :  { %3971 = vmatpush3.bf16.msra.mxu0 %v2802_v10 }
0x19e2   :  { %3982 = vmatprep.subr.bf16.mxu0 %v4385_v17 }
0x19e3   :  { %v2895_v21 = vpop.permute.xlu0 %2894 }
0x19e4   :  { %3973 = vmatmul.mubr.msk.bf16.vlgmr.msra.gmra.mrb[68].mxu0 %vm464_vm2, %v2747_v12 }
0x19e5   :  { %3984 = vmatprep.mubr.msk.bf16.mxu0 %vm4386_vm1, %v4385_v17 }
0x19e6   :  { %v4208_v29 = vpop.eup %4207 }
0x19e7   :  { %v2744_v18 = vmul.f32 %v4208_v29, %v4204_v61 }
0x19e9   :  { %v2746_v20 = vpack.c.bf16 %v2744_v18, %v2744_v18 }
0x19ea   :  { %3983 = vmatpush3.bf16.xpose.msra.mxu0 %v2902_v19 }
0x19eb   :  { %3967 = vmatmul.mubr.msk.bf16.vlgmr.msra.gmra.mrb[80].mxu1 %vm464_vm2, %v2746_v20  ;;  %3994 = vmatprep.subr.bf16.mxu0 %v4385_v17 }
0x19ec   :  { %3978 = vmatprep.mubr.msk.bf16.mxu1 %vm4386_vm1, %v4385_v17  ;;  %3977 = vmatpush3.bf16.msra.mxu1 %v2849_v23 }
0x19ed   :  { %3988 = vmatprep.subr.bf16.mxu1 %v4385_v17 }
0x19f1   :  { %3985 = vmatmul.mubr.msk.bf16.vlgmr.msra.gmra.mrb[72].mxu0 %vm464_vm2, %v2895_v21 }
0x19f2   :  { %3996 = vmatprep.mubr.msk.bf16.mxu0 %vm4386_vm1, %v4385_v17 }
0x1ab7   :  { %v2838_v24 = vpop.f32.mrb[68].mxu0 }
0x1ab8   :  { %v3974_v26 = vpop.f32.mrb[69].mxu0 }
0x1ab9   :  { %v2841_v27 = vpop.f32.mrb[70].mxu0 }
0x1aba   :  { %v3975_v31 = vpop.f32.mrb[71].mxu0 }
0x1abe   :  { %v2790_v37 = vpop.f32.mrb[80].mxu1 }
0x1abf   :  { %v2844_v38 = vpack.c.bf16 %v2838_v24, %v2790_v37  ;;  %v3968_v11 = vpop.f32.mrb[81].mxu1  ;;  %v3558_v37 = vld [vmem:[%s5217_s10] ss:$0 sm:$0xff] }
0x1ac0   :  { %v2793_v39 = vpop.f32.mrb[82].mxu1 }
0x1ac1   :  { %v3969_v40 = vpop.f32.mrb[83].mxu1  ;;  %3979 = vmatmul.mubr.msk.bf16.vlgmr.msra.gmra.mrb[84].mxu1 %vm464_vm2, %v2844_v38 }
0x1ac2   :  { %3989 = vmatpush3.bf16.xpose.msra.mxu1 %v2952_v5  ;;  %3990 = vmatprep.mubr.msk.bf16.mxu1 %vm4386_vm1, %v4385_v17 }
0x1ac3   :  { %4000 = vmatprep.subr.bf16.mxu1 %v4385_v17 }
0x1ac4   :  { %v2938_v41 = vpop.f32.mrb[72].mxu0 }
0x1ac5   :  { %v2939_v43 = vadd.f32 %v2938_v41, %v4969_v58  ;;  %v3986_v51 = vpop.f32.mrb[73].mxu0 }
0x1ac6   :  { %v2941_v54 = vpop.f32.mrb[74].mxu0 }
0x1ac7   :  { %v3987_v32 = vpop.f32.mrb[75].mxu0  ;;  %v2994_v0 = vsel %vm464_vm2, %v2939_v43, -inf }
0x1ac8   :  { %2995 = vmax.xlane.f32.xlu0 %v2994_v0 }
0x1ac9   :  { %3991 = vmatmul.mubr.msk.bf16.vlgmr.msra.gmra.mrb[88].mxu1 %vm464_vm2, %v2945_v44 }
0x1aca   :  { %4002 = vmatprep.mubr.msk.bf16.mxu1 %vm4386_vm1, %v4385_v17 }
0x1b55   :  { %v2996_v45 = vpop.xlane.xlu0 %2995 }
0x1b56   :  { %v3000_v46 = vsub.f32 %v2939_v43, %v2996_v45 }
0x1b58   :  { %v3002_v53 = vmul.f32 1.442695, %v3000_v46 }
0x1b5a   :  { %4209 = vpow2.f32 %v3002_v53 }
0x1b64   :  { %v4210_v42 = vpop.eup %4209 }
0x1b65   :  { %v3006_v47 = vsel %vm464_vm2, %v4210_v42, 0.0 }
0x1b66   :  { %3007 = vadd.xlane.f32.xlu0 %v3006_v47 }
0x1b94   :  { %v2885_v58 = vpop.f32.mrb[84].mxu1 }
0x1b95   :  { %v2892_v2 = vadd.f32 %v2885_v58, %v5074_v1  ;;  %v3980_v15 = vpop.f32.mrb[85].mxu1  ;;  %v4127_v58 = vld [vmem:[%s5218_s11] sm:$0xff]  }
0x1b96   :  { %v2888_v9 = vpop.f32.mrb[86].mxu1 }
0x1b97   :  { %v2893_v14 = vadd.f32 %v2888_v9, %v5076_v16  ;;  %v3981_v48 = vpop.f32.mrb[87].mxu1 }
0x1b9c   :  { %v2988_v7 = vpop.f32.mrb[88].mxu1 }
0x1b9d   :  { %v2989_v33 = vadd.f32 %v2988_v7, %v4971_v59  ;;  %v3992_v49 = vpop.f32.mrb[89].mxu1 }
0x1b9e   :  { %v2991_v50 = vpop.f32.mrb[90].mxu1 }
0x1b9f   :  { %v3993_v52 = vpop.f32.mrb[91].mxu1  ;;  %v2997_v55 = vsel %vm464_vm2, %v2989_v33, -inf  ;;  %v3559_v50 = vld [vmem:[%s5219_s20] ss:$0 sm:$0xff] }
0x1ba0   :  { %2998 = vmax.xlane.f32.xlu1 %v2997_v55 }
0x1bb1   :  { %3018 = vrot.lane.b32.xlu1 %v4945_v30, %s4390_s25 }
0x1bf3   :  { %v3008_v36 = vpop.xlane.xlu0 %3007 }
0x1bf4   :  { %4211 = vrcp.f32 %v3008_v36 }
0x1bfe   :  { %v4212_v1 = vpop.eup %4211 }
0x1bff   :  { %v3014_v16 = vmul.f32 %v4212_v1, %v4210_v42 }
0x1c01   :  { %v3016_v62 = vpack.c.bf16 %v3014_v16, %v3014_v16 }
0x1c2d   :  { %v2999_v56 = vpop.xlane.xlu1 %2998 }
0x1c2e   :  { %v3001_v57 = vsub.f32 %v2989_v33, %v2999_v56  ;;  %v3560_v56 = vld [vmem:[%s5220_s16] ss:$0 sm:$0xff] }
0x1c30   :  { %v3004_v60 = vmul.f32 1.442695, %v3001_v57 }
0x1c31   :  { %v3019_v61 = vpop.permute.xlu1 %3018 }
0x1c32   :  { %4213 = vpow2.f32 %v3004_v60  ;;  %v3024_v59 = vsel %vm598_vm11, %v3019_v61, 0 }
0x1c33   :  { %3995 = vmatpush3.bf16.msra.mxu0 %v3024_v59  ;;  %v4129_v59 = vld [vmem:[%s4546_s4] sm:$0xff]  }
0x1c34   :  { %4006 = vmatprep.subr.bf16.mxu0 %v4385_v17 }
0x1c36   :  { %3997 = vmatmul.mubr.msk.bf16.vlgmr.msra.gmra.mrb[76].mxu0 %vm464_vm2, %v3016_v62  ;;  %v4130_v62 = vld [vmem:[%s4546_s4 + $0x8] sm:$0xff]  }
0x1c37   :  { %4008 = vmatprep.mubr.msk.bf16.mxu0 %vm4386_vm1, %v4385_v17  ;;  %4007 = vmatpush3.bf16.msra.mxu0 %v3119_v4  ;;  %v4134_v4 = vld [vmem:[%s4546_s4 + $0x28] sm:$0xff]  }
0x1c38   :  { %4020 = vmatprep.subr.bf16.mxu0 %v4385_v17 }
0x1c3c   :  { %v4214_v30 = vpop.eup %4213 }
0x1c3d   :  { %v3009_v63 = vsel %vm464_vm2, %v4214_v30, 0.0 }
0x1c3e   :  { %3010 = vadd.xlane.f32.xlu0 %v3009_v63  ;;  %v4132_v63 = vld [vmem:[%s4546_s4 + $0x18] sm:$0xff]  }
0x1c54   :  { %3066 = vrot.lane.b32.xlu0 %v4949_v35, %s4390_s25 }
0x1ccb   :  { %v3011_v6 = vpop.xlane.xlu0 %3010 }
0x1ccc   :  { %4215 = vrcp.f32 %v3011_v6  ;;  %v4135_v6 = vld [vmem:[%s4546_s4 + $0x30] sm:$0xff]  }
0x1ccf   :  { %v3067_v8 = vpop.permute.xlu0 %3066 }
0x1cd0   :  { %v3072_v10 = vsel %vm598_vm11, %v3067_v8, 0  ;;  %v4136_v8 = vld [vmem:[%s4546_s4 + $0x38] sm:$0xff]  }
0x1cd1   :  { %4001 = vmatpush3.bf16.msra.mxu1 %v3072_v10  ;;  %v3561_v10 = vld [vmem:[%s5221_s18] ss:$0 sm:$0xff] }
0x1cd2   :  { %4012 = vmatprep.subr.bf16.mxu1 %v4385_v17 }
0x1cd6   :  { %v4216_v12 = vpop.eup %4215 }
0x1cd7   :  { %v3015_v29 = vmul.f32 %v4216_v12, %v4214_v30  ;;  %v4131_v30 = vld [vmem:[%s4546_s4 + $0x10] sm:$0xff]   ;;  %s4392_s4 = smov [#allocation12]  }
0x1cd8   :  { %s3429_s17 = sshll.u32 %s4392_s4, 4  ;;  %s3430_s17 = int_to_ptr.vmem [resolvable:$true] %s3429_s17 }
0x1cd9   :  { %v3017_v13 = vpack.c.bf16 %v3015_v29, %v3015_v29  ;;  %s4315_s19 = scalar_lea.vmem %s3430_s17, 256  ;;  %p4320_p5 = scmp.lt.s32.totalorder %s3430_s17, %s3430_s17 }
0x1cda   :  { %p4316_p4 = scmp.ne.s32.totalorder %s3430_s17, %s4315_s19  ;;  %p4321_p6 = scmp.lt.s32.totalorder %s4315_s19, %s4315_s19 }
0x1cdb   :  { %4003 = vmatmul.mubr.msk.bf16.vlgmr.msra.gmra.mrb[92].mxu1 %vm464_vm2, %v3017_v13 }
0x1cdc   :  { %4016 = vmatprep.mubr.msk.bf16.mxu1 %vm4386_vm1, %v4385_v17  ;;  %4013 = vmatpush3.bf16.msra.mxu1 %v4127_v58  ;;  %p4322_p7 = por %p4321_p6, %p4320_p5 }
0x1cdd   :  { %4014 = vmatprep.subr.bf16.mxu1 %v4385_v17 }
0x1cde   :  { %p4323_p8 = pnand %p4322_p7, %p4316_p4 }
0x1d09   :  { %v3060_v35 = vpop.f32.mrb[76].mxu0 }
0x1d0a   :  { %v3998_v18 = vpop.f32.mrb[77].mxu0 }
0x1d0b   :  { %v3063_v19 = vpop.f32.mrb[78].mxu0 }
0x1d0c   :  { %v3999_v20 = vpop.f32.mrb[79].mxu0 }
0x1dae   :  { %v3108_v21 = vpop.f32.mrb[92].mxu1 }
0x1daf   :  { %v3114_v22 = vpack.c.bf16 %v3108_v21, %v3060_v35  ;;  %v4004_v23 = vpop.f32.mrb[93].mxu1 }
0x1db0   :  { %v3111_v24 = vpop.f32.mrb[94].mxu1 }
0x1db1   :  { %v4005_v26 = vpop.f32.mrb[95].mxu1  ;;  %4009 = vmatmul.mubr.msk.bf16.vlgmr.msra.gmra.mrb[80].mxu0 %vm464_vm2, %v3114_v22 }
0x1db2   :  { %4036 = vmatprep.mubr.msk.bf16.mxu0 %vm4386_vm1, %v4385_v17  ;;  %4021 = vmatpush3.bf16.msra.mxu0 %v4129_v59 }
0x1db3   :  { %4022 = vmatprep.subr.bf16.mxu0 %v4385_v17 }
0x1db6   :  { %4023 = vmatpush3.bf16.msra.mxu0 %v4130_v62 }
0x1db7   :  { %4024 = vmatprep.subr.bf16.mxu0 %v4385_v17 }
0x1dba   :  { %4025 = vmatpush3.bf16.msra.mxu0 %v4131_v30 }
0x1dbb   :  { %4026 = vmatprep.subr.bf16.mxu0 %v4385_v17 }
0x1dbe   :  { %4027 = vmatpush3.bf16.msra.mxu0 %v4132_v63 }
0x1dbf   :  { %4028 = vmatprep.subr.bf16.mxu0 %v4385_v17 }
0x1dc2   :  { %4029 = vmatpush3.bf16.msra.mxu0 %v4133_v3 }
0x1dc3   :  { %4030 = vmatprep.subr.bf16.mxu0 %v4385_v17 }
0x1dc6   :  { %4031 = vmatpush3.bf16.msra.mxu0 %v4134_v4 }
0x1dc7   :  { %4032 = vmatprep.subr.bf16.mxu0 %v4385_v17 }
0x1dca   :  { %4033 = vmatpush3.bf16.msra.mxu0 %v4135_v6 }
0x1dcb   :  { %4034 = vmatprep.subr.bf16.mxu0 %v4385_v17 }
0x1dce   :  { %4035 = vmatpush3.bf16.msra.mxu0 %v4136_v8 }
0x1e84   :  { %v3155_v27 = vpop.f32.mrb[80].mxu0 }
0x1e85   :  { %v3162_v31 = vadd.f32 %v3155_v27, %v2892_v2  ;;  %v4010_v34 = vpop.f32.mrb[81].mxu0  ;;  %v4128_v2 = vld [vmem:[%s5218_s11 + $0x8] sm:$0xff]  }
0x1e86   :  { %v3158_v38 = vpop.f32.mrb[82].mxu0  ;;  %4015 = vmatpush3.bf16.msra.mxu1 %v4128_v2 }
0x1e87   :  { %v3164_v11 = vadd.f32 %v3162_v31, %v4894_v25  ;;  %v3163_v39 = vadd.f32 %v3158_v38, %v2893_v14  ;;  %v4011_v5 = vpop.f32.mrb[83].mxu0 }
0x1e89   :  { %v5140_v40 = vadd.f32 %v3558_v37, %v3164_v11  ;;  %v3165_v41 = vadd.f32 %v3163_v39, %v4897_v28 }
0x1e8b   :  { %v5143_v43 = vadd.f32 %v3558_v37, %v3165_v41  ;;  %v3177_v51 = vsel %vm195_vm0, %v5140_v40, 0.0 }
0x1e8c   :  { %3178 = vadd.xlane.f32.xlu1 %v3177_v51 }
0x1e8d   :  { %v3180_v54 = vsel %vm195_vm0, %v5143_v43, 0.0 }
0x1e8e   :  { %3181 = vadd.xlane.f32.xlu0 %v3180_v54 }
0x1f19   :  { %v3179_v32 = vpop.xlane.xlu1 %3178 }
0x1f1a   :  { %v3183_v25 = vmul.f32 0.03125, %v3179_v32 }
0x1f1b   :  { %v3182_v0 = vpop.xlane.xlu0 %3181 }
0x1f1c   :  { %v3185_v44 = vsub.f32 %v5140_v40, %v3183_v25  ;;  %v3184_v45 = vmul.f32 0.03125, %v3182_v0  ;;  %v3573_v0 = vld [vmem:[%s4551_s15] ss:$0 sm:$0xff] }
0x1f1e   :  { %v3186_v28 = vsub.f32 %v5143_v43, %v3184_v45  ;;  %v3187_v46 = vmul.f32 %v3185_v44, %v3185_v44 }
0x1f20   :  { %v3189_v53 = vsel %vm195_vm0, %v3187_v46, 0.0  ;;  %v3188_v42 = vmul.f32 %v3186_v28, %v3186_v28 }
0x1f21   :  { %3190 = vadd.xlane.f32.xlu1 %v3189_v53 }
0x1f22   :  { %v3192_v47 = vsel %vm195_vm0, %v3188_v42, 0.0 }
0x1f23   :  { %3193 = vadd.xlane.f32.xlu0 %v3192_v47 }
0x1fae   :  { %v3191_v15 = vpop.xlane.xlu1 %3190 }
0x1faf   :  { %v3195_v9 = vmul.f32 0.03125, %v3191_v15 }
0x1fb0   :  { %v3194_v14 = vpop.xlane.xlu0 %3193 }
0x1fb1   :  { %v3197_v48 = vadd.f32 1e-05, %v3195_v9  ;;  %v3196_v7 = vmul.f32 0.03125, %v3194_v14 }
0x1fb3   :  { %4217 = vrsqrt.f32 %v3197_v48  ;;  %v3198_v33 = vadd.f32 1e-05, %v3196_v7 }
0x1fb5   :  { %4219 = vrsqrt.f32 %v3198_v33 }
0x1fbd   :  { %v4218_v49 = vpop.eup %4217 }
0x1fbe   :  { %v3201_v52 = vmul.f32 %v4218_v49, %v3185_v44 }
0x1fbf   :  { %v4220_v55 = vpop.eup %4219 }
0x1fc0   :  { %v3209_v36 = vmul.f32 %v3559_v50, %v3201_v52  ;;  %v3202_v1 = vmul.f32 %v4220_v55, %v3186_v28 }
0x1fc2   :  { %v3210_v57 = vmul.f32 %v3559_v50, %v3202_v1  ;;  %v3217_v16 = vadd.f32 %v3560_v56, %v3209_v36 }
0x1fc4   :  { %v3218_v60 = vadd.f32 %v3560_v56, %v3210_v57 }
0x1fc6   :  { %v3219_v61 = vpack.c.bf16 %v3218_v60, %v3217_v16 }
0x1fc8   :  { %4017 = vmatmul.mubr.msk.bf16.vlgmr.msra.gmra.mrb[96].mxu1 %vm195_vm0, %v3219_v61 }
0x209b   :  { %v3280_v12 = vpop.f32.mrb[96].mxu1 }
0x209c   :  { %v3281_v29 = vadd.f32 %v3561_v10, %v3280_v12  ;;  %v4018_v13 = vpop.f32.mrb[97].mxu1 }
0x209d   :  { %v3283_v35 = vpop.f32.mrb[98].mxu1 }
0x209e   :  { %v3289_v18 = vmul.f32 0.044715, %v3281_v29  ;;  %v3284_v19 = vadd.f32 %v3561_v10, %v3283_v35  ;;  %v4019_v20 = vpop.f32.mrb[99].mxu1  ;;  %v3287_v39 = vmul.f32 0.5, %v3281_v29 }
0x20a0   :  { %v3291_v21 = vmul.f32 %v3289_v18, %v3281_v29  ;;  %v3290_v22 = vmul.f32 0.044715, %v3284_v19  ;;  %v3288_v5 = vmul.f32 0.5, %v3284_v19 }
0x20a2   :  { %v3293_v23 = vmul.f32 %v3291_v21, %v3281_v29  ;;  %v3292_v24 = vmul.f32 %v3290_v22, %v3284_v19 }
0x20a4   :  { %v3295_v26 = vadd.f32 %v3293_v23, %v3281_v29  ;;  %v3294_v27 = vmul.f32 %v3292_v24, %v3284_v19 }
0x20a6   :  { %v3297_v31 = vmul.f32 0.7978846, %v3295_v26  ;;  %v3296_v34 = vadd.f32 %v3294_v27, %v3284_v19 }
0x20a8   :  { %4221 = vtanh.f32 %v3297_v31  ;;  %v3298_v17 = vmul.f32 0.7978846, %v3296_v34 }
0x20aa   :  { %4223 = vtanh.f32 %v3298_v17 }
0x20b2   :  { %v4222_v37 = vpop.eup %4221 }
0x20b3   :  { %v3301_v38 = vadd.f32 1.0, %v4222_v37 }
0x20b4   :  { %v4224_v11 = vpop.eup %4223 }
0x20b5   :  { %v3302_v41 = vadd.f32 1.0, %v4224_v11  ;;  %v3303_v51 = vmul.f32 %v3301_v38, %v3287_v39 }
0x20b7   :  { %v3304_v54 = vmul.f32 %v3302_v41, %v3288_v5 }
0x20b9   :  { %v3305_v32 = vpack.c.bf16 %v3304_v54, %v3303_v51 }
0x20bb   :  { %4037 = vmatmul.mubr.bf16.vlgmr.msra.gmra.mrb[84].mxu0 %v3305_v32 }
0x218e   :  { %v3404_v25 = vpop.f32.mrb[84].mxu0 }
0x218f   :  { %v3411_v44 = vadd.f32 %v3404_v25, %v5140_v40  ;;  %v4038_v45 = vpop.f32.mrb[85].mxu0 }
0x2190   :  { %v3407_v28 = vpop.f32.mrb[86].mxu0 }
0x2191   :  { %v3420_v46 = vadd.f32 %v3573_v0, %v3411_v44  ;;  %v3412_v53 = vadd.f32 %v3407_v28, %v5143_v43  ;;  %v4039_v42 = vpop.f32.mrb[87].mxu0 }
0x2193   :  { %3422 = vst.msk [vmem:[#allocation12] sm:$0xff] %vm195_vm0, %v3420_v46  ;;  %v3421_v47 = vadd.f32 %v3573_v0, %v3412_v53 }
0x2195   :  { %3423 = vst.msk [vmem:[#allocation12 + $0x8] sm:$0xff] %vm195_vm0, %v3421_v47 }
0x2196   :  { %4326 = shalt.err (!%p4323_p8)
}
0x2197   :  { %s4327_s15 = scalar_lea.hbm %s4556_s22, 256 }
0x2198   :  { %p4328_p9 = scmp.ne.s32.totalorder %s4556_s22, %s4327_s15  ;;  %p4331_p10 = scmp.lt.u32.totalorder %s4327_s15, %s4556_s22 }
0x219a   :  { %p4333_p11 = pnand %p4331_p10, %p4328_p9 }
0x219c   :  { %4336 = shalt.err (!%p4333_p11)
}
0x219d   :  { %s4393_s23 = smov 128   ;;  %s4394_s26 = smov 8  }
0x219e   :  { %3435 = dma.vmem_to_hbm [thread:$0]  %s3430_s17, 256, %s4556_s22, [#allocation6], %s4393_s23, %s4393_s23, %s4394_s26  }
0x219f   :  { %4343 = dma.done.wait [#allocation6], 256  }
0x21a0   :  { %4344 = vsyncadd [#allocation6], 4294967040 }
0x21a1   :  { %3439 = vsyncpa [#allocation5], 1 }
0x21a2   :  { %3440 = vsyncpa [#allocation8], 1 }
0x21a3   :  { %3441 = vsyncpa [#allocation11], 1 }
0x21a4   :  { %3442 = vsyncpa [#allocation6], 1 }

</bundles_post_ra>
